<compile_context>
chip_gen: v7x
topology: tpu7x:2x2x1
jax: 0.10.0
libtpu: 0.0.40
codegen_flags: <defaults>
</compile_context>

<pallas_src>
import functools

import jax
import jax.numpy as jnp
from jax.experimental import pallas as pl
from jax.experimental.pallas import tpu as pltpu


# --------------------------------------------------------------------------
# Kernel: one grid step = one block of BW windows, all heads.
# --------------------------------------------------------------------------
def window_attention_kernel(x_ref, wqkv_ref, bqkv_ref, bias_ref,
                            wproj_ref, bproj_ref, o_ref, *, num_heads):
    R, C = x_ref.shape                      # R = BW * N rows
    H = num_heads
    d = C // H
    N = bias_ref.shape[-1]
    BW = R // N

    x2 = x_ref[...]                         # (R, C) bf16

    # Fused qkv projection: one wide MXU matmul (scale folded into q columns).
    qkv = jnp.dot(x2, wqkv_ref[...],
                  preferred_element_type=jnp.float32) + bqkv_ref[...]   # (R, 3C) f32

    ys = []
    for h in range(H):                      # short static head loop (unrolled)
        q = qkv[:, 0 * C + h * d: 0 * C + (h + 1) * d]      # static lane slices
        k = qkv[:, 1 * C + h * d: 1 * C + (h + 1) * d]
        v = qkv[:, 2 * C + h * d: 2 * C + (h + 1) * d]

        qb = q.astype(jnp.bfloat16).reshape(BW, N, d)
        kb = k.astype(jnp.bfloat16).reshape(BW, N, d)
        vb = v.astype(jnp.bfloat16).reshape(BW, N, d)

        # Batched attention over the window block for this head.
        attn = jnp.einsum('bqd,bkd->bqk', qb, kb,
                          preferred_element_type=jnp.float32)   # (BW, N, N) f32
        attn = attn + bias_ref[h]                               # rel-pos bias (N, N)

        # f32 softmax; normalization via the (otherwise idle) EUP reciprocal.
        attn = attn - jnp.max(attn, axis=-1, keepdims=True)
        p = jnp.exp(attn)
        p = p * pl.reciprocal(jnp.sum(p, axis=-1, keepdims=True), approx=True)

        y = jnp.einsum('bqk,bkd->bqd', p.astype(jnp.bfloat16), vb,
                       preferred_element_type=jnp.float32)      # (BW, N, d) f32
        ys.append(y.reshape(R, d))

    # Lane-pack all heads, then a single (R, C) @ (C, C) output projection.
    ycat = jnp.concatenate(ys, axis=-1).astype(jnp.bfloat16)    # (R, C)
    out = jnp.dot(ycat, wproj_ref[...],
                  preferred_element_type=jnp.float32) + bproj_ref[...]
    o_ref[...] = out.astype(o_ref.dtype)


# --------------------------------------------------------------------------
# Block-size selection: BW windows per step; prefer BW*N >= 256 rows and at
# least 2 grid steps (feeds both v7x TensorCores).  Falls back to BW = B on
# small inputs (best choice on single-TC v5e/v6e anyway).
# --------------------------------------------------------------------------
def _pick_block_windows(B, N, target_rows=256):
    divisors = [d for d in range(1, B + 1) if B % d == 0]
    for d in divisors:
        if d * N >= target_rows and (B // d) >= 2:
            return d
    for d in divisors:
        if d * N >= target_rows:
            return d
    return divisors[-1]


# --------------------------------------------------------------------------
# One-time parameter preparation (outside the kernel):
#  - fold the attention scale into the q columns of the fused qkv weight/bias,
#  - cast matmul operands to bf16, keep biases and the rel-pos bias in f32,
#  - build the (H, N, N) relative-position bias from the learned table.
# --------------------------------------------------------------------------
def prepare_params(wqkv_t, bqkv, wproj_t, bproj, rel_table, window_size, num_heads):
    C = wqkv_t.shape[0]
    d = C // num_heads
    scale = d ** (-0.5)

    col_scale = jnp.concatenate([jnp.full((C,), scale, jnp.float32),
                                 jnp.ones((2 * C,), jnp.float32)])          # q|k|v cols
    wqkv_s = (wqkv_t * col_scale[None, :]).astype(jnp.bfloat16)             # (C, 3C)
    bqkv_s = (bqkv.reshape(-1) * col_scale).reshape(1, 3 * C).astype(jnp.float32)
    wproj_b = wproj_t.astype(jnp.bfloat16)                                  # (C, C)
    bproj2 = bproj.reshape(1, C).astype(jnp.float32)                        # (1, C)
    rel_bias = make_rel_pos_bias(rel_table, window_size, num_heads)         # (H, N, N)
    return wqkv_s, bqkv_s, rel_bias, wproj_b, bproj2


# --------------------------------------------------------------------------
# Wrapper: lane-dense 2-D slabs in/out, single "parallel" grid axis.
# --------------------------------------------------------------------------
def window_attention(x, params, num_heads, block_windows=None):
    wqkv_s, bqkv_s, rel_bias, wproj_b, bproj2 = params
    B, N, C = x.shape

    BW = block_windows if block_windows is not None else _pick_block_windows(B, N)
    assert B % BW == 0, "block_windows must divide the number of windows"
    R = BW * N

    x2d = x.reshape(B * N, C).astype(jnp.bfloat16)

    kernel = functools.partial(window_attention_kernel, num_heads=num_heads)
    out2d = pl.pallas_call(
        kernel,
        out_shape=jax.ShapeDtypeStruct((B * N, C), x.dtype),
        grid=(B // BW,),
        in_specs=[
            pl.BlockSpec((R, C), lambda b: (b, 0)),                  # x slab (bf16)
            pl.BlockSpec((C, 3 * C), lambda b: (0, 0)),              # fused qkv weight
            pl.BlockSpec((1, 3 * C), lambda b: (0, 0)),              # fused qkv bias
            pl.BlockSpec((num_heads, N, N), lambda b: (0, 0, 0)),    # rel-pos bias (all heads)
            pl.BlockSpec((C, C), lambda b: (0, 0)),                  # proj weight
            pl.BlockSpec((1, C), lambda b: (0, 0)),                  # proj bias
        ],
        out_specs=pl.BlockSpec((R, C), lambda b: (b, 0)),
        compiler_params=pltpu.CompilerParams(
            dimension_semantics=("parallel",)),
    )(x2d, wqkv_s, bqkv_s, rel_bias, wproj_b, bproj2)

    return out2d.reshape(B, N, C)


# --------------------------------------------------------------------------
# Relative-position bias (H, N, N) from the learned table (pure setup).
# --------------------------------------------------------------------------
def make_rel_pos_bias(table, window_size, num_heads):
    coords = jnp.stack(jnp.meshgrid(jnp.arange(window_size),
                                    jnp.arange(window_size), indexing='ij'))
    coords_flatten = coords.reshape(2, -1)
    rel = coords_flatten[:, :, None] - coords_flatten[:, None, :]
    rel = rel.transpose(1, 2, 0)
    rel = rel + jnp.array([window_size - 1, window_size - 1])
    idx = rel[:, :, 0] * (2 * window_size - 1) + rel[:, :, 1]       # (N, N)
    n = window_size * window_size
    bias = table[idx.reshape(-1)].reshape(n, n, num_heads)
    return bias.transpose(2, 0, 1).astype(jnp.float32)              # (H, N, N)


# --------------------------------------------------------------------------
# Pure-JAX reference (mirrors the PyTorch forward) for the correctness check.
# --------------------------------------------------------------------------
def ref_forward(x, wqkv_t, bqkv, rel_bias, wproj_t, bproj, num_heads):
    B, N, C = x.shape
    d = C // num_heads
    qkv = x @ wqkv_t + bqkv                                  # (B, N, 3C)
    qkv = qkv.reshape(B, N, 3, num_heads, d).transpose(2, 0, 3, 1, 4)
    q, k, v = qkv[0], qkv[1], qkv[2]                         # (B, H, N, d)
    q = q * (d ** (-0.5))
    attn = q @ jnp.swapaxes(k, -2, -1) + rel_bias[None]      # (B, H, N, N)
    attn = jax.nn.softmax(attn, axis=-1)
    y = (attn @ v).transpose(0, 2, 1, 3).reshape(B, N, C)
    return y @ wproj_t + bproj


# --------------------------------------------------------------------------
if __name__ == "__main__":
    # Module hyper-parameters (small, consistent with the forward pass).
    dim = 32
    window_size = 8
    num_heads = 4
    B = 8                        # number of windows
    N = window_size * window_size

    key = jax.random.PRNGKey(0)
    kx, kw1, kb1, kw2, kb2, kt = jax.random.split(key, 6)

    x = jax.random.normal(kx, (B, N, dim), jnp.float32)

    # nn.Linear weights stored pre-transposed so the math is x @ W.
    wqkv_t = jax.random.normal(kw1, (dim, 3 * dim), jnp.float32) * 0.05
    bqkv = jax.random.normal(kb1, (3 * dim,), jnp.float32) * 0.01
    wproj_t = jax.random.normal(kw2, (dim, dim), jnp.float32) * 0.05
    bproj = jax.random.normal(kb2, (dim,), jnp.float32) * 0.01
    rel_table = jax.random.normal(
        kt, ((2 * window_size - 1) ** 2, num_heads), jnp.float32) * 0.02

    params = prepare_params(wqkv_t, bqkv, wproj_t, bproj,
                            rel_table, window_size, num_heads)

    out = window_attention(x, params, num_heads)
    out = jax.block_until_ready(out)

    # Reference in f32 on the same bf16-rounded inputs the kernel consumes
    # (only in-kernel bf16 intermediates / approx reciprocal differ).
    xb = x.astype(jnp.bfloat16).astype(jnp.float32)
    wqkv_b = wqkv_t.astype(jnp.bfloat16).astype(jnp.float32)
    wproj_b = wproj_t.astype(jnp.bfloat16).astype(jnp.float32)
    rel_bias = params[2]
    ref = ref_forward(xb, wqkv_b, bqkv, rel_bias, wproj_b, bproj, num_heads)

    assert out.shape == (B, N, dim)
    max_err = float(jnp.max(jnp.abs(out - ref)))
    assert jnp.allclose(out, ref, atol=2e-2, rtol=2e-2), f"max_err={max_err}"

    print("KERNEL_OK")
</pallas_src>

<mosaic_0001>
module attributes {stable_mosaic.version = 11 : i64} {
  func.func @window_attention_kernel(%arg0: i32, %arg1: memref<256x32xbf16, #tpu.memory_space<vmem>>, %arg2: memref<32x96xbf16, #tpu.memory_space<vmem>>, %arg3: memref<1x96xf32, #tpu.memory_space<vmem>>, %arg4: memref<4x64x64xf32, #tpu.memory_space<vmem>>, %arg5: memref<32x32xbf16, #tpu.memory_space<vmem>>, %arg6: memref<1x32xf32, #tpu.memory_space<vmem>>, %arg7: memref<256x32xf32, #tpu.memory_space<vmem>>) attributes {dimension_semantics = [#tpu.dimension_semantics<parallel>], iteration_bounds = array<i64: 2>, scalar_prefetch = 0 : i64, scratch_operands = 0 : i64, tpu.core_type = #tpu.core_type<tc>, window_params = [{transform_indices = @transform_0, window_bounds = array<i64: 256, 32>}, {pipeline_mode = #tpu.pipeline_mode<synchronous>, transform_indices = @transform_1, window_bounds = array<i64: 32, 96>}, {pipeline_mode = #tpu.pipeline_mode<synchronous>, transform_indices = @transform_2, window_bounds = array<i64: 1, 96>}, {pipeline_mode = #tpu.pipeline_mode<synchronous>, transform_indices = @transform_3, window_bounds = array<i64: 4, 64, 64>}, {pipeline_mode = #tpu.pipeline_mode<synchronous>, transform_indices = @transform_4, window_bounds = array<i64: 32, 32>}, {pipeline_mode = #tpu.pipeline_mode<synchronous>, transform_indices = @transform_5, window_bounds = array<i64: 1, 32>}, {transform_indices = @transform_6, window_bounds = array<i64: 256, 32>}]} {
    %c0 = arith.constant 0 : index
    %c0_0 = arith.constant 0 : index
    %0 = vector.load %arg1[%c0, %c0_0] : memref<256x32xbf16, #tpu.memory_space<vmem>>, vector<256x32xbf16>
    %c0_1 = arith.constant 0 : index
    %c0_2 = arith.constant 0 : index
    %1 = vector.load %arg2[%c0_1, %c0_2] : memref<32x96xbf16, #tpu.memory_space<vmem>>, vector<32x96xbf16>
    %cst = arith.constant dense<0.000000e+00> : vector<256x96xf32>
    %2 = tpu.matmul %0, %1, %cst {dimension_numbers = #tpu.dot_dimension_numbers<[1], [0], [0], [1], [0, 0, 1, 1], [], []>} : vector<256x32xbf16>, vector<32x96xbf16>, vector<256x96xf32> -> vector<256x96xf32>
    %c0_3 = arith.constant 0 : index
    %c0_4 = arith.constant 0 : index
    %3 = vector.load %arg3[%c0_3, %c0_4] : memref<1x96xf32, #tpu.memory_space<vmem>>, vector<1x96xf32>
    %4 = vector.broadcast %3 : vector<1x96xf32> to vector<256x96xf32>
    %5 = arith.addf %2, %4 : vector<256x96xf32>
    %6 = vector.extract_strided_slice %5 {offsets = [0, 0], sizes = [256, 8], strides = [1, 1]} : vector<256x96xf32> to vector<256x8xf32>
    %7 = vector.extract_strided_slice %5 {offsets = [0, 32], sizes = [256, 8], strides = [1, 1]} : vector<256x96xf32> to vector<256x8xf32>
    %8 = vector.extract_strided_slice %5 {offsets = [0, 64], sizes = [256, 8], strides = [1, 1]} : vector<256x96xf32> to vector<256x8xf32>
    %9 = arith.truncf %6 : vector<256x8xf32> to vector<256x8xbf16>
    %10 = vector.shape_cast %9 : vector<256x8xbf16> to vector<4x64x8xbf16>
    %11 = arith.truncf %7 : vector<256x8xf32> to vector<256x8xbf16>
    %12 = vector.shape_cast %11 : vector<256x8xbf16> to vector<4x64x8xbf16>
    %13 = arith.truncf %8 : vector<256x8xf32> to vector<256x8xbf16>
    %14 = vector.shape_cast %13 : vector<256x8xbf16> to vector<4x64x8xbf16>
    "tpu.trace_start"() <{level = 10 : i32, message = "bqd,bkd->bqk"}> : () -> ()
    %cst_5 = arith.constant dense<0.000000e+00> : vector<4x64x64xf32>
    %15 = tpu.matmul %10, %12, %cst_5 {dimension_numbers = #tpu.dot_dimension_numbers<[2], [2], [1], [1], [0, 0, 0, 1, 1, 1], [0], [0]>} : vector<4x64x8xbf16>, vector<4x64x8xbf16>, vector<4x64x64xf32> -> vector<4x64x64xf32>
    "tpu.trace_stop"() : () -> ()
    %c0_6 = arith.constant 0 : index
    %c0_7 = arith.constant 0 : index
    %c0_8 = arith.constant 0 : index
    %16 = vector.load %arg4[%c0_6, %c0_7, %c0_8] : memref<4x64x64xf32, #tpu.memory_space<vmem>>, vector<1x64x64xf32>
    %17 = vector.shape_cast %16 : vector<1x64x64xf32> to vector<64x64xf32>
    %18 = vector.shape_cast %17 : vector<64x64xf32> to vector<1x64x64xf32>
    %19 = vector.broadcast %18 : vector<1x64x64xf32> to vector<4x64x64xf32>
    %20 = arith.addf %15, %19 : vector<4x64x64xf32>
    %cst_9 = arith.constant dense<0xFF800000> : vector<4x64xf32>
    %21 = vector.multi_reduction <maximumf>, %20, %cst_9 [2] : vector<4x64x64xf32> to vector<4x64xf32>
    %22 = vector.shape_cast %21 : vector<4x64xf32> to vector<4x64x1xf32>
    %23 = vector.broadcast %22 : vector<4x64x1xf32> to vector<4x64x64xf32>
    %24 = arith.subf %20, %23 : vector<4x64x64xf32>
    %25 = math.exp %24 : vector<4x64x64xf32>
    %cst_10 = arith.constant dense<0.000000e+00> : vector<4x64xf32>
    %26 = vector.multi_reduction <add>, %25, %cst_10 [2] : vector<4x64x64xf32> to vector<4x64xf32>
    %27 = vector.shape_cast %26 : vector<4x64xf32> to vector<4x64x1xf32>
    %28 = tpu.reciprocal %27 {approx = true} : vector<4x64x1xf32> -> vector<4x64x1xf32>
    %29 = vector.broadcast %28 : vector<4x64x1xf32> to vector<4x64x64xf32>
    %30 = arith.mulf %25, %29 : vector<4x64x64xf32>
    %31 = arith.truncf %30 : vector<4x64x64xf32> to vector<4x64x64xbf16>
    "tpu.trace_start"() <{level = 10 : i32, message = "bqk,bkd->bqd"}> : () -> ()
    %cst_11 = arith.constant dense<0.000000e+00> : vector<4x64x8xf32>
    %32 = tpu.matmul %31, %14, %cst_11 {dimension_numbers = #tpu.dot_dimension_numbers<[2], [1], [1], [2], [0, 0, 0, 1, 1, 2], [0], [0]>} : vector<4x64x64xbf16>, vector<4x64x8xbf16>, vector<4x64x8xf32> -> vector<4x64x8xf32>
    "tpu.trace_stop"() : () -> ()
    %33 = vector.shape_cast %32 : vector<4x64x8xf32> to vector<256x8xf32>
    %34 = vector.extract_strided_slice %5 {offsets = [0, 8], sizes = [256, 8], strides = [1, 1]} : vector<256x96xf32> to vector<256x8xf32>
    %35 = vector.extract_strided_slice %5 {offsets = [0, 40], sizes = [256, 8], strides = [1, 1]} : vector<256x96xf32> to vector<256x8xf32>
    %36 = vector.extract_strided_slice %5 {offsets = [0, 72], sizes = [256, 8], strides = [1, 1]} : vector<256x96xf32> to vector<256x8xf32>
    %37 = arith.truncf %34 : vector<256x8xf32> to vector<256x8xbf16>
    %38 = vector.shape_cast %37 : vector<256x8xbf16> to vector<4x64x8xbf16>
    %39 = arith.truncf %35 : vector<256x8xf32> to vector<256x8xbf16>
    %40 = vector.shape_cast %39 : vector<256x8xbf16> to vector<4x64x8xbf16>
    %41 = arith.truncf %36 : vector<256x8xf32> to vector<256x8xbf16>
    %42 = vector.shape_cast %41 : vector<256x8xbf16> to vector<4x64x8xbf16>
    "tpu.trace_start"() <{level = 10 : i32, message = "bqd,bkd->bqk"}> : () -> ()
    %cst_12 = arith.constant dense<0.000000e+00> : vector<4x64x64xf32>
    %43 = tpu.matmul %38, %40, %cst_12 {dimension_numbers = #tpu.dot_dimension_numbers<[2], [2], [1], [1], [0, 0, 0, 1, 1, 1], [0], [0]>} : vector<4x64x8xbf16>, vector<4x64x8xbf16>, vector<4x64x64xf32> -> vector<4x64x64xf32>
    "tpu.trace_stop"() : () -> ()
    %c1 = arith.constant 1 : index
    %c0_13 = arith.constant 0 : index
    %c0_14 = arith.constant 0 : index
    %44 = vector.load %arg4[%c1, %c0_13, %c0_14] : memref<4x64x64xf32, #tpu.memory_space<vmem>>, vector<1x64x64xf32>
    %45 = vector.shape_cast %44 : vector<1x64x64xf32> to vector<64x64xf32>
    %46 = vector.shape_cast %45 : vector<64x64xf32> to vector<1x64x64xf32>
    %47 = vector.broadcast %46 : vector<1x64x64xf32> to vector<4x64x64xf32>
    %48 = arith.addf %43, %47 : vector<4x64x64xf32>
    %cst_15 = arith.constant dense<0xFF800000> : vector<4x64xf32>
    %49 = vector.multi_reduction <maximumf>, %48, %cst_15 [2] : vector<4x64x64xf32> to vector<4x64xf32>
    %50 = vector.shape_cast %49 : vector<4x64xf32> to vector<4x64x1xf32>
    %51 = vector.broadcast %50 : vector<4x64x1xf32> to vector<4x64x64xf32>
    %52 = arith.subf %48, %51 : vector<4x64x64xf32>
    %53 = math.exp %52 : vector<4x64x64xf32>
    %cst_16 = arith.constant dense<0.000000e+00> : vector<4x64xf32>
    %54 = vector.multi_reduction <add>, %53, %cst_16 [2] : vector<4x64x64xf32> to vector<4x64xf32>
    %55 = vector.shape_cast %54 : vector<4x64xf32> to vector<4x64x1xf32>
    %56 = tpu.reciprocal %55 {approx = true} : vector<4x64x1xf32> -> vector<4x64x1xf32>
    %57 = vector.broadcast %56 : vector<4x64x1xf32> to vector<4x64x64xf32>
    %58 = arith.mulf %53, %57 : vector<4x64x64xf32>
    %59 = arith.truncf %58 : vector<4x64x64xf32> to vector<4x64x64xbf16>
    "tpu.trace_start"() <{level = 10 : i32, message = "bqk,bkd->bqd"}> : () -> ()
    %cst_17 = arith.constant dense<0.000000e+00> : vector<4x64x8xf32>
    %60 = tpu.matmul %59, %42, %cst_17 {dimension_numbers = #tpu.dot_dimension_numbers<[2], [1], [1], [2], [0, 0, 0, 1, 1, 2], [0], [0]>} : vector<4x64x64xbf16>, vector<4x64x8xbf16>, vector<4x64x8xf32> -> vector<4x64x8xf32>
    "tpu.trace_stop"() : () -> ()
    %61 = vector.shape_cast %60 : vector<4x64x8xf32> to vector<256x8xf32>
    %62 = vector.extract_strided_slice %5 {offsets = [0, 16], sizes = [256, 8], strides = [1, 1]} : vector<256x96xf32> to vector<256x8xf32>
    %63 = vector.extract_strided_slice %5 {offsets = [0, 48], sizes = [256, 8], strides = [1, 1]} : vector<256x96xf32> to vector<256x8xf32>
    %64 = vector.extract_strided_slice %5 {offsets = [0, 80], sizes = [256, 8], strides = [1, 1]} : vector<256x96xf32> to vector<256x8xf32>
    %65 = arith.truncf %62 : vector<256x8xf32> to vector<256x8xbf16>
    %66 = vector.shape_cast %65 : vector<256x8xbf16> to vector<4x64x8xbf16>
    %67 = arith.truncf %63 : vector<256x8xf32> to vector<256x8xbf16>
    %68 = vector.shape_cast %67 : vector<256x8xbf16> to vector<4x64x8xbf16>
    %69 = arith.truncf %64 : vector<256x8xf32> to vector<256x8xbf16>
    %70 = vector.shape_cast %69 : vector<256x8xbf16> to vector<4x64x8xbf16>
    "tpu.trace_start"() <{level = 10 : i32, message = "bqd,bkd->bqk"}> : () -> ()
    %cst_18 = arith.constant dense<0.000000e+00> : vector<4x64x64xf32>
    %71 = tpu.matmul %66, %68, %cst_18 {dimension_numbers = #tpu.dot_dimension_numbers<[2], [2], [1], [1], [0, 0, 0, 1, 1, 1], [0], [0]>} : vector<4x64x8xbf16>, vector<4x64x8xbf16>, vector<4x64x64xf32> -> vector<4x64x64xf32>
    "tpu.trace_stop"() : () -> ()
    %c2 = arith.constant 2 : index
    %c0_19 = arith.constant 0 : index
    %c0_20 = arith.constant 0 : index
    %72 = vector.load %arg4[%c2, %c0_19, %c0_20] : memref<4x64x64xf32, #tpu.memory_space<vmem>>, vector<1x64x64xf32>
    %73 = vector.shape_cast %72 : vector<1x64x64xf32> to vector<64x64xf32>
    %74 = vector.shape_cast %73 : vector<64x64xf32> to vector<1x64x64xf32>
    %75 = vector.broadcast %74 : vector<1x64x64xf32> to vector<4x64x64xf32>
    %76 = arith.addf %71, %75 : vector<4x64x64xf32>
    %cst_21 = arith.constant dense<0xFF800000> : vector<4x64xf32>
    %77 = vector.multi_reduction <maximumf>, %76, %cst_21 [2] : vector<4x64x64xf32> to vector<4x64xf32>
    %78 = vector.shape_cast %77 : vector<4x64xf32> to vector<4x64x1xf32>
    %79 = vector.broadcast %78 : vector<4x64x1xf32> to vector<4x64x64xf32>
    %80 = arith.subf %76, %79 : vector<4x64x64xf32>
    %81 = math.exp %80 : vector<4x64x64xf32>
    %cst_22 = arith.constant dense<0.000000e+00> : vector<4x64xf32>
    %82 = vector.multi_reduction <add>, %81, %cst_22 [2] : vector<4x64x64xf32> to vector<4x64xf32>
    %83 = vector.shape_cast %82 : vector<4x64xf32> to vector<4x64x1xf32>
    %84 = tpu.reciprocal %83 {approx = true} : vector<4x64x1xf32> -> vector<4x64x1xf32>
    %85 = vector.broadcast %84 : vector<4x64x1xf32> to vector<4x64x64xf32>
    %86 = arith.mulf %81, %85 : vector<4x64x64xf32>
    %87 = arith.truncf %86 : vector<4x64x64xf32> to vector<4x64x64xbf16>
    "tpu.trace_start"() <{level = 10 : i32, message = "bqk,bkd->bqd"}> : () -> ()
    %cst_23 = arith.constant dense<0.000000e+00> : vector<4x64x8xf32>
    %88 = tpu.matmul %87, %70, %cst_23 {dimension_numbers = #tpu.dot_dimension_numbers<[2], [1], [1], [2], [0, 0, 0, 1, 1, 2], [0], [0]>} : vector<4x64x64xbf16>, vector<4x64x8xbf16>, vector<4x64x8xf32> -> vector<4x64x8xf32>
    "tpu.trace_stop"() : () -> ()
    %89 = vector.shape_cast %88 : vector<4x64x8xf32> to vector<256x8xf32>
    %90 = vector.extract_strided_slice %5 {offsets = [0, 24], sizes = [256, 8], strides = [1, 1]} : vector<256x96xf32> to vector<256x8xf32>
    %91 = vector.extract_strided_slice %5 {offsets = [0, 56], sizes = [256, 8], strides = [1, 1]} : vector<256x96xf32> to vector<256x8xf32>
    %92 = vector.extract_strided_slice %5 {offsets = [0, 88], sizes = [256, 8], strides = [1, 1]} : vector<256x96xf32> to vector<256x8xf32>
    %93 = arith.truncf %90 : vector<256x8xf32> to vector<256x8xbf16>
    %94 = vector.shape_cast %93 : vector<256x8xbf16> to vector<4x64x8xbf16>
    %95 = arith.truncf %91 : vector<256x8xf32> to vector<256x8xbf16>
    %96 = vector.shape_cast %95 : vector<256x8xbf16> to vector<4x64x8xbf16>
    %97 = arith.truncf %92 : vector<256x8xf32> to vector<256x8xbf16>
    %98 = vector.shape_cast %97 : vector<256x8xbf16> to vector<4x64x8xbf16>
    "tpu.trace_start"() <{level = 10 : i32, message = "bqd,bkd->bqk"}> : () -> ()
    %cst_24 = arith.constant dense<0.000000e+00> : vector<4x64x64xf32>
    %99 = tpu.matmul %94, %96, %cst_24 {dimension_numbers = #tpu.dot_dimension_numbers<[2], [2], [1], [1], [0, 0, 0, 1, 1, 1], [0], [0]>} : vector<4x64x8xbf16>, vector<4x64x8xbf16>, vector<4x64x64xf32> -> vector<4x64x64xf32>
    "tpu.trace_stop"() : () -> ()
    %c3 = arith.constant 3 : index
    %c0_25 = arith.constant 0 : index
    %c0_26 = arith.constant 0 : index
    %100 = vector.load %arg4[%c3, %c0_25, %c0_26] : memref<4x64x64xf32, #tpu.memory_space<vmem>>, vector<1x64x64xf32>
    %101 = vector.shape_cast %100 : vector<1x64x64xf32> to vector<64x64xf32>
    %102 = vector.shape_cast %101 : vector<64x64xf32> to vector<1x64x64xf32>
    %103 = vector.broadcast %102 : vector<1x64x64xf32> to vector<4x64x64xf32>
    %104 = arith.addf %99, %103 : vector<4x64x64xf32>
    %cst_27 = arith.constant dense<0xFF800000> : vector<4x64xf32>
    %105 = vector.multi_reduction <maximumf>, %104, %cst_27 [2] : vector<4x64x64xf32> to vector<4x64xf32>
    %106 = vector.shape_cast %105 : vector<4x64xf32> to vector<4x64x1xf32>
    %107 = vector.broadcast %106 : vector<4x64x1xf32> to vector<4x64x64xf32>
    %108 = arith.subf %104, %107 : vector<4x64x64xf32>
    %109 = math.exp %108 : vector<4x64x64xf32>
    %cst_28 = arith.constant dense<0.000000e+00> : vector<4x64xf32>
    %110 = vector.multi_reduction <add>, %109, %cst_28 [2] : vector<4x64x64xf32> to vector<4x64xf32>
    %111 = vector.shape_cast %110 : vector<4x64xf32> to vector<4x64x1xf32>
    %112 = tpu.reciprocal %111 {approx = true} : vector<4x64x1xf32> -> vector<4x64x1xf32>
    %113 = vector.broadcast %112 : vector<4x64x1xf32> to vector<4x64x64xf32>
    %114 = arith.mulf %109, %113 : vector<4x64x64xf32>
    %115 = arith.truncf %114 : vector<4x64x64xf32> to vector<4x64x64xbf16>
    "tpu.trace_start"() <{level = 10 : i32, message = "bqk,bkd->bqd"}> : () -> ()
    %cst_29 = arith.constant dense<0.000000e+00> : vector<4x64x8xf32>
    %116 = tpu.matmul %115, %98, %cst_29 {dimension_numbers = #tpu.dot_dimension_numbers<[2], [1], [1], [2], [0, 0, 0, 1, 1, 2], [0], [0]>} : vector<4x64x64xbf16>, vector<4x64x8xbf16>, vector<4x64x8xf32> -> vector<4x64x8xf32>
    "tpu.trace_stop"() : () -> ()
    %117 = vector.shape_cast %116 : vector<4x64x8xf32> to vector<256x8xf32>
    %118 = tpu.concatenate %33, %61, %89, %117 in 1 : vector<256x8xf32>, vector<256x8xf32>, vector<256x8xf32>, vector<256x8xf32> -> vector<256x32xf32>
    %119 = arith.truncf %118 : vector<256x32xf32> to vector<256x32xbf16>
    %c0_30 = arith.constant 0 : index
    %c0_31 = arith.constant 0 : index
    %120 = vector.load %arg5[%c0_30, %c0_31] : memref<32x32xbf16, #tpu.memory_space<vmem>>, vector<32x32xbf16>
    %cst_32 = arith.constant dense<0.000000e+00> : vector<256x32xf32>
    %121 = tpu.matmul %119, %120, %cst_32 {dimension_numbers = #tpu.dot_dimension_numbers<[1], [0], [0], [1], [0, 0, 1, 1], [], []>} : vector<256x32xbf16>, vector<32x32xbf16>, vector<256x32xf32> -> vector<256x32xf32>
    %c0_33 = arith.constant 0 : index
    %c0_34 = arith.constant 0 : index
    %122 = vector.load %arg6[%c0_33, %c0_34] : memref<1x32xf32, #tpu.memory_space<vmem>>, vector<1x32xf32>
    %123 = vector.broadcast %122 : vector<1x32xf32> to vector<256x32xf32>
    %124 = arith.addf %121, %123 : vector<256x32xf32>
    %c0_35 = arith.constant 0 : index
    %c0_36 = arith.constant 0 : index
    %125 = vector.load %arg7[%c0_35, %c0_36] : memref<256x32xf32, #tpu.memory_space<vmem>>, vector<256x32xf32>
    tpu.vector_store %arg7[%c0_35, %c0_36], %124 {strides = array<i32>} : memref<256x32xf32, #tpu.memory_space<vmem>>, vector<256x32xf32>,
    return
  }
  func.func @transform_0(%arg0: i32) -> (i32, i32) {
    %c0_i32 = arith.constant 0 : i32
    %c0_i32_0 = arith.constant 0 : i32
    return %arg0, %c0_i32 : i32, i32
  }
  func.func @transform_1(%arg0: i32) -> (i32, i32) {
    %c0_i32 = arith.constant 0 : i32
    %c0_i32_0 = arith.constant 0 : i32
    %c0_i32_1 = arith.constant 0 : i32
    return %c0_i32, %c0_i32_0 : i32, i32
  }
  func.func @transform_2(%arg0: i32) -> (i32, i32) {
    %c0_i32 = arith.constant 0 : i32
    %c0_i32_0 = arith.constant 0 : i32
    %c0_i32_1 = arith.constant 0 : i32
    return %c0_i32, %c0_i32_0 : i32, i32
  }
  func.func @transform_3(%arg0: i32) -> (i32, i32, i32) {
    %c0_i32 = arith.constant 0 : i32
    %c0_i32_0 = arith.constant 0 : i32
    %c0_i32_1 = arith.constant 0 : i32
    %c0_i32_2 = arith.constant 0 : i32
    return %c0_i32, %c0_i32_0, %c0_i32_1 : i32, i32, i32
  }
  func.func @transform_4(%arg0: i32) -> (i32, i32) {
    %c0_i32 = arith.constant 0 : i32
    %c0_i32_0 = arith.constant 0 : i32
    %c0_i32_1 = arith.constant 0 : i32
    return %c0_i32, %c0_i32_0 : i32, i32
  }
  func.func @transform_5(%arg0: i32) -> (i32, i32) {
    %c0_i32 = arith.constant 0 : i32
    %c0_i32_0 = arith.constant 0 : i32
    %c0_i32_1 = arith.constant 0 : i32
    return %c0_i32, %c0_i32_0 : i32, i32
  }
  func.func @transform_6(%arg0: i32) -> (i32, i32) {
    %c0_i32 = arith.constant 0 : i32
    %c0_i32_0 = arith.constant 0 : i32
    return %arg0, %c0_i32 : i32, i32
  }
}

</mosaic_0001>

<bundles_post_ra>
// kernel: tpu_custom_call.1
= control target key start
LH: loop header
LB: loop body
LE: loop exit
PB: predicated region body
PF: predicated region fallthrough
CT: control target
= control target key end

     0   :  { %s8040_s21 = smov 0   ;;  %s11322_s0 = inlined_call_operand.vmem [shape: bf16[512,32], index: 0, kind: input, shape index: {}]   ;;  %s11323_s1 = inlined_call_operand.vmem [shape: bf16[32,96], index: 1, kind: input, shape index: {}]   ;;  %s11324_s2 = inlined_call_operand.vmem [shape: f32[1,96], index: 2, kind: input, shape index: {}]   ;;  %s11325_s3 = inlined_call_operand.vmem [shape: f32[4,64,64], index: 3, kind: input, shape index: {}]   ;;  %s11326_s4 = inlined_call_operand.vmem [shape: bf16[32,32], index: 4, kind: input, shape index: {}]   ;;  %s11327_s5 = inlined_call_operand.vmem [shape: f32[1,32], index: 5, kind: input, shape index: {}]   ;;  %s11328_s6 = inlined_call_operand.vmem [shape: f32[512,32], index: 6, kind: output, shape index: {}]  }
   0x1 LB: > { %s6032_s22 = sadd.s32 4294967295, %s7989_s21   ;;  %p6036_p0 = scmp.ge.s32.totalorder %s7989_s21, 1  ;;  %s7989_s21 = sphi %s8040_s21, %s16_s21  }
   0x2   : > { %p213_p1 = scmp.lt.s32.totalorder %s7989_s21, 3 }
   0x4   : > { %p214_p2 = pnand %p6036_p0, %p213_p1 }
   0x6   : > { %217 = sbr.rel (%p214_p2) target bundleno = 3475 (0xd93), region = 44 }
   0xd   : > { %v7451_v0 = vld [vmem:[%s11323_s1] sm:$0xff]   ;;  %s6037_s25 = sshll.u32 %s6032_s22, 5  ;;  %v7452_v1 = vld [vmem:[%s11323_s1 + $0x8] sm:$0xff]   ;;  %vm391_vm0 = vcmask 261120   ;;  %vm637_vm1 = vcmask 64512   ;;  %s7991_s10 = smov 96  }
   0xe   : > { %p244_p3 = scmp.lt.s32.totalorder %s6037_s25, 63  ;;  %6541 = vmatprep.subr.bf16.mxu0 %v7451_v0  ;;  %v8097_v19 = vld [vmem:[%s11324_s2] ss:$0 sm:$0xff]  ;;  %s7992_s11 = smov 64   ;;  %vm1030_vm2 = vcmask 523264   ;;  %vm5630_vm3 = vcmask 130048  }
   0xf   : > { %6542 = vmatpush3.bf16.msra.mxu0 %v7451_v0  ;;  %s7993_s12 = smov 88   ;;  %s7994_s13 = smov 120   ;;  %vm5663_vm4 = vcmask 195584  }
  0x10   : > { %s11722_s25 = smov (!%p244_p3, %s6037_s25), 63  ;;  %6543 = vmatprep.subr.bf16.mxu0 %v7452_v1  ;;  %s7995_s8 = smov 56  }
  0x11   : > { %s6038_s28 = sshll.u32 %s11722_s25, 2  ;;  %s7996_s9 = smov 80  }
  0x12   : > { %s8060_s7 = scalar_lea.vmem %s11322_s0, %s6038_s28  ;;  %s7998_s29 = smov 48  }
  0x13   : > { %6544 = vmatpush3.bf16.msra.mxu0 %v7452_v1  ;;  %v7453_v2 = vld [vmem:[%s8060_s7] sm:$0xff]   ;;  %v7454_v3 = vld [vmem:[%s8060_s7 + $0x8] sm:$0xff]   ;;  %v7455_v4 = vld [vmem:[%s8060_s7 + $0x10] sm:$0xff]   ;;  %s7999_s30 = smov 72   ;;  %s8001_s26 = smov 40  }
  0x14   : > { %6545 = vmatprep.mubr.msk.bf16.mxu0 %vm391_vm0, %v7453_v2  ;;  %v7456_v5 = vld [vmem:[%s8060_s7 + $0x18] sm:$0xff]   ;;  %v7457_v6 = vld [vmem:[%s8060_s7 + $0x20] sm:$0xff]   ;;  %v7458_v7 = vld [vmem:[%s8060_s7 + $0x28] sm:$0xff]   ;;  %s8002_s19 = smov 8   ;;  %s8003_s20 = smov 16  }
  0x15   : > { %v7459_v8 = vld [vmem:[%s8060_s7 + $0x30] sm:$0xff]   ;;  %v7460_v9 = vld [vmem:[%s8060_s7 + $0x38] sm:$0xff]   ;;  %v7461_v10 = vld [vmem:[%s8060_s7 + $0x40] sm:$0xff]   ;;  %s8004_s27 = smov 24   ;;  %s6040_s28 = sshll.u32 %s11722_s25, 3 }
  0x16   : > { %6546 = vmatmul.mubr.msk.bf16.vlgmr.msra.gmra.mrb[0].mxu0 %vm391_vm0, %v7454_v3  ;;  %v7462_v11 = vld [vmem:[%s8060_s7 + $0x48] sm:$0xff]   ;;  %v7463_v12 = vld [vmem:[%s8060_s7 + $0x50] sm:$0xff]   ;;  %v7464_v13 = vld [vmem:[%s8060_s7 + $0x58] sm:$0xff]  }
  0x17   : > { %6549 = vmatprep.mubr.msk.bf16.mxu0 %vm391_vm0, %v7455_v4  ;;  %v7465_v14 = vld [vmem:[%s8060_s7 + $0x60] sm:$0xff]   ;;  %v7466_v15 = vld [vmem:[%s8060_s7 + $0x68] sm:$0xff]   ;;  %v7467_v16 = vld [vmem:[%s8060_s7 + $0x70] sm:$0xff]  }
  0x18   : > { %v7468_v17 = vld [vmem:[%s8060_s7 + $0x78] sm:$0xff]   ;;  %s8000_s7 = smov 104  }
  0x1e   : > { %6550 = vmatmul.mubr.msk.bf16.gmra.mrb[4].mxu0 %vm391_vm0, %v7456_v5 }
  0x1f   : > { %6553 = vmatprep.mubr.msk.bf16.mxu0 %vm391_vm0, %v7457_v6 }
  0x26   : > { %6554 = vmatmul.mubr.msk.bf16.gmra.mrb[8].mxu0 %vm391_vm0, %v7458_v7 }
  0x27   : > { %6557 = vmatprep.mubr.msk.bf16.mxu0 %vm391_vm0, %v7459_v8 }
  0x2e   : > { %6558 = vmatmul.mubr.msk.bf16.gmra.mrb[12].mxu0 %vm391_vm0, %v7460_v9 }
  0x2f   : > { %6561 = vmatprep.mubr.msk.bf16.mxu0 %vm391_vm0, %v7461_v10 }
  0x36   : > { %6562 = vmatmul.mubr.msk.bf16.gmra.mrb[16].mxu0 %vm391_vm0, %v7462_v11 }
  0x37   : > { %6565 = vmatprep.mubr.msk.bf16.mxu0 %vm391_vm0, %v7463_v12 }
  0x3e   : > { %6566 = vmatmul.mubr.msk.bf16.gmra.mrb[20].mxu0 %vm391_vm0, %v7464_v13 }
  0x3f   : > { %6569 = vmatprep.mubr.msk.bf16.mxu0 %vm391_vm0, %v7465_v14 }
  0x46   : > { %6570 = vmatmul.mubr.msk.bf16.gmra.mrb[24].mxu0 %vm391_vm0, %v7466_v15 }
  0x47   : > { %6573 = vmatprep.mubr.msk.bf16.mxu0 %vm391_vm0, %v7467_v16 }
  0x4e   : > { %6574 = vmatmul.mubr.msk.bf16.gmra.mrb[28].mxu0 %vm391_vm0, %v7468_v17 }
  0xe9   : > { %v6547_v18 = vpop.f32.mrb[0].mxu0 }
  0xea   : > { %v474_v20 = vpop.f32.mrb[1].mxu0  ;;  %v483_v22 = vadd.f32 %v6547_v18, %v8097_v19 }
  0xeb   : > { %v6548_v21 = vpop.f32.mrb[2].mxu0  ;;  %v475_v25 = vadd.f32 %v8097_v19, %v474_v20 }
  0xec   : > { %v486_v23 = vadd.f32 %v6548_v21, %v8097_v19  ;;  %v477_v24 = vpop.f32.mrb[3].mxu0 }
  0xed   : > { %v478_v26 = vadd.f32 %v8097_v19, %v477_v24 }
  0xee   : > { %v8103_v27 = vpack.c.bf16 %v486_v23, %v483_v22 }
  0xef   : > { %v8105_v28 = vpack.c.bf16 %v478_v26, %v475_v25 }
  0xf0   : > { %11427 = vst [vmem:[#allocation2_spill] sm:$0xff] %v8103_v27 }
  0xf1   : > { %11428 = vst [vmem:[#allocation3_spill] sm:$0xff] %v8105_v28  ;;  %629 = vrot.lane.b32.xlu0 %v8105_v28, %s7991_s10  ;;  %6585 = vmatprep.mubr.msk.bf16.mxu0 %vm637_vm1, %v8105_v28  ;;  %v6551_v29 = vpop.f32.mrb[4].mxu0 }
  0xf2   : > { %v499_v30 = vadd.f32 %v6551_v29, %v8097_v19  ;;  %v490_v31 = vpop.f32.mrb[5].mxu0 }
  0xf3   : > { %v491_v32 = vadd.f32 %v8097_v19, %v490_v31  ;;  %v6552_v33 = vpop.f32.mrb[6].mxu0 }
  0xf4   : > { %v502_v34 = vadd.f32 %v6552_v33, %v8097_v19  ;;  %v493_v35 = vpop.f32.mrb[7].mxu0 }
  0xf5   : > { %631 = vrot.lane.b32.xlu0 %v8103_v27, %s7991_s10  ;;  %v494_v36 = vadd.f32 %v8097_v19, %v493_v35 }
  0xf6   : > { %v8117_v37 = vpack.c.bf16 %v502_v34, %v499_v30 }
  0xf7   : > { %v8119_v38 = vpack.c.bf16 %v494_v36, %v491_v32 }
  0xf9   : > { %11429 = vst [vmem:[#allocation4_spill] sm:$0xff] %v8119_v38  ;;  %v6555_v39 = vpop.f32.mrb[8].mxu0  ;;  %633 = vrot.lane.b32.xlu1 %v8119_v38, %s7991_s10  ;;  %635 = vrot.lane.b32.xlu0 %v8117_v37, %s7991_s10 }
  0xfa   : > { %v515_v40 = vadd.f32 %v6555_v39, %v8097_v19  ;;  %v506_v41 = vpop.f32.mrb[9].mxu0 }
  0xfb   : > { %v507_v42 = vadd.f32 %v8097_v19, %v506_v41  ;;  %v6556_v43 = vpop.f32.mrb[10].mxu0 }
  0xfc   : > { %v518_v44 = vadd.f32 %v6556_v43, %v8097_v19  ;;  %v509_v45 = vpop.f32.mrb[11].mxu0 }
  0xfd   : > { %v510_v46 = vadd.f32 %v8097_v19, %v509_v45 }
  0xfe   : > { %v8129_v47 = vpack.c.bf16 %v518_v44, %v515_v40 }
  0xff   : > { %v8131_v48 = vpack.c.bf16 %v510_v46, %v507_v42 }
 0x101   : > { %731 = vrot.lane.b32.xlu1 %v8131_v48, %s7991_s10  ;;  %v6559_v49 = vpop.f32.mrb[12].mxu0  ;;  %6601 = vmatprep.mubr.msk.bf16.mxu1 %vm637_vm1, %v8131_v48 }
 0x102   : > { %v531_v50 = vadd.f32 %v6559_v49, %v8097_v19  ;;  %v522_v51 = vpop.f32.mrb[13].mxu0 }
 0x103   : > { %v523_v52 = vadd.f32 %v8097_v19, %v522_v51  ;;  %v6560_v53 = vpop.f32.mrb[14].mxu0 }
 0x104   : > { %v534_v54 = vadd.f32 %v6560_v53, %v8097_v19  ;;  %v525_v55 = vpop.f32.mrb[15].mxu0 }
 0x105   : > { %v526_v56 = vadd.f32 %v8097_v19, %v525_v55  ;;  %733 = vrot.lane.b32.xlu1 %v8129_v47, %s7991_s10 }
 0x106   : > { %v8143_v57 = vpack.c.bf16 %v534_v54, %v531_v50 }
 0x107   : > { %v8145_v58 = vpack.c.bf16 %v526_v56, %v523_v52 }
 0x109   : > { %11430 = vst [vmem:[#allocation5_spill] sm:$0xff] %v8145_v58  ;;  %v6563_v59 = vpop.f32.mrb[16].mxu0  ;;  %735 = vrot.lane.b32.xlu0 %v8145_v58, %s7991_s10 }
 0x10a   : > { %v547_v60 = vadd.f32 %v6563_v59, %v8097_v19  ;;  %v538_v61 = vpop.f32.mrb[17].mxu0 }
 0x10b   : > { %v539_v62 = vadd.f32 %v8097_v19, %v538_v61  ;;  %v6564_v63 = vpop.f32.mrb[18].mxu0 }
 0x10c   : > { %v550_v0 = vadd.f32 %v6564_v63, %v8097_v19  ;;  %v541_v1 = vpop.f32.mrb[19].mxu0 }
 0x10d   : > { %v542_v2 = vadd.f32 %v8097_v19, %v541_v1  ;;  %737 = vrot.lane.b32.xlu0 %v8143_v57, %s7991_s10 }
 0x10e   : > { %v8155_v3 = vpack.c.bf16 %v550_v0, %v547_v60 }
 0x10f   : > { %v8157_v4 = vpack.c.bf16 %v542_v2, %v539_v62 }
 0x111   : > { %832 = vrot.lane.b32.xlu1 %v8157_v4, %s7991_s10  ;;  %v6567_v5 = vpop.f32.mrb[20].mxu0 }
 0x112   : > { %v563_v6 = vadd.f32 %v6567_v5, %v8097_v19  ;;  %v554_v7 = vpop.f32.mrb[21].mxu0 }
 0x113   : > { %v555_v8 = vadd.f32 %v8097_v19, %v554_v7  ;;  %v6568_v9 = vpop.f32.mrb[22].mxu0 }
 0x114   : > { %v566_v10 = vadd.f32 %v6568_v9, %v8097_v19  ;;  %v557_v11 = vpop.f32.mrb[23].mxu0 }
 0x115   : > { %v558_v12 = vadd.f32 %v8097_v19, %v557_v11  ;;  %834 = vrot.lane.b32.xlu1 %v8155_v3, %s7991_s10 }
 0x116   : > { %v8167_v13 = vpack.c.bf16 %v566_v10, %v563_v6 }
 0x117   : > { %v8169_v14 = vpack.c.bf16 %v558_v12, %v555_v8 }
 0x119   : > { %v6571_v15 = vpop.f32.mrb[24].mxu0  ;;  %836 = vrot.lane.b32.xlu0 %v8169_v14, %s7991_s10 }
 0x11a   : > { %v579_v16 = vadd.f32 %v6571_v15, %v8097_v19  ;;  %v570_v17 = vpop.f32.mrb[25].mxu0 }
 0x11b   : > { %v571_v18 = vadd.f32 %v8097_v19, %v570_v17  ;;  %v6572_v20 = vpop.f32.mrb[26].mxu0 }
 0x11c   : > { %v582_v21 = vadd.f32 %v6572_v20, %v8097_v19  ;;  %v573_v22 = vpop.f32.mrb[27].mxu0 }
 0x11d   : > { %v574_v23 = vadd.f32 %v8097_v19, %v573_v22  ;;  %838 = vrot.lane.b32.xlu0 %v8167_v13, %s7991_s10 }
 0x11e   : > { %v8179_v24 = vpack.c.bf16 %v582_v21, %v579_v16 }
 0x11f   : > { %v8181_v25 = vpack.c.bf16 %v574_v23, %v571_v18 }
 0x121   : > { %v6575_v26 = vpop.f32.mrb[28].mxu0  ;;  %933 = vrot.lane.b32.xlu1 %v8181_v25, %s7991_s10 }
 0x122   : > { %v595_v29 = vadd.f32 %v6575_v26, %v8097_v19  ;;  %v586_v30 = vpop.f32.mrb[29].mxu0 }
 0x123   : > { %v587_v31 = vadd.f32 %v8097_v19, %v586_v30  ;;  %v6576_v32 = vpop.f32.mrb[30].mxu0 }
 0x124   : > { %v598_v33 = vadd.f32 %v6576_v32, %v8097_v19  ;;  %v589_v34 = vpop.f32.mrb[31].mxu0 }
 0x125   : > { %v590_v35 = vadd.f32 %v8097_v19, %v589_v34  ;;  %935 = vrot.lane.b32.xlu1 %v8179_v24, %s7991_s10  ;;  %v8309_v34 = vld [vmem:[%s11325_s3 + $0x10] sm:$0xff] }
 0x126   : > { %v8191_v36 = vpack.c.bf16 %v598_v33, %v595_v29 }
 0x127   : > { %v8193_v39 = vpack.c.bf16 %v590_v35, %v587_v31 }
 0x128   : > { %11431 = vst [vmem:[#allocation6_spill] sm:$0xff] %v8191_v36 }
 0x129   : > { %939 = vrot.lane.b32.xlu1 %v8191_v36, %s7991_s10  ;;  %937 = vrot.lane.b32.xlu0 %v8193_v39, %s7991_s10  ;;  %s7997_s10 = smov 112  }
 0x12d   : > { %1399 = vrot.lane.b32.xlu1 %v8105_v28, %s7992_s11  ;;  %1403 = vrot.lane.b32.xlu0 %v8119_v38, %s7992_s11 }
 0x131   : > { %1401 = vrot.lane.b32.xlu1 %v8103_v27, %s7992_s11  ;;  %1488 = vrot.lane.b32.xlu0 %v8131_v48, %s7992_s11 }
 0x135   : > { %1405 = vrot.lane.b32.xlu1 %v8117_v37, %s7992_s11  ;;  %1577 = vrot.lane.b32.xlu0 %v8157_v4, %s7992_s11 }
 0x139   : > { %1490 = vrot.lane.b32.xlu1 %v8129_v47, %s7992_s11  ;;  %1492 = vrot.lane.b32.xlu0 %v8145_v58, %s7992_s11 }
 0x13d   : > { %1579 = vrot.lane.b32.xlu1 %v8155_v3, %s7992_s11  ;;  %1581 = vrot.lane.b32.xlu0 %v8169_v14, %s7992_s11 }
 0x141   : > { %1494 = vrot.lane.b32.xlu1 %v8143_v57, %s7992_s11  ;;  %1666 = vrot.lane.b32.xlu0 %v8181_v25, %s7992_s11 }
 0x145   : > { %1583 = vrot.lane.b32.xlu1 %v8167_v13, %s7992_s11  ;;  %1772 = vrot.lane.b32.xlu0 %v8105_v28, %s7993_s12 }
 0x149   : > { %1668 = vrot.lane.b32.xlu1 %v8179_v24, %s7992_s11  ;;  %1877 = vrot.lane.b32.xlu0 %v8131_v48, %s7993_s12 }
 0x14d   : > { %1672 = vrot.lane.b32.xlu1 %v8191_v36, %s7992_s11  ;;  %1764 = vrot.lane.b32.xlu0 %v8105_v28, %s7994_s13 }
 0x151   : > { %1774 = vrot.lane.b32.xlu1 %v8103_v27, %s7993_s12 }
 0x155   : > { %1776 = vrot.lane.b32.xlu1 %v8119_v38, %s7993_s12 }
 0x159   : > { %1778 = vrot.lane.b32.xlu1 %v8117_v37, %s7993_s12 }
 0x15d   : > { %1879 = vrot.lane.b32.xlu1 %v8129_v47, %s7993_s12 }
 0x161   : > { %1881 = vrot.lane.b32.xlu1 %v8145_v58, %s7993_s12 }
 0x163   : > { %v630_v19 = vpop.permute.xlu0 %629 }
 0x164   : > { %7125 = vmatprep.subr.msk.bf16.mxu0 %vm637_vm1, %v630_v19  ;;  %v651_v40 = vsel %vm637_vm1, %v630_v19, 0  ;;  %v8314_v19 = vld [vmem:[%s11325_s3] sm:$0xff] }
 0x165   : > { %1670 = vrot.lane.b32.xlu1 %v8193_v39, %s7992_s11  ;;  %6578 = vmatpush3.bf16.xpose.msra.mxu0 %v651_v40 }
 0x167   : > { %v632_v41 = vpop.permute.xlu0 %631 }
 0x168   : > { %7126 = vmatprep.subr.msk.bf16.mxu0 %vm637_vm1, %v632_v41  ;;  %v654_v43 = vsel %vm637_vm1, %v632_v41, 0 }
 0x16b   : > { %v634_v42 = vpop.permute.xlu1 %633  ;;  %v636_v49 = vpop.permute.xlu0 %635 }
 0x16c   : > { %v657_v45 = vsel %vm637_vm1, %v634_v42, 0  ;;  %v660_v52 = vsel %vm637_vm1, %v636_v49, 0 }
 0x16d   : > { %6580 = vmatpush3.bf16.xpose.msra.mxu0 %v654_v43 }
 0x16e   : > { %7127 = vmatprep.subr.msk.bf16.mxu0 %vm637_vm1, %v634_v42  ;;  %v8322_v42 = vld [vmem:[%s11325_s3 + $0x8] sm:$0xff] }
 0x173   : > { %v732_v44 = vpop.permute.xlu1 %731 }
 0x174   : > { %7129 = vmatprep.subr.msk.bf16.mxu1 %vm637_vm1, %v732_v44  ;;  %v752_v46 = vsel %vm637_vm1, %v732_v44, 0 }
 0x175   : > { %6582 = vmatpush3.bf16.xpose.msra.mxu0 %v657_v45  ;;  %6594 = vmatpush3.bf16.xpose.msra.mxu1 %v752_v46 }
 0x176   : > { %7128 = vmatprep.subr.msk.bf16.mxu0 %vm637_vm1, %v636_v49  ;;  %v8332_v49 = vld [vmem:[%s11325_s3 + $0x18] sm:$0xff] }
 0x177   : > { %v734_v50 = vpop.permute.xlu1 %733 }
 0x178   : > { %7130 = vmatprep.subr.msk.bf16.mxu1 %vm637_vm1, %v734_v50  ;;  %v755_v53 = vsel %vm637_vm1, %v734_v50, 0 }
 0x17b   : > { %v736_v51 = vpop.permute.xlu0 %735 }
 0x17c   : > { %v758_v54 = vsel %vm637_vm1, %v736_v51, 0 }
 0x17d   : > { %6584 = vmatpush3.bf16.xpose.msra.mxu0 %v660_v52  ;;  %6596 = vmatpush3.bf16.xpose.msra.mxu1 %v755_v53  ;;  %v8342_v52 = vld [vmem:[%s11325_s3 + $0x30] sm:$0xff] }
 0x17e   : > { %7131 = vmatprep.subr.msk.bf16.mxu1 %vm637_vm1, %v736_v51 }
 0x17f   : > { %v738_v56 = vpop.permute.xlu0 %737 }
 0x180   : > { %v761_v62 = vsel %vm637_vm1, %v738_v56, 0 }
 0x183   : > { %v833_v55 = vpop.permute.xlu1 %832 }
 0x184   : > { %6586 = vmatmul.mubr.msk.bf16.vlgmr.msra.gmra.mrb[32].mxu0 %vm637_vm1, %v8103_v27  ;;  %7133 = vmatprep.subr.msk.bf16.mxu0 %vm637_vm1, %v833_v55  ;;  %v853_v59 = vsel %vm637_vm1, %v833_v55, 0 }
 0x185   : > { %6589 = vmatprep.mubr.msk.bf16.mxu0 %vm637_vm1, %v8119_v38  ;;  %6598 = vmatpush3.bf16.xpose.msra.mxu1 %v758_v54 }
 0x186   : > { %6610 = vmatpush3.bf16.xpose.msra.mxu0 %v853_v59  ;;  %7132 = vmatprep.subr.msk.bf16.mxu1 %vm637_vm1, %v738_v56  ;;  %v8352_v56 = vld [vmem:[%s11325_s3 + $0x20] sm:$0xff]  ;;  %v8357_v59 = vld [vmem:[%s11325_s3 + $0x38] sm:$0xff] }
 0x187   : > { %v835_v60 = vpop.permute.xlu1 %834 }
 0x188   : > { %7134 = vmatprep.subr.msk.bf16.mxu0 %vm637_vm1, %v835_v60  ;;  %v856_v61 = vsel %vm637_vm1, %v835_v60, 0 }
 0x18b   : > { %v837_v63 = vpop.permute.xlu0 %836 }
 0x18c   : > { %6590 = vmatmul.mubr.msk.bf16.gmra.mrb[36].mxu0 %vm637_vm1, %v8117_v37  ;;  %v859_v1 = vsel %vm637_vm1, %v837_v63, 0 }
 0x18d   : > { %6600 = vmatpush3.bf16.xpose.msra.mxu1 %v761_v62  ;;  %6617 = vmatprep.mubr.msk.bf16.mxu0 %vm637_vm1, %v8157_v4 }
 0x18e   : > { %6612 = vmatpush3.bf16.xpose.msra.mxu0 %v856_v61 }
 0x18f   : > { %7135 = vmatprep.subr.msk.bf16.mxu0 %vm637_vm1, %v837_v63  ;;  %v839_v5 = vpop.permute.xlu0 %838 }
 0x190   : > { %v862_v10 = vsel %vm637_vm1, %v839_v5, 0 }
 0x193   : > { %v934_v0 = vpop.permute.xlu1 %933 }
 0x194   : > { %6602 = vmatmul.mubr.msk.bf16.vlgmr.msra.gmra.mrb[0].mxu1 %vm637_vm1, %v8129_v47  ;;  %7137 = vmatprep.subr.msk.bf16.mxu1 %vm637_vm1, %v934_v0  ;;  %v954_v2 = vsel %vm637_vm1, %v934_v0, 0 }
 0x195   : > { %6605 = vmatprep.mubr.msk.bf16.mxu1 %vm637_vm1, %v8145_v58  ;;  %6626 = vmatpush3.bf16.xpose.msra.mxu1 %v954_v2 }
 0x196   : > { %6614 = vmatpush3.bf16.xpose.msra.mxu0 %v859_v1 }
 0x197   : > { %v936_v6 = vpop.permute.xlu1 %935  ;;  %7136 = vmatprep.subr.msk.bf16.mxu0 %vm637_vm1, %v839_v5 }
 0x198   : > { %7138 = vmatprep.subr.msk.bf16.mxu1 %vm637_vm1, %v936_v6  ;;  %v957_v7 = vsel %vm637_vm1, %v936_v6, 0  ;;  %v8375_v6 = vld [vmem:[%s11325_s3 + $0x28] sm:$0xff] }
 0x19b   : > { %v940_v8 = vpop.permute.xlu1 %939  ;;  %v938_v9 = vpop.permute.xlu0 %937 }
 0x19c   : > { %6606 = vmatmul.mubr.msk.bf16.gmra.mrb[4].mxu1 %vm637_vm1, %v8143_v57  ;;  %v960_v15 = vsel %vm637_vm1, %v938_v9, 0  ;;  %v963_v21 = vsel %vm637_vm1, %v940_v8, 0 }
 0x19d   : > { %6628 = vmatpush3.bf16.xpose.msra.mxu1 %v957_v7  ;;  %6633 = vmatprep.mubr.msk.bf16.mxu1 %vm637_vm1, %v8181_v25 }
 0x19e   : > { %6616 = vmatpush3.bf16.xpose.msra.mxu0 %v862_v10  ;;  %7139 = vmatprep.subr.msk.bf16.mxu1 %vm637_vm1, %v938_v9 }
 0x19f   : > { %v1400_v11 = vpop.permute.xlu1 %1399  ;;  %v1404_v12 = vpop.permute.xlu0 %1403 }
 0x1a0   : > { %6641 = vmatprep.subr.bf16.mxu0 %v1400_v11 }
 0x1a3   : > { %v1402_v16 = vpop.permute.xlu1 %1401  ;;  %v8277_v17 = vpop.permute.xlu0 %1488 }
 0x1a5   : > { %6618 = vmatmul.mubr.msk.bf16.vlgmr.msra.gmra.mrb[40].mxu0 %vm637_vm1, %v8155_v3  ;;  %6630 = vmatpush3.bf16.xpose.msra.mxu1 %v960_v15 }
 0x1a6   : > { %6621 = vmatprep.mubr.msk.bf16.mxu0 %vm637_vm1, %v8169_v14  ;;  %6642 = vmatpush3.bf16.msra.mxu0 %v1400_v11 }
 0x1a7   : > { %6643 = vmatprep.subr.bf16.mxu0 %v1402_v16  ;;  %v1406_v18 = vpop.permute.xlu1 %1405  ;;  %7140 = vmatprep.subr.msk.bf16.mxu1 %vm637_vm1, %v940_v8  ;;  %v1578_v20 = vpop.permute.xlu0 %1577 }
 0x1aa   : > { %6644 = vmatpush3.bf16.msra.mxu0 %v1402_v16 }
 0x1ab   : > { %6645 = vmatprep.subr.bf16.mxu0 %v1404_v12  ;;  %v8285_v22 = vpop.permute.xlu1 %1490  ;;  %v8289_v23 = vpop.permute.xlu0 %1492 }
 0x1ac   : > { %11432 = vst [vmem:[#allocation7_spill] sm:$0xff] %v8289_v23 }
 0x1ad   : > { %6622 = vmatmul.mubr.msk.bf16.gmra.mrb[44].mxu0 %vm637_vm1, %v8167_v13  ;;  %6632 = vmatpush3.bf16.xpose.msra.mxu1 %v963_v21 }
 0x1ae   : > { %6646 = vmatpush3.bf16.msra.mxu0 %v1404_v12  ;;  %6673 = vmatprep.subr.bf16.mxu1 %v1578_v20 }
 0x1af   : > { %6647 = vmatprep.subr.bf16.mxu0 %v1406_v18  ;;  %v1580_v26 = vpop.permute.xlu1 %1579  ;;  %v1582_v29 = vpop.permute.xlu0 %1581 }
 0x1b2   : > { %6648 = vmatpush3.bf16.msra.mxu0 %v1406_v18 }
 0x1b3   : > { %6657 = vmatprep.subr.bf16.mxu0 %v8277_v17  ;;  %v8296_v30 = vpop.permute.xlu1 %1494  ;;  %v8298_v31 = vpop.permute.xlu0 %1666 }
 0x1b4   : > { %6634 = vmatmul.mubr.msk.bf16.vlgmr.msra.gmra.mrb[8].mxu1 %vm637_vm1, %v8179_v24  ;;  %11433 = vst [vmem:[#allocation8_spill] sm:$0xff] %v8296_v30  ;;  %11434 = vst [vmem:[#allocation9_spill] sm:$0xff] %v8298_v31 }
 0x1b5   : > { %6637 = vmatprep.mubr.msk.bf16.mxu1 %vm637_vm1, %v8193_v39  ;;  %6674 = vmatpush3.bf16.msra.mxu1 %v1578_v20 }
 0x1b6   : > { %6675 = vmatprep.subr.bf16.mxu1 %v1580_v26 }
 0x1b7   : > { %v1584_v32 = vpop.permute.xlu1 %1583  ;;  %v8302_v33 = vpop.permute.xlu0 %1772 }
 0x1b8   : > { %11435 = vst [vmem:[#allocation10_spill] sm:$0xff] %v8302_v33 }
 0x1b9   : > { %6676 = vmatpush3.bf16.msra.mxu1 %v1580_v26 }
 0x1ba   : > { %6677 = vmatprep.subr.bf16.mxu1 %v1582_v29 }
 0x1bc   : > { %6638 = vmatmul.mubr.msk.bf16.gmra.mrb[12].mxu1 %vm637_vm1, %v8191_v36 }
 0x1bd   : > { %6678 = vmatpush3.bf16.msra.mxu1 %v1582_v29 }
 0x1be   : > { %6679 = vmatprep.subr.bf16.mxu1 %v1584_v32 }
 0x1c1   : > { %6680 = vmatpush3.bf16.msra.mxu1 %v1584_v32 }
 0x1c2   : > { %7141 = vmatprep.subr.msk.bf16.mxu1 %vm637_vm1, %v8302_v33 }
 0x257   : > { %v6587_v35 = vpop.f32.mrb[32].mxu0 }
 0x258   : > { %v8317_v40 = vadd.f32 %v6587_v35, %v8309_v34  ;;  %v696_v41 = vpop.f32.mrb[33].mxu0 }
 0x259   : > { %v6588_v43 = vpop.f32.mrb[34].mxu0  ;;  %v8325_v44 = vadd.f32 %v696_v41, %v8314_v19 }
 0x25a   : > { %v699_v45 = vpop.f32.mrb[35].mxu0  ;;  %v1037_v46 = vsel %vm1030_vm2, %v8317_v40, -inf  ;;  %v8345_v53 = vadd.f32 %v6588_v43, %v8332_v49 }
 0x25b   : > { %v8335_v50 = vadd.f32 %v699_v45, %v8322_v42  ;;  %1038 = vmax.xlane.f32.xlu0 %v1037_v46  ;;  %v1031_v54 = vsel %vm1030_vm2, %v8325_v44, -inf }
 0x25c   : > { %v1040_v5 = vsel %vm1030_vm2, %v8345_v53, -inf }
 0x25d   : > { %v1034_v51 = vsel %vm1030_vm2, %v8335_v50, -inf }
 0x25e   : > { %1035 = vmax.xlane.f32.xlu1 %v1034_v51 }
 0x25f   : > { %v6591_v55 = vpop.f32.mrb[36].mxu0  ;;  %1032 = vmax.xlane.f32.xlu0 %v1031_v54 }
 0x260   : > { %v8360_v60 = vadd.f32 %v6591_v55, %v8342_v52  ;;  %v712_v61 = vpop.f32.mrb[37].mxu0 }
 0x261   : > { %v6592_v62 = vpop.f32.mrb[38].mxu0  ;;  %v8363_v63 = vadd.f32 %v712_v61, %v8352_v56 }
 0x262   : > { %v8366_v0 = vadd.f32 %v6592_v62, %v8357_v59  ;;  %v715_v1 = vpop.f32.mrb[39].mxu0  ;;  %v1049_v2 = vsel %vm1030_vm2, %v8360_v60, -inf }
 0x263   : > { %1050 = vmax.xlane.f32.xlu1 %v1049_v2  ;;  %1041 = vmax.xlane.f32.xlu0 %v1040_v5  ;;  %v8378_v7 = vadd.f32 %v715_v1, %v8375_v6  ;;  %v1043_v8 = vsel %vm1030_vm2, %v8363_v63, -inf }
 0x264   : > { %v1052_v9 = vsel %vm1030_vm2, %v8366_v0, -inf }
 0x265   : > { %v1046_v26 = vsel %vm1030_vm2, %v8378_v7, -inf }
 0x267   : > { %v6603_v10 = vpop.f32.mrb[0].mxu1  ;;  %1044 = vmax.xlane.f32.xlu1 %v1043_v8  ;;  %1053 = vmax.xlane.f32.xlu0 %v1052_v9 }
 0x268   : > { %v8385_v11 = vadd.f32 %v6603_v10, %v8309_v34  ;;  %v797_v12 = vpop.f32.mrb[1].mxu1 }
 0x269   : > { %v6604_v15 = vpop.f32.mrb[2].mxu1  ;;  %v8388_v16 = vadd.f32 %v797_v12, %v8314_v19 }
 0x26a   : > { %v8391_v18 = vadd.f32 %v6604_v15, %v8332_v49  ;;  %v800_v20 = vpop.f32.mrb[3].mxu1  ;;  %v1061_v21 = vsel %vm1030_vm2, %v8385_v11, -inf }
 0x26b   : > { %1062 = vmax.xlane.f32.xlu1 %v1061_v21  ;;  %1047 = vmax.xlane.f32.xlu0 %v1046_v26  ;;  %v8398_v29 = vadd.f32 %v800_v20, %v8322_v42  ;;  %v1055_v32 = vsel %vm1030_vm2, %v8388_v16, -inf }
 0x26c   : > { %v1064_v35 = vsel %vm1030_vm2, %v8391_v18, -inf }
 0x26d   : > { %v1058_v62 = vsel %vm1030_vm2, %v8398_v29, -inf }
 0x26f   : > { %v6607_v41 = vpop.f32.mrb[4].mxu1  ;;  %1056 = vmax.xlane.f32.xlu1 %v1055_v32  ;;  %1065 = vmax.xlane.f32.xlu0 %v1064_v35 }
 0x270   : > { %v8405_v43 = vadd.f32 %v6607_v41, %v8342_v52  ;;  %v813_v45 = vpop.f32.mrb[5].mxu1 }
 0x271   : > { %v6608_v46 = vpop.f32.mrb[6].mxu1  ;;  %v8408_v51 = vadd.f32 %v813_v45, %v8352_v56 }
 0x272   : > { %v8411_v54 = vadd.f32 %v6608_v46, %v8357_v59  ;;  %v816_v55 = vpop.f32.mrb[7].mxu1  ;;  %v1073_v61 = vsel %vm1030_vm2, %v8405_v43, -inf }
 0x273   : > { %1074 = vmax.xlane.f32.xlu1 %v1073_v61  ;;  %1059 = vmax.xlane.f32.xlu0 %v1058_v62  ;;  %v8418_v1 = vadd.f32 %v816_v55, %v8375_v6  ;;  %v1067_v2 = vsel %vm1030_vm2, %v8408_v51, -inf }
 0x274   : > { %v1076_v5 = vsel %vm1030_vm2, %v8411_v54, -inf }
 0x275   : > { %v1070_v15 = vsel %vm1030_vm2, %v8418_v1, -inf }
 0x277   : > { %1068 = vmax.xlane.f32.xlu1 %v1067_v2  ;;  %1077 = vmax.xlane.f32.xlu0 %v1076_v5 }
 0x278   : > { %v6619_v8 = vpop.f32.mrb[40].mxu0 }
 0x279   : > { %v8425_v9 = vadd.f32 %v6619_v8, %v8309_v34  ;;  %v898_v10 = vpop.f32.mrb[41].mxu0 }
 0x27a   : > { %v6620_v12 = vpop.f32.mrb[42].mxu0  ;;  %v8430_v20 = vadd.f32 %v898_v10, %v8314_v19 }
 0x27b   : > { %v8433_v21 = vadd.f32 %v6620_v12, %v8332_v49  ;;  %v901_v26 = vpop.f32.mrb[43].mxu0  ;;  %v1085_v32 = vsel %vm1030_vm2, %v8425_v9, -inf  ;;  %1071 = vmax.xlane.f32.xlu0 %v1070_v15 }
 0x27c   : > { %1086 = vmax.xlane.f32.xlu1 %v1085_v32  ;;  %v8438_v35 = vadd.f32 %v901_v26, %v8322_v42  ;;  %v1079_v45 = vsel %vm1030_vm2, %v8430_v20, -inf }
 0x27d   : > { %v1088_v41 = vsel %vm1030_vm2, %v8433_v21, -inf }
 0x27e   : > { %v1082_v2 = vsel %vm1030_vm2, %v8438_v35, -inf }
 0x27f   : > { %1089 = vmax.xlane.f32.xlu0 %v1088_v41 }
 0x280   : > { %v6623_v46 = vpop.f32.mrb[44].mxu0  ;;  %1080 = vmax.xlane.f32.xlu1 %v1079_v45 }
 0x281   : > { %v8445_v55 = vadd.f32 %v6623_v46, %v8342_v52  ;;  %v914_v61 = vpop.f32.mrb[45].mxu0 }
 0x282   : > { %v6624_v62 = vpop.f32.mrb[46].mxu0  ;;  %v8450_v5 = vadd.f32 %v914_v61, %v8352_v56 }
 0x283   : > { %v8453_v8 = vadd.f32 %v6624_v62, %v8357_v59  ;;  %v917_v10 = vpop.f32.mrb[47].mxu0  ;;  %v1097_v12 = vsel %vm1030_vm2, %v8445_v55, -inf  ;;  %1083 = vmax.xlane.f32.xlu0 %v1082_v2 }
 0x284   : > { %1098 = vmax.xlane.f32.xlu1 %v1097_v12  ;;  %v8458_v15 = vadd.f32 %v917_v10, %v8375_v6  ;;  %v1091_v41 = vsel %vm1030_vm2, %v8450_v5, -inf }
 0x285   : > { %v1100_v26 = vsel %vm1030_vm2, %v8453_v8, -inf }
 0x286   : > { %v1094_v12 = vsel %vm1030_vm2, %v8458_v15, -inf }
 0x287   : > { %v6635_v32 = vpop.f32.mrb[8].mxu1  ;;  %1101 = vmax.xlane.f32.xlu0 %v1100_v26 }
 0x288   : > { %v8465_v45 = vadd.f32 %v6635_v32, %v8309_v34  ;;  %1092 = vmax.xlane.f32.xlu1 %v1091_v41  ;;  %v999_v46 = vpop.f32.mrb[9].mxu1 }
 0x289   : > { %v6636_v61 = vpop.f32.mrb[10].mxu1  ;;  %v8475_v33 = vadd.f32 %v999_v46, %v8314_v19 }
 0x28a   : > { %v8468_v62 = vadd.f32 %v6636_v61, %v8332_v49  ;;  %v1002_v2 = vpop.f32.mrb[11].mxu1  ;;  %v1109_v10 = vsel %vm1030_vm2, %v8465_v45, -inf }
 0x28b   : > { %1095 = vmax.xlane.f32.xlu0 %v1094_v12  ;;  %v8478_v34 = vadd.f32 %v1002_v2, %v8322_v42  ;;  %v1103_v32 = vsel %vm1030_vm2, %v8475_v33, -inf }
 0x28c   : > { %1110 = vmax.xlane.f32.xlu1 %v1109_v10  ;;  %v1112_v26 = vsel %vm1030_vm2, %v8468_v62, -inf }
 0x28d   : > { %v1106_v2 = vsel %vm1030_vm2, %v8478_v34, -inf }
 0x28f   : > { %v6639_v49 = vpop.f32.mrb[12].mxu1  ;;  %1113 = vmax.xlane.f32.xlu0 %v1112_v26 }
 0x290   : > { %v8485_v41 = vadd.f32 %v6639_v49, %v8342_v52  ;;  %1104 = vmax.xlane.f32.xlu1 %v1103_v32  ;;  %v1015_v61 = vpop.f32.mrb[13].mxu1  ;;  %v8506_v32 = vpop.permute.xlu1 %1668 }
 0x291   : > { %v6640_v19 = vpop.f32.mrb[14].mxu1  ;;  %v8495_v12 = vadd.f32 %v1015_v61, %v8352_v56  ;;  %11436 = vst [vmem:[#allocation11_spill] sm:$0xff] %v8506_v32 }
 0x292   : > { %v8488_v46 = vadd.f32 %v6640_v19, %v8357_v59  ;;  %v1018_v10 = vpop.f32.mrb[15].mxu1  ;;  %v1121_v42 = vsel %vm1030_vm2, %v8485_v41, -inf }
 0x293   : > { %1107 = vmax.xlane.f32.xlu0 %v1106_v2  ;;  %v8498_v52 = vadd.f32 %v1018_v10, %v8375_v6  ;;  %v1115_v59 = vsel %vm1030_vm2, %v8495_v12, -inf }
 0x294   : > { %1122 = vmax.xlane.f32.xlu1 %v1121_v42  ;;  %v1124_v26 = vsel %vm1030_vm2, %v8488_v46, -inf  ;;  %v8508_v56 = vpop.permute.xlu1 %1672  ;;  %v8518_v42 = vpop.permute.xlu0 %1877 }
 0x295   : > { %v1118_v49 = vsel %vm1030_vm2, %v8498_v52, -inf  ;;  %11437 = vst [vmem:[#allocation12_spill] sm:$0xff] %v8508_v56  ;;  %11442 = vst [vmem:[#allocation17_spill] sm:$0xff] %v8518_v42 }
 0x297   : > { %1125 = vmax.xlane.f32.xlu0 %v1124_v26 }
 0x298   : > { %1116 = vmax.xlane.f32.xlu1 %v1115_v59  ;;  %v8510_v61 = vpop.permute.xlu1 %1774  ;;  %v8522_v26 = vpop.permute.xlu0 %1764 }
 0x299   : > { %11438 = vst [vmem:[#allocation13_spill] sm:$0xff] %v8510_v61  ;;  %11444 = vst [vmem:[#allocation19_spill] sm:$0xff] %v8522_v26 }
 0x29b   : > { %1119 = vmax.xlane.f32.xlu0 %v1118_v49 }
 0x29c   : > { %v8512_v6 = vpop.permute.xlu1 %1776 }
 0x29d   : > { %11439 = vst [vmem:[#allocation14_spill] sm:$0xff] %v8512_v6 }
 0x2a0   : > { %v8514_v19 = vpop.permute.xlu1 %1778 }
 0x2a1   : > { %11440 = vst [vmem:[#allocation15_spill] sm:$0xff] %v8514_v19 }
 0x2a4   : > { %v8516_v10 = vpop.permute.xlu1 %1879 }
 0x2a5   : > { %11441 = vst [vmem:[#allocation16_spill] sm:$0xff] %v8516_v10 }
 0x2a8   : > { %v8520_v2 = vpop.permute.xlu1 %1881 }
 0x2a9   : > { %11443 = vst [vmem:[#allocation18_spill] sm:$0xff] %v8520_v2 }
 0x2ac   : > { %v8524_v59 = vpop.permute.xlu1 %1670 }
 0x2ad   : > { %11445 = vst [vmem:[#allocation20_spill] sm:$0xff] %v8524_v59 }
 0x2e8   : > { %v1039_v49 = vpop.xlane.xlu0 %1038 }
 0x2e9   : > { %v1129_v32 = vsub.f32 %v8317_v40, %v1039_v49 }
 0x2eb   : > { %v1163_v56 = vmul.f32 1.442695, %v1129_v32  ;;  %v1036_v31 = vpop.xlane.xlu1 %1035 }
 0x2ec   : > { %v1033_v61 = vpop.xlane.xlu0 %1032  ;;  %v1128_v10 = vsub.f32 %v8335_v50, %v1036_v31 }
 0x2ed   : > { %7471 = vpow2.f32 %v1163_v56  ;;  %v1127_v6 = vsub.f32 %v8325_v44, %v1033_v61 }
 0x2ee   : > { %v1161_v28 = vmul.f32 1.442695, %v1128_v10 }
 0x2ef   : > { %v1159_v19 = vmul.f32 1.442695, %v1127_v6 }
 0x2f0   : > { %v1051_v30 = vpop.xlane.xlu1 %1050  ;;  %v1042_v42 = vpop.xlane.xlu0 %1041 }
 0x2f1   : > { %7473 = vpow2.f32 %v1159_v19  ;;  %v1133_v2 = vsub.f32 %v8360_v60, %v1051_v30  ;;  %v1130_v26 = vsub.f32 %v8345_v53, %v1042_v42 }
 0x2f3   : > { %v1171_v59 = vmul.f32 1.442695, %v1133_v2  ;;  %v1165_v23 = vmul.f32 1.442695, %v1130_v26 }
 0x2f4   : > { %v1045_v40 = vpop.xlane.xlu1 %1044  ;;  %v1054_v32 = vpop.xlane.xlu0 %1053 }
 0x2f5   : > { %7475 = vpow2.f32 %v1171_v59  ;;  %v1131_v56 = vsub.f32 %v8363_v63, %v1045_v40  ;;  %v1134_v44 = vsub.f32 %v8366_v0, %v1054_v32 }
 0x2f6   : > { %7477 = vpow2.f32 %v1165_v23 }
 0x2f7   : > { %v8533_v61 = vpop.eup %7471  ;;  %v1167_v31 = vmul.f32 1.442695, %v1131_v56  ;;  %7479 = vpow2.f32 %v1161_v28  ;;  %v1173_v50 = vmul.f32 1.442695, %v1134_v44 }
 0x2f8   : > { %v1063_v6 = vpop.xlane.xlu1 %1062  ;;  %v1048_v30 = vpop.xlane.xlu0 %1047  ;;  %v1229_v53 = vsel %vm1030_vm2, %v8533_v61, 0.0 }
 0x2f9   : > { %7481 = vpow2.f32 %v1167_v31  ;;  %v1132_v60 = vsub.f32 %v8378_v7, %v1048_v30  ;;  %1230 = vadd.xlane.f32.xlu1 %v1229_v53  ;;  %v1137_v63 = vsub.f32 %v8385_v11, %v1063_v6 }
 0x2fa   : > { %7483 = vpow2.f32 %v1173_v50 }
 0x2fb   : > { %v8538_v19 = vpop.eup %7473  ;;  %v1169_v23 = vmul.f32 1.442695, %v1132_v60  ;;  %v1179_v26 = vmul.f32 1.442695, %v1137_v63 }
 0x2fc   : > { %v1057_v0 = vpop.xlane.xlu1 %1056  ;;  %v1066_v10 = vpop.xlane.xlu0 %1065  ;;  %v1223_v28 = vsel %vm1030_vm2, %v8538_v19, 0.0 }
 0x2fd   : > { %1224 = vadd.xlane.f32.xlu1 %v1223_v28  ;;  %7485 = vpow2.f32 %v1169_v23  ;;  %v1135_v7 = vsub.f32 %v8388_v16, %v1057_v0  ;;  %v1138_v31 = vsub.f32 %v8391_v18, %v1066_v10 }
 0x2fe   : > { %7487 = vpow2.f32 %v1179_v26 }
 0x2ff   : > { %v8543_v42 = vpop.eup %7475  ;;  %v1175_v44 = vmul.f32 1.442695, %v1135_v7  ;;  %v1181_v23 = vmul.f32 1.442695, %v1138_v31 }
 0x300   : > { %v8545_v2 = vpop.eup %7477  ;;  %v1075_v59 = vpop.xlane.xlu1 %1074  ;;  %v1241_v11 = vsel %vm1030_vm2, %v8543_v42, 0.0 }
 0x301   : > { %v1060_v49 = vpop.xlane.xlu0 %1059  ;;  %1242 = vadd.xlane.f32.xlu1 %v1241_v11  ;;  %v1232_v40 = vsel %vm1030_vm2, %v8545_v2, 0.0  ;;  %v8552_v32 = vpop.eup %7479  ;;  %7489 = vpow2.f32 %v1175_v44  ;;  %v1141_v11 = vsub.f32 %v8405_v43, %v1075_v59 }
 0x302   : > { %1233 = vadd.xlane.f32.xlu0 %v1232_v40  ;;  %v1226_v53 = vsel %vm1030_vm2, %v8552_v32, 0.0  ;;  %v1136_v0 = vsub.f32 %v8398_v29, %v1060_v49 }
 0x303   : > { %v8554_v56 = vpop.eup %7481 }
 0x304   : > { %v1069_v50 = vpop.xlane.xlu1 %1068  ;;  %v1235_v6 = vsel %vm1030_vm2, %v8554_v56, 0.0  ;;  %v8562_v60 = vpop.eup %7483  ;;  %v1177_v40 = vmul.f32 1.442695, %v1136_v0 }
 0x305   : > { %v1078_v16 = vpop.xlane.xlu0 %1077  ;;  %1236 = vadd.xlane.f32.xlu1 %v1235_v6  ;;  %v1244_v26 = vsel %vm1030_vm2, %v8562_v60, 0.0  ;;  %v1187_v6 = vmul.f32 1.442695, %v1141_v11 }
 0x306   : > { %v1142_v30 = vsub.f32 %v8411_v54, %v1078_v16  ;;  %1227 = vadd.xlane.f32.xlu0 %v1226_v53 }
 0x307   : > { %v8568_v54 = vpop.eup %7485 }
 0x308   : > { %v1189_v63 = vmul.f32 1.442695, %v1142_v30  ;;  %v8574_v49 = vpop.eup %7487  ;;  %v1139_v30 = vsub.f32 %v8408_v51, %v1069_v50 }
 0x309   : > { %v1072_v18 = vpop.xlane.xlu0 %1071  ;;  %v1087_v10 = vpop.xlane.xlu1 %1086  ;;  %v1253_v59 = vsel %vm1030_vm2, %v8574_v49, 0.0 }
 0x30a   : > { %v1140_v28 = vsub.f32 %v8418_v1, %v1072_v18  ;;  %7491 = vpow2.f32 %v1189_v63  ;;  %1245 = vadd.xlane.f32.xlu0 %v1244_v26  ;;  %v1238_v1 = vsel %vm1030_vm2, %v8568_v54, 0.0  ;;  %v1183_v18 = vmul.f32 1.442695, %v1139_v30 }
 0x30b   : > { %7493 = vpow2.f32 %v1181_v23  ;;  %v8580_v63 = vpop.eup %7489 }
 0x30c   : > { %v1185_v7 = vmul.f32 1.442695, %v1140_v28  ;;  %v1145_v28 = vsub.f32 %v8425_v9, %v1087_v10 }
 0x30d   : > { %v1090_v44 = vpop.xlane.xlu0 %1089  ;;  %v1081_v31 = vpop.xlane.xlu1 %1080 }
 0x30e   : > { %7495 = vpow2.f32 %v1185_v7  ;;  %v1146_v29 = vsub.f32 %v8433_v21, %v1090_v44  ;;  %1239 = vadd.xlane.f32.xlu0 %v1238_v1  ;;  %v1195_v44 = vmul.f32 1.442695, %v1145_v28  ;;  %v1143_v9 = vsub.f32 %v8430_v20, %v1081_v31 }
 0x30f   : > { %7497 = vpow2.f32 %v1177_v40 }
 0x310   : > { %v1197_v16 = vmul.f32 1.442695, %v1146_v29  ;;  %v1191_v20 = vmul.f32 1.442695, %v1143_v9 }
 0x311   : > { %v1084_v53 = vpop.xlane.xlu0 %1083  ;;  %v1099_v21 = vpop.xlane.xlu1 %1098 }
 0x312   : > { %7499 = vpow2.f32 %v1197_v16  ;;  %v1144_v43 = vsub.f32 %v8438_v35, %v1084_v53  ;;  %1254 = vadd.xlane.f32.xlu0 %v1253_v59  ;;  %v1247_v35 = vsel %vm1030_vm2, %v8580_v63, 0.0  ;;  %v1149_v31 = vsub.f32 %v8445_v55, %v1099_v21 }
 0x313   : > { %7501 = vpow2.f32 %v1187_v6 }
 0x314   : > { %v1193_v23 = vmul.f32 1.442695, %v1144_v43  ;;  %v8582_v0 = vpop.eup %7491  ;;  %v1203_v55 = vmul.f32 1.442695, %v1149_v31 }
 0x315   : > { %v1102_v26 = vpop.xlane.xlu0 %1101  ;;  %v1268_v50 = vsel %vm1030_vm2, %v8582_v0, 0.0  ;;  %v8590_v7 = vpop.eup %7493 }
 0x316   : > { %7503 = vpow2.f32 %v1193_v23  ;;  %v1150_v51 = vsub.f32 %v8453_v8, %v1102_v26  ;;  %1248 = vadd.xlane.f32.xlu0 %v1247_v35  ;;  %1269 = vadd.xlane.f32.xlu1 %v1268_v50  ;;  %v1093_v29 = vpop.xlane.xlu1 %1092  ;;  %v1256_v16 = vsel %vm1030_vm2, %v8590_v7, 0.0 }
 0x317   : > { %7505 = vpow2.f32 %v1183_v18  ;;  %v1147_v21 = vsub.f32 %v8450_v5, %v1093_v29 }
 0x318   : > { %v8592_v11 = vpop.eup %7495  ;;  %v1205_v40 = vmul.f32 1.442695, %v1150_v51 }
 0x319   : > { %v1096_v10 = vpop.xlane.xlu0 %1095  ;;  %v1262_v8 = vsel %vm1030_vm2, %v8592_v11, 0.0  ;;  %v8600_v6 = vpop.eup %7497 }
 0x31a   : > { %7507 = vpow2.f32 %v1205_v40  ;;  %v1148_v1 = vsub.f32 %v8458_v15, %v1096_v10  ;;  %1257 = vadd.xlane.f32.xlu0 %v1256_v16  ;;  %1263 = vadd.xlane.f32.xlu1 %v1262_v8  ;;  %v1250_v23 = vsel %vm1030_vm2, %v8600_v6, 0.0  ;;  %v1111_v26 = vpop.xlane.xlu1 %1110  ;;  %v1199_v8 = vmul.f32 1.442695, %v1147_v21 }
 0x31b   : > { %7509 = vpow2.f32 %v1195_v44  ;;  %v1153_v5 = vsub.f32 %v8465_v45, %v1111_v26 }
 0x31c   : > { %v8602_v30 = vpop.eup %7499  ;;  %v1201_v53 = vmul.f32 1.442695, %v1148_v1 }
 0x31d   : > { %v1114_v43 = vpop.xlane.xlu0 %1113  ;;  %v1280_v59 = vsel %vm1030_vm2, %v8602_v30, 0.0  ;;  %v8610_v18 = vpop.eup %7501 }
 0x31e   : > { %7511 = vpow2.f32 %v1201_v53  ;;  %v1154_v15 = vsub.f32 %v8468_v62, %v1114_v43  ;;  %1251 = vadd.xlane.f32.xlu0 %v1250_v23  ;;  %1281 = vadd.xlane.f32.xlu1 %v1280_v59  ;;  %v1265_v40 = vsel %vm1030_vm2, %v8610_v18, 0.0  ;;  %v1105_v1 = vpop.xlane.xlu1 %1104 }
 0x31f   : > { %7513 = vpow2.f32 %v1191_v20  ;;  %v1211_v20 = vmul.f32 1.442695, %v1153_v5  ;;  %v1151_v31 = vsub.f32 %v8475_v33, %v1105_v1 }
 0x320   : > { %v8612_v28 = vpop.eup %7503  ;;  %v1213_v51 = vmul.f32 1.442695, %v1154_v15 }
 0x321   : > { %v1108_v35 = vpop.xlane.xlu0 %1107  ;;  %v1274_v50 = vsel %vm1030_vm2, %v8612_v28, 0.0  ;;  %v8620_v44 = vpop.eup %7505  ;;  %v1207_v23 = vmul.f32 1.442695, %v1151_v31 }
 0x322   : > { %7515 = vpow2.f32 %v1213_v51  ;;  %v1152_v62 = vsub.f32 %v8478_v34, %v1108_v35  ;;  %1266 = vadd.xlane.f32.xlu0 %v1265_v40  ;;  %1275 = vadd.xlane.f32.xlu1 %v1274_v50  ;;  %v1259_v34 = vsel %vm1030_vm2, %v8620_v44, 0.0 }
 0x323   : > { %7517 = vpow2.f32 %v1203_v55 }
 0x324   : > { %v8622_v9 = vpop.eup %7507  ;;  %v1209_v10 = vmul.f32 1.442695, %v1152_v62 }
 0x325   : > { %v1292_v29 = vsel %vm1030_vm2, %v8622_v9, 0.0  ;;  %v8629_v16 = vpop.eup %7509 }
 0x326   : > { %7519 = vpow2.f32 %v1209_v10  ;;  %1260 = vadd.xlane.f32.xlu0 %v1259_v34  ;;  %1293 = vadd.xlane.f32.xlu1 %v1292_v29  ;;  %v1277_v43 = vsel %vm1030_vm2, %v8629_v16, 0.0  ;;  %v1123_v29 = vpop.xlane.xlu1 %1122 }
 0x327   : > { %7521 = vpow2.f32 %v1199_v8  ;;  %v1157_v1 = vsub.f32 %v8485_v41, %v1123_v29 }
 0x328   : > { %v8631_v53 = vpop.eup %7511  ;;  %7523 = vpow2.f32 %v1211_v20 }
 0x329   : > { %v1286_v45 = vsel %vm1030_vm2, %v8631_v53, 0.0  ;;  %v8638_v59 = vpop.eup %7513  ;;  %7525 = vpow2.f32 %v1207_v23  ;;  %v1219_v20 = vmul.f32 1.442695, %v1157_v1 }
 0x32a   : > { %1278 = vadd.xlane.f32.xlu0 %v1277_v43  ;;  %1287 = vadd.xlane.f32.xlu1 %v1286_v45  ;;  %v1271_v33 = vsel %vm1030_vm2, %v8638_v59, 0.0  ;;  %v1117_v34 = vpop.xlane.xlu1 %1116  ;;  %v1126_v45 = vpop.xlane.xlu0 %1125 }
 0x32b   : > { %v1155_v31 = vsub.f32 %v8495_v12, %v1117_v34  ;;  %7527 = vpow2.f32 %v1219_v20  ;;  %v1158_v23 = vsub.f32 %v8488_v46, %v1126_v45 }
 0x32c   : > { %v8640_v15 = vpop.eup %7515 }
 0x32d   : > { %v1304_v26 = vsel %vm1030_vm2, %v8640_v15, 0.0  ;;  %v8646_v51 = vpop.eup %7517  ;;  %v1215_v43 = vmul.f32 1.442695, %v1155_v31 }
 0x32e   : > { %1272 = vadd.xlane.f32.xlu0 %v1271_v33  ;;  %1305 = vadd.xlane.f32.xlu1 %v1304_v26  ;;  %v1289_v35 = vsel %vm1030_vm2, %v8646_v51, 0.0  ;;  %v1120_v26 = vpop.xlane.xlu0 %1119  ;;  %v1221_v33 = vmul.f32 1.442695, %v1158_v23 }
 0x32f   : > { %7529 = vpow2.f32 %v1215_v43 }
 0x330   : > { %v8648_v55 = vpop.eup %7519  ;;  %7531 = vpow2.f32 %v1221_v33 }
 0x331   : > { %v1298_v21 = vsel %vm1030_vm2, %v8648_v55, 0.0  ;;  %v8654_v50 = vpop.eup %7521 }
 0x332   : > { %1290 = vadd.xlane.f32.xlu0 %v1289_v35  ;;  %1299 = vadd.xlane.f32.xlu1 %v1298_v21  ;;  %v1283_v62 = vsel %vm1030_vm2, %v8654_v50, 0.0  ;;  %v8658_v40 = vpop.eup %7523  ;;  %v1156_v21 = vsub.f32 %v8498_v52, %v1120_v26 }
 0x333   : > { %v1301_v10 = vsel %vm1030_vm2, %v8658_v40, 0.0  ;;  %v8662_v8 = vpop.eup %7525 }
 0x334   : > { %v1295_v5 = vsel %vm1030_vm2, %v8662_v8, 0.0  ;;  %v1217_v41 = vmul.f32 1.442695, %v1156_v21 }
 0x335   : > { %v8674_v35 = vpop.eup %7527 }
 0x336   : > { %1284 = vadd.xlane.f32.xlu0 %v1283_v62  ;;  %v1313_v62 = vsel %vm1030_vm2, %v8674_v35, 0.0  ;;  %7533 = vpow2.f32 %v1217_v41 }
 0x33a   : > { %1302 = vadd.xlane.f32.xlu0 %v1301_v10  ;;  %v8678_v10 = vpop.eup %7529 }
 0x33b   : > { %v1307_v12 = vsel %vm1030_vm2, %v8678_v10, 0.0  ;;  %v8682_v46 = vpop.eup %7531 }
 0x33c   : > { %v1316_v52 = vsel %vm1030_vm2, %v8682_v46, 0.0 }
 0x33e   : > { %1296 = vadd.xlane.f32.xlu0 %v1295_v5 }
 0x340   : > { %v8686_v5 = vpop.eup %7533 }
 0x341   : > { %v1310_v29 = vsel %vm1030_vm2, %v8686_v5, 0.0 }
 0x343   : > { %1766 = vrot.lane.b32.xlu1 %v8103_v27, %s7994_s13 }
 0x354   : > { %1982 = vrot.lane.b32.xlu0 %v8157_v4, %s7993_s12 }
 0x367   : > { %1314 = vadd.xlane.f32.xlu1 %v1313_v62 }
 0x36b   : > { %1308 = vadd.xlane.f32.xlu1 %v1307_v12 }
 0x373   : > { %1317 = vadd.xlane.f32.xlu0 %v1316_v52 }
 0x377   : > { %1311 = vadd.xlane.f32.xlu0 %v1310_v29 }
 0x37c   : > { %1984 = vrot.lane.b32.xlu1 %v8155_v3, %s7993_s12 }
 0x380   : > { %1986 = vrot.lane.b32.xlu1 %v8169_v14, %s7993_s12 }
 0x384   : > { %1871 = vrot.lane.b32.xlu1 %v8129_v47, %s7994_s13 }
 0x386   : > { %v1231_v1 = vpop.xlane.xlu1 %1230 }
 0x388   : > { %1770 = vrot.lane.b32.xlu1 %v8117_v37, %s7994_s13 }
 0x38a   : > { %v1225_v34 = vpop.xlane.xlu1 %1224 }
 0x38c   : > { %2089 = vrot.lane.b32.xlu1 %v8179_v24, %s7993_s12 }
 0x38d   : > { %1883 = vrot.lane.b32.xlu0 %v8143_v57, %s7993_s12 }
 0x38e   : > { %v1243_v31 = vpop.xlane.xlu1 %1242 }
 0x38f   : > { %v1234_v20 = vpop.xlane.xlu0 %1233 }
 0x390   : > { %1976 = vrot.lane.b32.xlu1 %v8155_v3, %s7994_s13  ;;  %7535 = vrcp.f32 %v1234_v20 }
 0x391   : > { %1869 = vrot.lane.b32.xlu0 %v8131_v48, %s7994_s13  ;;  %7537 = vrcp.f32 %v1225_v34 }
 0x392   : > { %7539 = vrcp.f32 %v1231_v1  ;;  %v1237_v43 = vpop.xlane.xlu1 %1236 }
 0x393   : > { %v1228_v45 = vpop.xlane.xlu0 %1227 }
 0x394   : > { %7541 = vrcp.f32 %v1228_v45  ;;  %1873 = vrot.lane.b32.xlu1 %v8145_v58, %s7994_s13 }
 0x395   : > { %2087 = vrot.lane.b32.xlu0 %v8181_v25, %s7993_s12 }
 0x397   : > { %v1246_v23 = vpop.xlane.xlu0 %1245 }
 0x398   : > { %2093 = vrot.lane.b32.xlu1 %v8191_v36, %s7993_s12  ;;  %7543 = vrcp.f32 %v1246_v23 }
 0x399   : > { %1768 = vrot.lane.b32.xlu0 %v8119_v38, %s7994_s13  ;;  %7545 = vrcp.f32 %v1237_v43 }
 0x39a   : > { %v7536_v26 = vpop.eup %7535  ;;  %7547 = vrcp.f32 %v1243_v31 }
 0x39b   : > { %v1240_v33 = vpop.xlane.xlu0 %1239  ;;  %v7538_v21 = vpop.eup %7537  ;;  %v1354_v12 = vmul.f32 %v7536_v26, %v8545_v2 }
 0x39c   : > { %7549 = vrcp.f32 %v1240_v33  ;;  %2081 = vrot.lane.b32.xlu1 %v8179_v24, %s7994_s13  ;;  %v7540_v41 = vpop.eup %7539  ;;  %v1351_v29 = vmul.f32 %v7538_v21, %v8538_v19 }
 0x39d   : > { %1988 = vrot.lane.b32.xlu0 %v8167_v13, %s7993_s12  ;;  %v1353_v34 = vmul.f32 %v7540_v41, %v8533_v61 }
 0x39e   : > { %v7542_v62 = vpop.eup %7541 }
 0x39f   : > { %v1255_v52 = vpop.xlane.xlu0 %1254  ;;  %v1352_v1 = vmul.f32 %v7542_v62, %v8552_v32  ;;  %v1384_v31 = vpack.c.bf16 %v1354_v12, %v1353_v34  ;;  %v11446_v62 = vld [vmem:[#allocation3_spill] sm:$0xff] }
 0x3a0   : > { %1980 = vrot.lane.b32.xlu1 %v8167_v13, %s7994_s13 }
 0x3a1   : > { %1974 = vrot.lane.b32.xlu0 %v8157_v4, %s7994_s13  ;;  %v1383_v20 = vpack.c.bf16 %v1352_v1, %v1351_v29 }
 0x3a2   : > { %v7544_v45 = vpop.eup %7543 }
 0x3a3   : > { %v1270_v43 = vpop.xlane.xlu1 %1269  ;;  %6649 = vmatprep.mubr.msk.bf16.mxu0 %vm1030_vm2, %v1383_v20  ;;  %v1249_v2 = vpop.xlane.xlu0 %1248  ;;  %v1358_v32 = vmul.f32 %v7544_v45, %v8562_v60  ;;  %v11447_v60 = vld [vmem:[#allocation7_spill] sm:$0xff] }
 0x3a4   : > { %v7546_v23 = vpop.eup %7545  ;;  %2085 = vrot.lane.b32.xlu1 %v8191_v36, %s7994_s13  ;;  %6650 = vmatmul.mubr.msk.bf16.vlgmr.msra.gmra.mrb[48].mxu0 %vm1030_vm2, %v1384_v31 }
 0x3a5   : > { %v7548_v61 = vpop.eup %7547  ;;  %6658 = vmatpush3.bf16.msra.mxu0 %v8277_v17  ;;  %2091 = vrot.lane.b32.xlu0 %v8193_v39, %s7993_s12  ;;  %v1355_v21 = vmul.f32 %v7546_v23, %v8554_v56 }
 0x3a6   : > { %v7550_v19 = vpop.eup %7549  ;;  %6659 = vmatprep.subr.bf16.mxu0 %v8285_v22  ;;  %v1357_v17 = vmul.f32 %v7548_v61, %v8543_v42 }
 0x3a7   : > { %v1264_v26 = vpop.xlane.xlu1 %1263  ;;  %v1258_v33 = vpop.xlane.xlu0 %1257  ;;  %v1356_v41 = vmul.f32 %v7550_v19, %v8568_v54 }
 0x3a8   : > { %2552 = vrot.lane.b32.xlu1 %v11446_v62, %s7995_s8  ;;  %7551 = vrcp.f32 %v1258_v33  ;;  %v1386_v29 = vpack.c.bf16 %v1358_v32, %v1357_v17 }
 0x3a9   : > { %6660 = vmatpush3.bf16.msra.mxu0 %v8285_v22  ;;  %1875 = vrot.lane.b32.xlu0 %v8143_v57, %s7994_s13  ;;  %v1385_v12 = vpack.c.bf16 %v1356_v41, %v1355_v21  ;;  %7553 = vrcp.f32 %v1249_v2  ;;  %v11448_v22 = vld [vmem:[#allocation8_spill] sm:$0xff] }
 0x3aa   : > { %6661 = vmatprep.subr.bf16.mxu0 %v11447_v60  ;;  %7555 = vrcp.f32 %v1255_v52  ;;  %v11449_v52 = vld [vmem:[#allocation9_spill] sm:$0xff] }
 0x3ab   : > { %v1282_v56 = vpop.xlane.xlu1 %1281  ;;  %6653 = vmatprep.mubr.msk.bf16.mxu0 %vm1030_vm2, %v1385_v12  ;;  %v1252_v54 = vpop.xlane.xlu0 %1251  ;;  %v11450_v12 = vld [vmem:[#allocation11_spill] sm:$0xff] }
 0x3ac   : > { %2556 = vrot.lane.b32.xlu1 %v8119_v38, %s7995_s8  ;;  %6654 = vmatmul.mubr.msk.bf16.gmra.mrb[52].mxu0 %vm1030_vm2, %v1386_v29  ;;  %7557 = vrcp.f32 %v1252_v54 }
 0x3ad   : > { %6662 = vmatpush3.bf16.msra.mxu0 %v11447_v60  ;;  %2079 = vrot.lane.b32.xlu0 %v8181_v25, %s7994_s13 }
 0x3ae   : > { %6663 = vmatprep.subr.bf16.mxu0 %v11448_v22 }
 0x3af   : > { %v1276_v42 = vpop.xlane.xlu1 %1275  ;;  %v1267_v1 = vpop.xlane.xlu0 %1266 }
 0x3b0   : > { %2641 = vrot.lane.b32.xlu1 %v8131_v48, %s7995_s8  ;;  %7559 = vrcp.f32 %v1267_v1 }
 0x3b1   : > { %6664 = vmatpush3.bf16.msra.mxu0 %v11448_v22  ;;  %1978 = vrot.lane.b32.xlu0 %v8169_v14, %s7994_s13  ;;  %7561 = vrcp.f32 %v1264_v26 }
 0x3b2   : > { %6689 = vmatprep.subr.bf16.mxu0 %v11449_v52  ;;  %v7552_v20 = vpop.eup %7551  ;;  %7563 = vrcp.f32 %v1270_v43 }
 0x3b3   : > { %v1261_v34 = vpop.xlane.xlu0 %1260  ;;  %v7554_v31 = vpop.eup %7553  ;;  %v1362_v61 = vmul.f32 %v7552_v20, %v8590_v7 }
 0x3b4   : > { %2730 = vrot.lane.b32.xlu1 %v8157_v4, %s7995_s8  ;;  %v1294_v45 = vpop.xlane.xlu1 %1293  ;;  %7565 = vrcp.f32 %v1261_v34  ;;  %v7556_v2 = vpop.eup %7555  ;;  %v1359_v32 = vmul.f32 %v7554_v31, %v8580_v63 }
 0x3b5   : > { %2083 = vrot.lane.b32.xlu0 %v8193_v39, %s7994_s13  ;;  %v1361_v26 = vmul.f32 %v7556_v2, %v8574_v49  ;;  %v11452_v2 = vld [vmem:[#allocation12_spill] sm:$0xff] }
 0x3b6   : > { %v7558_v23 = vpop.eup %7557 }
 0x3b7   : > { %v1279_v19 = vpop.xlane.xlu0 %1278  ;;  %v1360_v43 = vmul.f32 %v7558_v23, %v8600_v6  ;;  %v1388_v21 = vpack.c.bf16 %v1362_v61, %v1361_v26 }
 0x3b8   : > { %2645 = vrot.lane.b32.xlu1 %v8145_v58, %s7995_s8  ;;  %7567 = vrcp.f32 %v1279_v19  ;;  %v1288_v41 = vpop.xlane.xlu1 %1287 }
 0x3b9   : > { %2554 = vrot.lane.b32.xlu0 %v8103_v27, %s7995_s8  ;;  %v1387_v33 = vpack.c.bf16 %v1360_v43, %v1359_v32  ;;  %7569 = vrcp.f32 %v1276_v42 }
 0x3ba   : > { %v7560_v7 = vpop.eup %7559  ;;  %7571 = vrcp.f32 %v1282_v56 }
 0x3bb   : > { %v1273_v17 = vpop.xlane.xlu0 %1272  ;;  %6665 = vmatprep.mubr.msk.bf16.mxu0 %vm1030_vm2, %v1387_v33  ;;  %v7562_v63 = vpop.eup %7561  ;;  %v1365_v29 = vmul.f32 %v7560_v7, %v8610_v18  ;;  %v11451_v18 = vld [vmem:[#allocation20_spill] sm:$0xff]  ;;  %v11453_v33 = vld [vmem:[#allocation17_spill] sm:$0xff] }
 0x3bc   : > { %2734 = vrot.lane.b32.xlu1 %v8169_v14, %s7995_s8  ;;  %7573 = vrcp.f32 %v1273_v17  ;;  %6666 = vmatmul.mubr.msk.bf16.vlgmr.msra.gmra.mrb[56].mxu0 %vm1030_vm2, %v1388_v21  ;;  %v7564_v49 = vpop.eup %7563  ;;  %v1364_v54 = vmul.f32 %v7562_v63, %v8592_v11  ;;  %v1306_v22 = vpop.xlane.xlu1 %1305  ;;  %v11455_v7 = vld [vmem:[#allocation13_spill] sm:$0xff] }
 0x3bd   : > { %2558 = vrot.lane.b32.xlu0 %v8117_v37, %s7995_s8  ;;  %6690 = vmatpush3.bf16.msra.mxu0 %v11449_v52  ;;  %7575 = vrcp.f32 %v1288_v41  ;;  %v1366_v42 = vmul.f32 %v7564_v49, %v8582_v0 }
 0x3be   : > { %v7566_v6 = vpop.eup %7565  ;;  %6691 = vmatprep.subr.bf16.mxu0 %v11450_v12 }
 0x3bf   : > { %v1291_v60 = vpop.xlane.xlu0 %1290  ;;  %v1363_v56 = vmul.f32 %v7566_v6, %v8620_v44  ;;  %v1390_v34 = vpack.c.bf16 %v1366_v42, %v1365_v29  ;;  %v11456_v42 = vld [vmem:[#allocation19_spill] sm:$0xff] }
 0x3c0   : > { %2819 = vrot.lane.b32.xlu1 %v8181_v25, %s7995_s8  ;;  %7577 = vrcp.f32 %v1291_v60 }
 0x3c1   : > { %2643 = vrot.lane.b32.xlu0 %v8129_v47, %s7995_s8  ;;  %6692 = vmatpush3.bf16.msra.mxu0 %v11450_v12  ;;  %v1389_v1 = vpack.c.bf16 %v1364_v54, %v1363_v56  ;;  %7579 = vrcp.f32 %v1294_v45  ;;  %v1300_v45 = vpop.xlane.xlu1 %1299 }
 0x3c2   : > { %6693 = vmatprep.subr.bf16.mxu0 %v11451_v18  ;;  %v7568_v20 = vpop.eup %7567 }
 0x3c3   : > { %v1285_v52 = vpop.xlane.xlu0 %1284  ;;  %6669 = vmatprep.mubr.msk.bf16.mxu0 %vm1030_vm2, %v1389_v1  ;;  %v7570_v11 = vpop.eup %7569  ;;  %v1369_v31 = vmul.f32 %v7568_v20, %v8629_v16 }
 0x3c4   : > { %7581 = vrcp.f32 %v1285_v52  ;;  %2927 = vrot.lane.b32.xlu1 %v8103_v27, %s7996_s9  ;;  %6670 = vmatmul.mubr.msk.bf16.gmra.mrb[60].mxu0 %vm1030_vm2, %v1390_v34  ;;  %v7572_v0 = vpop.eup %7571  ;;  %v1368_v19 = vmul.f32 %v7570_v11, %v8612_v28  ;;  %v11454_v28 = vld [vmem:[#allocation10_spill] sm:$0xff] }
 0x3c5   : > { %2732 = vrot.lane.b32.xlu0 %v8155_v3, %s7995_s8  ;;  %6694 = vmatpush3.bf16.msra.mxu0 %v11451_v18  ;;  %v1370_v32 = vmul.f32 %v7572_v0, %v8602_v30  ;;  %v1793_v41 = vsel %vm637_vm1, %v11454_v28, 0 }
 0x3c6   : > { %v7574_v44 = vpop.eup %7573  ;;  %6695 = vmatprep.subr.bf16.mxu0 %v11452_v2 }
 0x3c7   : > { %v1303_v23 = vpop.xlane.xlu0 %1302  ;;  %v1367_v61 = vmul.f32 %v7574_v44, %v8638_v59  ;;  %v7576_v43 = vpop.eup %7575  ;;  %v1392_v26 = vpack.c.bf16 %v1370_v32, %v1369_v31  ;;  %v11460_v31 = vld [vmem:[#allocation18_spill] sm:$0xff] }
 0x3c8   : > { %3030 = vrot.lane.b32.xlu1 %v8131_v48, %s7996_s9  ;;  %7583 = vrcp.f32 %v1303_v23  ;;  %v1372_v49 = vmul.f32 %v7576_v43, %v8631_v53  ;;  %v1796_v53 = vsel %vm637_vm1, %v11455_v7, 0 }
 0x3c9   : > { %2647 = vrot.lane.b32.xlu0 %v8143_v57, %s7995_s8  ;;  %7585 = vrcp.f32 %v1300_v45  ;;  %6696 = vmatpush3.bf16.msra.mxu0 %v11452_v2  ;;  %v1391_v16 = vpack.c.bf16 %v1368_v19, %v1367_v61  ;;  %v1767_v45 = vpop.permute.xlu1 %1766  ;;  %v1904_v2 = vsel %vm637_vm1, %v11460_v31, 0 }
 0x3ca   : > { %7587 = vrcp.f32 %v1306_v22  ;;  %7145 = vmatprep.subr.msk.bf16.mxu0 %vm637_vm1, %v11453_v33  ;;  %v7578_v59 = vpop.eup %7577 }
 0x3cb   : > { %v1297_v21 = vpop.xlane.xlu0 %1296  ;;  %6681 = vmatprep.mubr.msk.bf16.mxu1 %vm1030_vm2, %v1391_v16  ;;  %v7580_v30 = vpop.eup %7579  ;;  %v1373_v6 = vmul.f32 %v7578_v59, %v8646_v51 }
 0x3cc   : > { %7589 = vrcp.f32 %v1297_v21  ;;  %2917 = vrot.lane.b32.xlu1 %v11446_v62, %s7997_s10  ;;  %6682 = vmatmul.mubr.msk.bf16.vlgmr.msra.gmra.mrb[16].mxu1 %vm1030_vm2, %v1392_v26  ;;  %v1374_v60 = vmul.f32 %v7580_v30, %v8622_v9  ;;  %v11457_v9 = vld [vmem:[#allocation14_spill] sm:$0xff] }
 0x3cd   : > { %2736 = vrot.lane.b32.xlu0 %v8167_v13, %s7995_s8  ;;  %6706 = vmatpush3.bf16.xpose.msra.mxu1 %v1793_v41  ;;  %v1799_v11 = vsel %vm637_vm1, %v11457_v9, 0 }
 0x3ce   : > { %v7582_v17 = vpop.eup %7581  ;;  %7142 = vmatprep.subr.msk.bf16.mxu1 %vm637_vm1, %v11455_v7  ;;  %v1394_v56 = vpack.c.bf16 %v1374_v60, %v1373_v6 }
 0x3cf   : > { %v1371_v63 = vmul.f32 %v7582_v17, %v8654_v50  ;;  %v1983_v44 = vpop.permute.xlu0 %1982 }
 0x3d0   : > { %3135 = vrot.lane.b32.xlu1 %v8157_v4, %s7996_s9  ;;  %v2003_v23 = vsel %vm637_vm1, %v1983_v44, 0 }
 0x3d1   : > { %2821 = vrot.lane.b32.xlu0 %v8179_v24, %s7995_s8  ;;  %v1393_v12 = vpack.c.bf16 %v1372_v49, %v1371_v63 }
 0x3d2   : > { %v7584_v29 = vpop.eup %7583 }
 0x3d3   : > { %6685 = vmatprep.mubr.msk.bf16.mxu1 %vm1030_vm2, %v1393_v12  ;;  %v7586_v54 = vpop.eup %7585  ;;  %v1377_v50 = vmul.f32 %v7584_v29, %v8658_v40  ;;  %v1898_v40 = vsel %vm637_vm1, %v11453_v33, 0 }
 0x3d4   : > { %v7588_v22 = vpop.eup %7587  ;;  %6686 = vmatmul.mubr.msk.bf16.gmra.mrb[20].mxu1 %vm1030_vm2, %v1394_v56  ;;  %v1376_v18 = vmul.f32 %v7586_v54, %v8648_v55  ;;  %v11459_v55 = vld [vmem:[#allocation15_spill] sm:$0xff] }
 0x3d5   : > { %2925 = vrot.lane.b32.xlu0 %v11446_v62, %s7996_s9  ;;  %6708 = vmatpush3.bf16.xpose.msra.mxu1 %v1796_v53  ;;  %v1378_v52 = vmul.f32 %v7588_v22, %v8640_v15  ;;  %v11458_v15 = vld [vmem:[#allocation16_spill] sm:$0xff]  ;;  %v1802_v0 = vsel %vm637_vm1, %v11459_v55, 0 }
 0x3d6   : > { %v7590_v51 = vpop.eup %7589  ;;  %6713 = vmatprep.mubr.msk.bf16.mxu1 %vm637_vm1, %v11456_v42  ;;  %7143 = vmatprep.subr.msk.bf16.mxu1 %vm637_vm1, %v11457_v9 }
 0x3d7   : > { %v1375_v1 = vmul.f32 %v7590_v51, %v8662_v8  ;;  %v1396_v20 = vpack.c.bf16 %v1378_v52, %v1377_v50  ;;  %v1901_v8 = vsel %vm637_vm1, %v11458_v15, 0 }
 0x3d9   : > { %2823 = vrot.lane.b32.xlu0 %v8193_v39, %s7995_s8  ;;  %v1395_v34 = vpack.c.bf16 %v1376_v18, %v1375_v1 }
 0x3db   : > { %6697 = vmatprep.mubr.msk.bf16.mxu0 %vm1030_vm2, %v1395_v34 }
 0x3dc   : > { %6698 = vmatmul.mubr.msk.bf16.vlgmr.msra.gmra.mrb[64].mxu0 %vm1030_vm2, %v1396_v20 }
 0x3dd   : > { %6722 = vmatpush3.bf16.xpose.msra.mxu0 %v1898_v40  ;;  %2825 = vrot.lane.b32.xlu0 %v8191_v36, %s7995_s8 }
 0x3de   : > { %6710 = vmatpush3.bf16.xpose.msra.mxu1 %v1799_v11  ;;  %7146 = vmatprep.subr.msk.bf16.mxu0 %vm637_vm1, %v11458_v15 }
 0x3df   : > { %7144 = vmatprep.subr.msk.bf16.mxu1 %vm637_vm1, %v11459_v55 }
 0x3e1   : > { %2929 = vrot.lane.b32.xlu0 %v8119_v38, %s7996_s9 }
 0x3e5   : > { %6724 = vmatpush3.bf16.xpose.msra.mxu0 %v1901_v8  ;;  %2931 = vrot.lane.b32.xlu0 %v8117_v37, %s7996_s9 }
 0x3e6   : > { %6712 = vmatpush3.bf16.xpose.msra.mxu1 %v1802_v0  ;;  %7147 = vmatprep.subr.msk.bf16.mxu0 %vm637_vm1, %v11460_v31 }
 0x3e7   : > { %7149 = vmatprep.subr.msk.bf16.mxu1 %vm637_vm1, %v1983_v44 }
 0x3e9   : > { %3032 = vrot.lane.b32.xlu0 %v8129_v47, %s7996_s9 }
 0x3ed   : > { %6714 = vmatmul.mubr.msk.bf16.vlgmr.msra.gmra.mrb[24].mxu1 %vm637_vm1, %v1767_v45  ;;  %6726 = vmatpush3.bf16.xpose.msra.mxu0 %v1904_v2 }
 0x3ee   : > { %6738 = vmatpush3.bf16.xpose.msra.mxu1 %v2003_v23  ;;  %3034 = vrot.lane.b32.xlu0 %v8145_v58, %s7996_s9 }
 0x3f4   : > { %v1315_v61 = vpop.xlane.xlu1 %1314 }
 0x3f8   : > { %v1309_v19 = vpop.xlane.xlu1 %1308 }
 0x3fc   : > { %v1985_v32 = vpop.permute.xlu1 %1984 }
 0x3fd   : > { %7150 = vmatprep.subr.msk.bf16.mxu1 %vm637_vm1, %v1985_v32  ;;  %v2006_v16 = vsel %vm637_vm1, %v1985_v32, 0 }
 0x3fe   : > { %6740 = vmatpush3.bf16.xpose.msra.mxu1 %v2006_v16 }
 0x400   : > { %v1987_v43 = vpop.permute.xlu1 %1986  ;;  %v1318_v26 = vpop.xlane.xlu0 %1317 }
 0x401   : > { %7151 = vmatprep.subr.msk.bf16.mxu1 %vm637_vm1, %v1987_v43  ;;  %7591 = vrcp.f32 %v1318_v26  ;;  %v2009_v59 = vsel %vm637_vm1, %v1987_v43, 0 }
 0x402   : > { %7593 = vrcp.f32 %v1309_v19 }
 0x403   : > { %7595 = vrcp.f32 %v1315_v61 }
 0x404   : > { %v1872_v33 = vpop.permute.xlu1 %1871  ;;  %v1312_v21 = vpop.xlane.xlu0 %1311 }
 0x405   : > { %7597 = vrcp.f32 %v1312_v21 }
 0x406   : > { %6742 = vmatpush3.bf16.xpose.msra.mxu1 %v2009_v59 }
 0x408   : > { %v1771_v30 = vpop.permute.xlu1 %1770  ;;  %v1884_v28 = vpop.permute.xlu0 %1883 }
 0x409   : > { %7148 = vmatprep.subr.msk.bf16.mxu0 %vm637_vm1, %v1884_v28  ;;  %v1907_v41 = vsel %vm637_vm1, %v1884_v28, 0 }
 0x40a   : > { %6728 = vmatpush3.bf16.xpose.msra.mxu0 %v1907_v41 }
 0x40b   : > { %v7592_v17 = vpop.eup %7591 }
 0x40c   : > { %v2090_v7 = vpop.permute.xlu1 %2089  ;;  %v1870_v63 = vpop.permute.xlu0 %1869  ;;  %v1382_v60 = vmul.f32 %v7592_v17, %v8682_v46 }
 0x40d   : > { %v7594_v49 = vpop.eup %7593  ;;  %v2111_v11 = vsel %vm637_vm1, %v2090_v7, 0 }
 0x40e   : > { %v7596_v6 = vpop.eup %7595  ;;  %v1379_v54 = vmul.f32 %v7594_v49, %v8678_v10 }
 0x40f   : > { %v7598_v12 = vpop.eup %7597  ;;  %v1381_v53 = vmul.f32 %v7596_v6, %v8674_v35 }
 0x410   : > { %v1977_v29 = vpop.permute.xlu1 %1976  ;;  %v2088_v56 = vpop.permute.xlu0 %2087  ;;  %v1380_v22 = vmul.f32 %v7598_v12, %v8686_v5 }
 0x411   : > { %7153 = vmatprep.subr.msk.bf16.mxu0 %vm637_vm1, %v2088_v56  ;;  %v1398_v50 = vpack.c.bf16 %v1382_v60, %v1381_v53  ;;  %v2108_v18 = vsel %vm637_vm1, %v2088_v56, 0 }
 0x412   : > { %v1397_v51 = vpack.c.bf16 %v1380_v22, %v1379_v54 }
 0x414   : > { %v1874_v42 = vpop.permute.xlu1 %1873  ;;  %6701 = vmatprep.mubr.msk.bf16.mxu0 %vm1030_vm2, %v1397_v51  ;;  %v1769_v9 = vpop.permute.xlu0 %1768 }
 0x415   : > { %6702 = vmatmul.mubr.msk.bf16.gmra.mrb[68].mxu0 %vm1030_vm2, %v1398_v50  ;;  %6717 = vmatprep.mubr.msk.bf16.mxu1 %vm637_vm1, %v1769_v9 }
 0x416   : > { %6718 = vmatmul.mubr.msk.bf16.gmra.mrb[28].mxu1 %vm637_vm1, %v1771_v30  ;;  %6729 = vmatprep.mubr.msk.bf16.mxu0 %vm637_vm1, %v1870_v63 }
 0x418   : > { %v2094_v10 = vpop.permute.xlu1 %2093  ;;  %v1989_v46 = vpop.permute.xlu0 %1988 }
 0x419   : > { %7152 = vmatprep.subr.msk.bf16.mxu1 %vm637_vm1, %v1989_v46  ;;  %v2012_v35 = vsel %vm637_vm1, %v1989_v46, 0  ;;  %v2117_v23 = vsel %vm637_vm1, %v2094_v10, 0 }
 0x41a   : > { %6744 = vmatpush3.bf16.xpose.msra.mxu1 %v2012_v35 }
 0x41c   : > { %v2082_v5 = vpop.permute.xlu1 %2081  ;;  %v1975_v1 = vpop.permute.xlu0 %1974 }
 0x41d   : > { %6730 = vmatmul.mubr.msk.bf16.vlgmr.msra.gmra.mrb[72].mxu0 %vm637_vm1, %v1872_v33  ;;  %6745 = vmatprep.mubr.msk.bf16.mxu1 %vm637_vm1, %v1975_v1 }
 0x41e   : > { %6754 = vmatpush3.bf16.xpose.msra.mxu0 %v2108_v18  ;;  %6733 = vmatprep.mubr.msk.bf16.mxu0 %vm637_vm1, %v1874_v42 }
 0x41f   : > { %7154 = vmatprep.subr.msk.bf16.mxu0 %vm637_vm1, %v2090_v7 }
 0x420   : > { %v1981_v52 = vpop.permute.xlu1 %1980  ;;  %v2092_v34 = vpop.permute.xlu0 %2091 }
 0x421   : > { %6746 = vmatmul.mubr.msk.bf16.vlgmr.msra.gmra.mrb[32].mxu1 %vm637_vm1, %v1977_v29  ;;  %v2114_v44 = vsel %vm637_vm1, %v2092_v34, 0 }
 0x424   : > { %v2086_v20 = vpop.permute.xlu1 %2085  ;;  %v1876_v40 = vpop.permute.xlu0 %1875 }
 0x425   : > { %6734 = vmatmul.mubr.msk.bf16.gmra.mrb[76].mxu0 %vm637_vm1, %v1876_v40 }
 0x426   : > { %6756 = vmatpush3.bf16.xpose.msra.mxu0 %v2111_v11  ;;  %v8982_v11 = vld [vmem:[%s11325_s3 + $0x40] sm:$0xff] }
 0x427   : > { %7155 = vmatprep.subr.msk.bf16.mxu0 %vm637_vm1, %v2092_v34 }
 0x428   : > { %v2553_v15 = vpop.permute.xlu1 %2552  ;;  %v2080_v55 = vpop.permute.xlu0 %2079 }
 0x429   : > { %6761 = vmatprep.mubr.msk.bf16.mxu0 %vm637_vm1, %v2080_v55  ;;  %6769 = vmatprep.subr.bf16.mxu1 %v2553_v15 }
 0x42a   : > { %6770 = vmatpush3.bf16.msra.mxu1 %v2553_v15 }
 0x42c   : > { %v2557_v8 = vpop.permute.xlu1 %2556  ;;  %v1979_v0 = vpop.permute.xlu0 %1978 }
 0x42d   : > { %6749 = vmatprep.mubr.msk.bf16.mxu1 %vm637_vm1, %v1979_v0 }
 0x42e   : > { %6758 = vmatpush3.bf16.xpose.msra.mxu0 %v2114_v44  ;;  %6750 = vmatmul.mubr.msk.bf16.gmra.mrb[36].mxu1 %vm637_vm1, %v1981_v52 }
 0x42f   : > { %7156 = vmatprep.subr.msk.bf16.mxu0 %vm637_vm1, %v2094_v10 }
 0x430   : > { %v2084_v31 = vpop.permute.xlu0 %2083  ;;  %v2642_v45 = vpop.permute.xlu1 %2641 }
 0x434   : > { %v2555_v2 = vpop.permute.xlu0 %2554  ;;  %v8905_v61 = vpop.permute.xlu1 %2730 }
 0x435   : > { %6771 = vmatprep.subr.bf16.mxu1 %v2555_v2 }
 0x436   : > { %6760 = vmatpush3.bf16.xpose.msra.mxu0 %v2117_v23  ;;  %6772 = vmatpush3.bf16.msra.mxu1 %v2555_v2  ;;  %v9000_v2 = vld [vmem:[%s11325_s3 + $0x58] sm:$0xff] }
 0x437   : > { %6785 = vmatprep.subr.bf16.mxu0 %v2642_v45  ;;  %6773 = vmatprep.subr.bf16.mxu1 %v2557_v8 }
 0x438   : > { %v2559_v19 = vpop.permute.xlu0 %2558  ;;  %v2646_v16 = vpop.permute.xlu1 %2645 }
 0x43a   : > { %6774 = vmatpush3.bf16.msra.mxu1 %v2557_v8  ;;  %v8990_v8 = vld [vmem:[%s11325_s3 + $0x48] sm:$0xff] }
 0x43b   : > { %6775 = vmatprep.subr.bf16.mxu1 %v2559_v19 }
 0x43c   : > { %v2644_v32 = vpop.permute.xlu0 %2643  ;;  %v8912_v26 = vpop.permute.xlu1 %2734 }
 0x43d   : > { %6762 = vmatmul.mubr.msk.bf16.vlgmr.msra.gmra.mrb[80].mxu0 %vm637_vm1, %v2082_v5 }
 0x43e   : > { %6765 = vmatprep.mubr.msk.bf16.mxu0 %vm637_vm1, %v2084_v31  ;;  %6786 = vmatpush3.bf16.msra.mxu0 %v2642_v45 }
 0x43f   : > { %6776 = vmatpush3.bf16.msra.mxu1 %v2559_v19  ;;  %6787 = vmatprep.subr.bf16.mxu0 %v2644_v32 }
 0x440   : > { %6801 = vmatprep.subr.bf16.mxu1 %v8905_v61  ;;  %v8910_v43 = vpop.permute.xlu0 %2732  ;;  %v8915_v21 = vpop.permute.xlu1 %2819 }
 0x441   : > { %11461 = vst [vmem:[#allocation7_spill] sm:$0xff] %v8915_v21 }
 0x442   : > { %6788 = vmatpush3.bf16.msra.mxu0 %v2644_v32 }
 0x443   : > { %6789 = vmatprep.subr.bf16.mxu0 %v2646_v16 }
 0x444   : > { %v2648_v33 = vpop.permute.xlu0 %2647 }
 0x445   : > { %6766 = vmatmul.mubr.msk.bf16.gmra.mrb[84].mxu0 %vm637_vm1, %v2086_v20  ;;  %v8977_v20 = vld [vmem:[%s11325_s3 + $0x50] sm:$0xff] }
 0x446   : > { %6790 = vmatpush3.bf16.msra.mxu0 %v2646_v16 }
 0x447   : > { %6791 = vmatprep.subr.bf16.mxu0 %v2648_v33 }
 0x44a   : > { %6792 = vmatpush3.bf16.msra.mxu0 %v2648_v33 }
 0x44b   : > { %6817 = vmatprep.subr.bf16.mxu0 %v8915_v21 }
 0x477   : > { %v8918_v59 = vpop.f32.mrb[48].mxu0 }
 0x478   : > { %11462 = vst [vmem:[#allocation8_spill] sm:$0xff] %v8918_v59  ;;  %v8920_v30 = vpop.f32.mrb[49].mxu0 }
 0x479   : > { %11463 = vst [vmem:[#allocation9_spill] sm:$0xff] %v8920_v30  ;;  %v8922_v28 = vpop.f32.mrb[50].mxu0 }
 0x47a   : > { %11464 = vst [vmem:[#allocation11_spill] sm:$0xff] %v8922_v28  ;;  %v8924_v41 = vpop.f32.mrb[51].mxu0 }
 0x47b   : > { %11465 = vst [vmem:[#allocation20_spill] sm:$0xff] %v8924_v41 }
 0x47f   : > { %v8926_v17 = vpop.f32.mrb[52].mxu0 }
 0x480   : > { %11466 = vst [vmem:[#allocation12_spill] sm:$0xff] %v8926_v17  ;;  %v8928_v7 = vpop.f32.mrb[53].mxu0 }
 0x481   : > { %11467 = vst [vmem:[#allocation17_spill] sm:$0xff] %v8928_v7  ;;  %v8930_v63 = vpop.f32.mrb[54].mxu0 }
 0x482   : > { %11468 = vst [vmem:[#allocation10_spill] sm:$0xff] %v8930_v63  ;;  %v8932_v49 = vpop.f32.mrb[55].mxu0 }
 0x483   : > { %11469 = vst [vmem:[#allocation13_spill] sm:$0xff] %v8932_v49 }
 0x48f   : > { %v8934_v6 = vpop.f32.mrb[56].mxu0 }
 0x490   : > { %11470 = vst [vmem:[#allocation19_spill] sm:$0xff] %v8934_v6  ;;  %v8936_v12 = vpop.f32.mrb[57].mxu0 }
 0x491   : > { %11471 = vst [vmem:[#allocation14_spill] sm:$0xff] %v8936_v12  ;;  %v8938_v60 = vpop.f32.mrb[58].mxu0  ;;  %v9173_v12 = vpop.permute.xlu0 %2736 }
 0x492   : > { %11472 = vst [vmem:[#allocation16_spill] sm:$0xff] %v8938_v60  ;;  %v8940_v29 = vpop.f32.mrb[59].mxu0 }
 0x493   : > { %11473 = vst [vmem:[#allocation15_spill] sm:$0xff] %v8940_v29 }
 0x497   : > { %v8942_v56 = vpop.f32.mrb[60].mxu0 }
 0x498   : > { %11474 = vst [vmem:[#allocation18_spill] sm:$0xff] %v8942_v56  ;;  %v8944_v54 = vpop.f32.mrb[61].mxu0 }
 0x499   : > { %11475 = vst [vmem:[#allocation21_spill] sm:$0xff] %v8944_v54  ;;  %v8946_v22 = vpop.f32.mrb[62].mxu0 }
 0x49a   : > { %11476 = vst [vmem:[#allocation22_spill] sm:$0xff] %v8946_v22  ;;  %v8948_v53 = vpop.f32.mrb[63].mxu0 }
 0x49b   : > { %11477 = vst [vmem:[#allocation23_spill] sm:$0xff] %v8948_v53 }
 0x49f   : > { %v8950_v51 = vpop.f32.mrb[16].mxu1 }
 0x4a0   : > { %11478 = vst [vmem:[#allocation24_spill] sm:$0xff] %v8950_v51  ;;  %v8952_v50 = vpop.f32.mrb[17].mxu1 }
 0x4a1   : > { %11479 = vst [vmem:[#allocation25_spill] sm:$0xff] %v8952_v50  ;;  %v8954_v42 = vpop.f32.mrb[18].mxu1 }
 0x4a2   : > { %11480 = vst [vmem:[#allocation26_spill] sm:$0xff] %v8954_v42  ;;  %v8956_v9 = vpop.f32.mrb[19].mxu1 }
 0x4a3   : > { %11481 = vst [vmem:[#allocation27_spill] sm:$0xff] %v8956_v9 }
 0x4a7   : > { %v8958_v10 = vpop.f32.mrb[20].mxu1 }
 0x4a8   : > { %11482 = vst [vmem:[#allocation28_spill] sm:$0xff] %v8958_v10  ;;  %v8960_v46 = vpop.f32.mrb[21].mxu1 }
 0x4a9   : > { %11483 = vst [vmem:[#allocation29_spill] sm:$0xff] %v8960_v46  ;;  %v8962_v35 = vpop.f32.mrb[22].mxu1 }
 0x4aa   : > { %11484 = vst [vmem:[#allocation30_spill] sm:$0xff] %v8962_v35  ;;  %v8964_v5 = vpop.f32.mrb[23].mxu1 }
 0x4ab   : > { %11485 = vst [vmem:[#allocation31_spill] sm:$0xff] %v8964_v5 }
 0x4af   : > { %v8966_v1 = vpop.f32.mrb[64].mxu0 }
 0x4b0   : > { %11486 = vst [vmem:[#allocation32_spill] sm:$0xff] %v8966_v1  ;;  %v8968_v18 = vpop.f32.mrb[65].mxu0 }
 0x4b1   : > { %11487 = vst [vmem:[#allocation33_spill] sm:$0xff] %v8968_v18  ;;  %v8970_v52 = vpop.f32.mrb[66].mxu0 }
 0x4b2   : > { %11488 = vst [vmem:[#allocation34_spill] sm:$0xff] %v8970_v52  ;;  %v8972_v34 = vpop.f32.mrb[67].mxu0 }
 0x4b3   : > { %11489 = vst [vmem:[#allocation35_spill] sm:$0xff] %v8972_v34  ;;  %v9043_v34 = vld [vmem:[%s11325_s3 + $0x68] sm:$0xff] }
 0x4c0   : > { %v6715_v40 = vpop.f32.mrb[24].mxu1 }
 0x4c1   : > { %v8985_v15 = vadd.f32 %v6715_v40, %v8977_v20  ;;  %v1838_v55 = vpop.f32.mrb[25].mxu1  ;;  %v9017_v40 = vld [vmem:[%s11325_s3 + $0x70] sm:$0xff] }
 0x4c2   : > { %v6716_v0 = vpop.f32.mrb[26].mxu1  ;;  %v8993_v44 = vadd.f32 %v8982_v11, %v1838_v55 }
 0x4c3   : > { %v1841_v31 = vpop.f32.mrb[27].mxu1  ;;  %v2190_v45 = vsel %vm1030_vm2, %v8985_v15, -inf  ;;  %v9008_v32 = vadd.f32 %v6716_v0, %v9000_v2 }
 0x4c4   : > { %v9003_v23 = vadd.f32 %v8990_v8, %v1841_v31  ;;  %2191 = vmax.xlane.f32.xlu0 %v2190_v45  ;;  %v2184_v16 = vsel %vm1030_vm2, %v8993_v44, -inf  ;;  %v9026_v45 = vld [vmem:[%s11325_s3 + $0x60] sm:$0xff] }
 0x4c5   : > { %v2193_v33 = vsel %vm1030_vm2, %v9008_v32, -inf }
 0x4c6   : > { %v2187_v19 = vsel %vm1030_vm2, %v9003_v23, -inf }
 0x4c7   : > { %2188 = vmax.xlane.f32.xlu1 %v2187_v19  ;;  %v9031_v19 = vld [vmem:[%s11325_s3 + $0x78] sm:$0xff] }
 0x4c8   : > { %2185 = vmax.xlane.f32.xlu0 %v2184_v16 }
 0x4cc   : > { %2194 = vmax.xlane.f32.xlu0 %v2193_v33 }
 0x4e8   : > { %v9019_v55 = vpop.f32.mrb[68].mxu0 }
 0x4e9   : > { %11490 = vst [vmem:[#allocation36_spill] sm:$0xff] %v9019_v55  ;;  %v9021_v31 = vpop.f32.mrb[69].mxu0  ;;  %v6719_v0 = vpop.f32.mrb[28].mxu1 }
 0x4ea   : > { %11491 = vst [vmem:[#allocation37_spill] sm:$0xff] %v9021_v31  ;;  %v9034_v16 = vadd.f32 %v6719_v0, %v9017_v40  ;;  %v9036_v33 = vpop.f32.mrb[70].mxu0  ;;  %v1854_v18 = vpop.f32.mrb[29].mxu1 }
 0x4eb   : > { %11492 = vst [vmem:[#allocation38_spill] sm:$0xff] %v9036_v33  ;;  %v9038_v55 = vpop.f32.mrb[71].mxu0  ;;  %v6720_v31 = vpop.f32.mrb[30].mxu1  ;;  %v9046_v1 = vadd.f32 %v9026_v45, %v1854_v18 }
 0x4ec   : > { %11493 = vst [vmem:[#allocation39_spill] sm:$0xff] %v9038_v55  ;;  %v9049_v52 = vadd.f32 %v6720_v31, %v9031_v19  ;;  %v1857_v46 = vpop.f32.mrb[31].mxu1  ;;  %v2202_v0 = vsel %vm1030_vm2, %v9034_v16, -inf }
 0x4ed   : > { %2203 = vmax.xlane.f32.xlu1 %v2202_v0  ;;  %v9054_v33 = vadd.f32 %v9043_v34, %v1857_v46  ;;  %v2196_v18 = vsel %vm1030_vm2, %v9046_v1, -inf }
 0x4ee   : > { %v2205_v55 = vsel %vm1030_vm2, %v9049_v52, -inf }
 0x4ef   : > { %2206 = vmax.xlane.f32.xlu0 %v2205_v55  ;;  %v2199_v0 = vsel %vm1030_vm2, %v9054_v33, -inf }
 0x4f0   : > { %v6731_v5 = vpop.f32.mrb[72].mxu0 }
 0x4f1   : > { %v9061_v10 = vadd.f32 %v6731_v5, %v8977_v20  ;;  %v1943_v31 = vpop.f32.mrb[73].mxu0  ;;  %2197 = vmax.xlane.f32.xlu1 %v2196_v18 }
 0x4f2   : > { %v6732_v35 = vpop.f32.mrb[74].mxu0  ;;  %v9071_v50 = vadd.f32 %v8982_v11, %v1943_v31 }
 0x4f3   : > { %v9066_v46 = vadd.f32 %v6732_v35, %v9000_v2  ;;  %v1946_v42 = vpop.f32.mrb[75].mxu0  ;;  %2200 = vmax.xlane.f32.xlu0 %v2199_v0  ;;  %v2214_v55 = vsel %vm1030_vm2, %v9061_v10, -inf }
 0x4f4   : > { %v6747_v9 = vpop.f32.mrb[32].mxu1  ;;  %v9076_v51 = vadd.f32 %v8990_v8, %v1946_v42  ;;  %v2208_v0 = vsel %vm1030_vm2, %v9071_v50, -inf }
 0x4f5   : > { %2215 = vmax.xlane.f32.xlu1 %v2214_v55  ;;  %v2048_v5 = vpop.f32.mrb[33].mxu1  ;;  %v2217_v18 = vsel %vm1030_vm2, %v9066_v46, -inf  ;;  %v9099_v41 = vadd.f32 %v6747_v9, %v8977_v20 }
 0x4f6   : > { %v6748_v17 = vpop.f32.mrb[34].mxu1  ;;  %v2211_v49 = vsel %vm1030_vm2, %v9076_v51, -inf }
 0x4f7   : > { %2218 = vmax.xlane.f32.xlu0 %v2217_v18  ;;  %v2051_v35 = vpop.f32.mrb[35].mxu1  ;;  %v9104_v30 = vadd.f32 %v6748_v17, %v9000_v2  ;;  %v2238_v9 = vsel %vm1030_vm2, %v9099_v41, -inf }
 0x4f8   : > { %v6735_v63 = vpop.f32.mrb[76].mxu0 }
 0x4f9   : > { %v9081_v7 = vadd.f32 %v6735_v63, %v9017_v40  ;;  %2209 = vmax.xlane.f32.xlu1 %v2208_v0  ;;  %v1959_v31 = vpop.f32.mrb[77].mxu0  ;;  %v2241_v17 = vsel %vm1030_vm2, %v9104_v30, -inf }
 0x4fa   : > { %v6736_v55 = vpop.f32.mrb[78].mxu0  ;;  %v9091_v28 = vadd.f32 %v9026_v45, %v1959_v31 }
 0x4fb   : > { %v9086_v59 = vadd.f32 %v6736_v55, %v9031_v19  ;;  %2212 = vmax.xlane.f32.xlu0 %v2211_v49  ;;  %v1962_v42 = vpop.f32.mrb[79].mxu0  ;;  %v2226_v18 = vsel %vm1030_vm2, %v9081_v7, -inf }
 0x4fc   : > { %v9096_v0 = vadd.f32 %v9043_v34, %v1962_v42  ;;  %v2220_v49 = vsel %vm1030_vm2, %v9091_v28, -inf  ;;  %v9109_v42 = vadd.f32 %v8982_v11, %v2048_v5 }
 0x4fd   : > { %2227 = vmax.xlane.f32.xlu1 %v2226_v18  ;;  %v2229_v63 = vsel %vm1030_vm2, %v9086_v59, -inf }
 0x4fe   : > { %v2223_v18 = vsel %vm1030_vm2, %v9096_v0, -inf }
 0x4ff   : > { %2230 = vmax.xlane.f32.xlu0 %v2229_v63 }
 0x501   : > { %2221 = vmax.xlane.f32.xlu1 %v2220_v49  ;;  %v6751_v55 = vpop.f32.mrb[36].mxu1  ;;  %v9114_v49 = vadd.f32 %v8990_v8, %v2051_v35 }
 0x502   : > { %v2064_v31 = vpop.f32.mrb[37].mxu1  ;;  %v9119_v22 = vadd.f32 %v6751_v55, %v9017_v40 }
 0x503   : > { %2224 = vmax.xlane.f32.xlu0 %v2223_v18  ;;  %v6752_v56 = vpop.f32.mrb[38].mxu1  ;;  %v2232_v18 = vsel %vm1030_vm2, %v9109_v42, -inf  ;;  %v9129_v35 = vadd.f32 %v9026_v45, %v2064_v31 }
 0x504   : > { %v2067_v63 = vpop.f32.mrb[39].mxu1  ;;  %v9124_v5 = vadd.f32 %v6752_v56, %v9031_v19 }
 0x505   : > { %2239 = vmax.xlane.f32.xlu1 %v2238_v9  ;;  %v2235_v9 = vsel %vm1030_vm2, %v9114_v49, -inf  ;;  %v9134_v55 = vadd.f32 %v9043_v34, %v2067_v63  ;;  %v2244_v54 = vsel %vm1030_vm2, %v9129_v35, -inf }
 0x507   : > { %2242 = vmax.xlane.f32.xlu0 %v2241_v17  ;;  %v2250_v17 = vsel %vm1030_vm2, %v9119_v22, -inf }
 0x509   : > { %2233 = vmax.xlane.f32.xlu1 %v2232_v18  ;;  %v2253_v18 = vsel %vm1030_vm2, %v9124_v5, -inf }
 0x50b   : > { %2236 = vmax.xlane.f32.xlu0 %v2235_v9 }
 0x50d   : > { %2251 = vmax.xlane.f32.xlu1 %v2250_v17  ;;  %v2247_v17 = vsel %vm1030_vm2, %v9134_v55, -inf }
 0x50f   : > { %2254 = vmax.xlane.f32.xlu0 %v2253_v18 }
 0x510   : > { %v6763_v56 = vpop.f32.mrb[80].mxu0 }
 0x511   : > { %v9141_v9 = vadd.f32 %v6763_v56, %v8977_v20  ;;  %v2153_v31 = vpop.f32.mrb[81].mxu0  ;;  %2245 = vmax.xlane.f32.xlu1 %v2244_v54 }
 0x512   : > { %v6764_v53 = vpop.f32.mrb[82].mxu0  ;;  %v9149_v18 = vadd.f32 %v8982_v11, %v2153_v31 }
 0x513   : > { %v9146_v63 = vadd.f32 %v6764_v53, %v9000_v2  ;;  %v2156_v6 = vpop.f32.mrb[83].mxu0  ;;  %2248 = vmax.xlane.f32.xlu0 %v2247_v17  ;;  %v2262_v60 = vsel %vm1030_vm2, %v9141_v9, -inf }
 0x514   : > { %v9154_v20 = vadd.f32 %v8990_v8, %v2156_v6  ;;  %v2256_v53 = vsel %vm1030_vm2, %v9149_v18, -inf }
 0x515   : > { %2263 = vmax.xlane.f32.xlu1 %v2262_v60  ;;  %v2265_v54 = vsel %vm1030_vm2, %v9146_v63, -inf }
 0x516   : > { %v2259_v60 = vsel %vm1030_vm2, %v9154_v20, -inf }
 0x517   : > { %2266 = vmax.xlane.f32.xlu0 %v2265_v54 }
 0x518   : > { %v6767_v56 = vpop.f32.mrb[84].mxu0 }
 0x519   : > { %v9161_v2 = vadd.f32 %v6767_v56, %v9017_v40  ;;  %v2169_v11 = vpop.f32.mrb[85].mxu0  ;;  %2257 = vmax.xlane.f32.xlu1 %v2256_v53  ;;  %v9184_v53 = vpop.permute.xlu0 %2821 }
 0x51a   : > { %v6768_v31 = vpop.f32.mrb[86].mxu0  ;;  %v9169_v17 = vadd.f32 %v9026_v45, %v2169_v11  ;;  %11494 = vst [vmem:[#allocation40_spill] sm:$0xff] %v9184_v53 }
 0x51b   : > { %v9166_v6 = vadd.f32 %v6768_v31, %v9031_v19  ;;  %v2172_v8 = vpop.f32.mrb[87].mxu0  ;;  %2260 = vmax.xlane.f32.xlu0 %v2259_v60  ;;  %v2274_v54 = vsel %vm1030_vm2, %v9161_v2, -inf }
 0x51c   : > { %v9176_v40 = vadd.f32 %v9043_v34, %v2172_v8  ;;  %v2268_v19 = vsel %vm1030_vm2, %v9169_v17, -inf  ;;  %v9194_v8 = vpop.permute.xlu1 %2927 }
 0x51d   : > { %2275 = vmax.xlane.f32.xlu1 %v2274_v54  ;;  %v2277_v56 = vsel %vm1030_vm2, %v9166_v6, -inf  ;;  %v9186_v11 = vpop.permute.xlu0 %2925  ;;  %11498 = vst [vmem:[#allocation44_spill] sm:$0xff] %v9194_v8 }
 0x51e   : > { %v2271_v45 = vsel %vm1030_vm2, %v9176_v40, -inf }
 0x51f   : > { %2278 = vmax.xlane.f32.xlu0 %v2277_v56 }
 0x520   : > { %v9198_v56 = vpop.permute.xlu1 %3030 }
 0x521   : > { %2269 = vmax.xlane.f32.xlu1 %v2268_v19  ;;  %v9188_v31 = vpop.permute.xlu0 %2823  ;;  %11500 = vst [vmem:[#allocation46_spill] sm:$0xff] %v9198_v56 }
 0x522   : > { %11495 = vst [vmem:[#allocation41_spill] sm:$0xff] %v9188_v31 }
 0x523   : > { %2272 = vmax.xlane.f32.xlu0 %v2271_v45 }
 0x524   : > { %v9202_v29 = vpop.permute.xlu1 %2917 }
 0x525   : > { %v9190_v34 = vpop.permute.xlu0 %2825  ;;  %11502 = vst [vmem:[#allocation48_spill] sm:$0xff] %v9202_v29 }
 0x526   : > { %11496 = vst [vmem:[#allocation42_spill] sm:$0xff] %v9190_v34 }
 0x528   : > { %v9206_v45 = vpop.permute.xlu1 %3135 }
 0x529   : > { %v9192_v60 = vpop.permute.xlu0 %2929  ;;  %11504 = vst [vmem:[#allocation50_spill] sm:$0xff] %v9206_v45 }
 0x52a   : > { %11497 = vst [vmem:[#allocation43_spill] sm:$0xff] %v9192_v60 }
 0x52d   : > { %v9196_v54 = vpop.permute.xlu0 %2931 }
 0x52e   : > { %11499 = vst [vmem:[#allocation45_spill] sm:$0xff] %v9196_v54 }
 0x531   : > { %v9200_v19 = vpop.permute.xlu0 %3032 }
 0x532   : > { %11501 = vst [vmem:[#allocation47_spill] sm:$0xff] %v9200_v19 }
 0x535   : > { %v9204_v53 = vpop.permute.xlu0 %3034 }
 0x536   : > { %11503 = vst [vmem:[#allocation49_spill] sm:$0xff] %v9204_v53 }
 0x551   : > { %v2192_v62 = vpop.xlane.xlu0 %2191 }
 0x552   : > { %v2282_v31 = vsub.f32 %v8985_v15, %v2192_v62 }
 0x554   : > { %v2316_v34 = vmul.f32 1.442695, %v2282_v31  ;;  %v2189_v21 = vpop.xlane.xlu1 %2188 }
 0x555   : > { %v2186_v60 = vpop.xlane.xlu0 %2185  ;;  %v2281_v54 = vsub.f32 %v9003_v23, %v2189_v21 }
 0x556   : > { %7599 = vpow2.f32 %v2316_v34  ;;  %v2280_v8 = vsub.f32 %v8993_v44, %v2186_v60 }
 0x557   : > { %v2314_v29 = vmul.f32 1.442695, %v2281_v54 }
 0x558   : > { %v2312_v56 = vmul.f32 1.442695, %v2280_v8 }
 0x559   : > { %v2195_v36 = vpop.xlane.xlu0 %2194 }
 0x55a   : > { %7601 = vpow2.f32 %v2312_v56  ;;  %v2283_v19 = vsub.f32 %v9008_v32, %v2195_v36 }
 0x55c   : > { %v2318_v53 = vmul.f32 1.442695, %v2283_v19 }
 0x55e   : > { %7603 = vpow2.f32 %v2318_v53 }
 0x55f   : > { %7605 = vpow2.f32 %v2314_v29 }
 0x560   : > { %v9212_v45 = vpop.eup %7599 }
 0x561   : > { %v2382_v62 = vsel %vm1030_vm2, %v9212_v45, 0.0 }
 0x562   : > { %2383 = vadd.xlane.f32.xlu1 %v2382_v62 }
 0x564   : > { %v9216_v15 = vpop.eup %7601 }
 0x565   : > { %v2376_v21 = vsel %vm1030_vm2, %v9216_v15, 0.0 }
 0x566   : > { %2377 = vadd.xlane.f32.xlu1 %v2376_v21 }
 0x568   : > { %v9220_v44 = vpop.eup %7603 }
 0x569   : > { %v2385_v36 = vsel %vm1030_vm2, %v9220_v44, 0.0  ;;  %v9224_v23 = vpop.eup %7605 }
 0x56a   : > { %2386 = vadd.xlane.f32.xlu0 %v2385_v36  ;;  %v2379_v29 = vsel %vm1030_vm2, %v9224_v23, 0.0 }
 0x56e   : > { %2380 = vadd.xlane.f32.xlu0 %v2379_v29 }
 0x57a   : > { %v2204_v32 = vpop.xlane.xlu1 %2203 }
 0x57b   : > { %v2286_v53 = vsub.f32 %v9034_v16, %v2204_v32 }
 0x57c   : > { %v2207_v31 = vpop.xlane.xlu0 %2206 }
 0x57d   : > { %v2324_v34 = vmul.f32 1.442695, %v2286_v53  ;;  %v2287_v60 = vsub.f32 %v9049_v52, %v2207_v31 }
 0x57e   : > { %v2198_v8 = vpop.xlane.xlu1 %2197 }
 0x57f   : > { %7607 = vpow2.f32 %v2324_v34  ;;  %v2326_v54 = vmul.f32 1.442695, %v2287_v60  ;;  %v2284_v56 = vsub.f32 %v9046_v1, %v2198_v8 }
 0x580   : > { %v2201_v19 = vpop.xlane.xlu0 %2200 }
 0x581   : > { %7609 = vpow2.f32 %v2326_v54  ;;  %v2320_v62 = vmul.f32 1.442695, %v2284_v56  ;;  %v2285_v21 = vsub.f32 %v9054_v33, %v2201_v19 }
 0x582   : > { %v2216_v36 = vpop.xlane.xlu1 %2215 }
 0x583   : > { %7611 = vpow2.f32 %v2320_v62  ;;  %v2322_v29 = vmul.f32 1.442695, %v2285_v21  ;;  %v2290_v58 = vsub.f32 %v9061_v10, %v2216_v36 }
 0x584   : > { %v2219_v16 = vpop.xlane.xlu0 %2218 }
 0x585   : > { %7613 = vpow2.f32 %v2322_v29  ;;  %v2332_v32 = vmul.f32 1.442695, %v2290_v58  ;;  %v2291_v52 = vsub.f32 %v9066_v46, %v2219_v16 }
 0x586   : > { %v2210_v53 = vpop.xlane.xlu1 %2209 }
 0x587   : > { %7615 = vpow2.f32 %v2332_v32  ;;  %v2288_v31 = vsub.f32 %v9071_v50, %v2210_v53  ;;  %v2334_v60 = vmul.f32 1.442695, %v2291_v52 }
 0x588   : > { %v2213_v1 = vpop.xlane.xlu0 %2212 }
 0x589   : > { %v9235_v34 = vpop.eup %7607  ;;  %v2328_v8 = vmul.f32 1.442695, %v2288_v31  ;;  %v2289_v33 = vsub.f32 %v9076_v51, %v2213_v1 }
 0x58a   : > { %v2228_v54 = vpop.xlane.xlu1 %2227  ;;  %v2394_v10 = vsel %vm1030_vm2, %v9235_v34, 0.0 }
 0x58b   : > { %v9240_v56 = vpop.eup %7609  ;;  %7617 = vpow2.f32 %v2328_v8  ;;  %2395 = vadd.xlane.f32.xlu0 %v2394_v10  ;;  %v2330_v58 = vmul.f32 1.442695, %v2289_v33  ;;  %v2294_v46 = vsub.f32 %v9081_v7, %v2228_v54 }
 0x58c   : > { %v2231_v19 = vpop.xlane.xlu0 %2230  ;;  %7619 = vpow2.f32 %v2334_v60  ;;  %v2397_v36 = vsel %vm1030_vm2, %v9240_v56, 0.0 }
 0x58d   : > { %v9243_v50 = vpop.eup %7611  ;;  %v2295_v62 = vsub.f32 %v9086_v59, %v2231_v19  ;;  %7621 = vpow2.f32 %v2330_v58  ;;  %v2340_v7 = vmul.f32 1.442695, %v2294_v46 }
 0x58e   : > { %v2222_v21 = vpop.xlane.xlu1 %2221  ;;  %v2388_v51 = vsel %vm1030_vm2, %v9243_v50, 0.0 }
 0x58f   : > { %v9250_v29 = vpop.eup %7613  ;;  %v2342_v16 = vmul.f32 1.442695, %v2295_v62  ;;  %2389 = vadd.xlane.f32.xlu1 %v2388_v51  ;;  %2398 = vadd.xlane.f32.xlu0 %v2397_v36  ;;  %v2292_v59 = vsub.f32 %v9091_v28, %v2222_v21 }
 0x590   : > { %v2225_v32 = vpop.xlane.xlu0 %2224  ;;  %v2391_v60 = vsel %vm1030_vm2, %v9250_v29, 0.0 }
 0x591   : > { %v9252_v52 = vpop.eup %7615  ;;  %7623 = vpow2.f32 %v2342_v16  ;;  %v2293_v53 = vsub.f32 %v9096_v0, %v2225_v32  ;;  %v2336_v58 = vmul.f32 1.442695, %v2292_v59 }
 0x592   : > { %v2240_v31 = vpop.xlane.xlu1 %2239  ;;  %v2406_v1 = vsel %vm1030_vm2, %v9252_v52, 0.0  ;;  %7625 = vpow2.f32 %v2340_v7 }
 0x593   : > { %v2338_v8 = vmul.f32 1.442695, %v2293_v53  ;;  %v2298_v33 = vsub.f32 %v9099_v41, %v2240_v31  ;;  %2407 = vadd.xlane.f32.xlu1 %v2406_v1  ;;  %2392 = vadd.xlane.f32.xlu0 %v2391_v60 }
 0x594   : > { %v2243_v54 = vpop.xlane.xlu0 %2242 }
 0x595   : > { %v9261_v10 = vpop.eup %7617  ;;  %7627 = vpow2.f32 %v2338_v8  ;;  %v2348_v28 = vmul.f32 1.442695, %v2298_v33  ;;  %v2299_v21 = vsub.f32 %v9104_v30, %v2243_v54 }
 0x596   : > { %v2234_v0 = vpop.xlane.xlu1 %2233  ;;  %v2400_v46 = vsel %vm1030_vm2, %v9261_v10, 0.0  ;;  %v9265_v19 = vpop.eup %7619 }
 0x597   : > { %7629 = vpow2.f32 %v2348_v28  ;;  %v2296_v62 = vsub.f32 %v9109_v42, %v2234_v0  ;;  %2401 = vadd.xlane.f32.xlu0 %v2400_v46  ;;  %v9270_v16 = vpop.eup %7621  ;;  %v2409_v32 = vsel %vm1030_vm2, %v9265_v19, 0.0  ;;  %v2350_v1 = vmul.f32 1.442695, %v2299_v21 }
 0x598   : > { %v2237_v41 = vpop.xlane.xlu0 %2236  ;;  %7631 = vpow2.f32 %v2336_v58  ;;  %v2403_v33 = vsel %vm1030_vm2, %v9270_v16, 0.0 }
 0x599   : > { %v2344_v51 = vmul.f32 1.442695, %v2296_v62  ;;  %v2297_v36 = vsub.f32 %v9114_v49, %v2237_v41 }
 0x59a   : > { %v2252_v7 = vpop.xlane.xlu1 %2251 }
 0x59b   : > { %v9274_v59 = vpop.eup %7623  ;;  %v2346_v53 = vmul.f32 1.442695, %v2297_v36  ;;  %v2302_v31 = vsub.f32 %v9119_v22, %v2252_v7  ;;  %2410 = vadd.xlane.f32.xlu0 %v2409_v32  ;;  %7633 = vpow2.f32 %v2344_v51 }
 0x59c   : > { %v2255_v42 = vpop.xlane.xlu0 %2254  ;;  %v2421_v30 = vsel %vm1030_vm2, %v9274_v59, 0.0  ;;  %v9279_v60 = vpop.eup %7625 }
 0x59d   : > { %7635 = vpow2.f32 %v2346_v53  ;;  %v2356_v49 = vmul.f32 1.442695, %v2302_v31  ;;  %2422 = vadd.xlane.f32.xlu1 %v2421_v30  ;;  %v2303_v58 = vsub.f32 %v9124_v5, %v2255_v42  ;;  %v2418_v51 = vsel %vm1030_vm2, %v9279_v60, 0.0 }
 0x59e   : > { %v2246_v8 = vpop.xlane.xlu1 %2245 }
 0x59f   : > { %v9283_v54 = vpop.eup %7627  ;;  %7637 = vpow2.f32 %v2356_v49  ;;  %v2300_v22 = vsub.f32 %v9129_v35, %v2246_v8  ;;  %2404 = vadd.xlane.f32.xlu0 %v2403_v33  ;;  %v2358_v5 = vmul.f32 1.442695, %v2303_v58 }
 0x5a0   : > { %v2249_v28 = vpop.xlane.xlu0 %2248  ;;  %v2415_v0 = vsel %vm1030_vm2, %v9283_v54, 0.0  ;;  %7639 = vpow2.f32 %v2350_v1 }
 0x5a1   : > { %v9289_v46 = vpop.eup %7629  ;;  %v2352_v62 = vmul.f32 1.442695, %v2300_v22  ;;  %v2301_v41 = vsub.f32 %v9134_v55, %v2249_v28  ;;  %2416 = vadd.xlane.f32.xlu1 %v2415_v0 }
 0x5a2   : > { %v2264_v21 = vpop.xlane.xlu1 %2263  ;;  %v9294_v36 = vpop.eup %7631  ;;  %v2430_v53 = vsel %vm1030_vm2, %v9289_v46, 0.0 }
 0x5a3   : > { %v2354_v35 = vmul.f32 1.442695, %v2301_v41  ;;  %2419 = vadd.xlane.f32.xlu0 %v2418_v51  ;;  %7641 = vpow2.f32 %v2352_v62  ;;  %v2306_v7 = vsub.f32 %v9141_v9, %v2264_v21  ;;  %v2412_v30 = vsel %vm1030_vm2, %v9294_v36, 0.0 }
 0x5a4   : > { %v2267_v32 = vpop.xlane.xlu0 %2266 }
 0x5a5   : > { %7643 = vpow2.f32 %v2354_v35  ;;  %v2307_v55 = vsub.f32 %v9146_v63, %v2267_v32  ;;  %2431 = vadd.xlane.f32.xlu1 %v2430_v53  ;;  %v9300_v31 = vpop.eup %7633  ;;  %v2364_v9 = vmul.f32 1.442695, %v2306_v7 }
 0x5a6   : > { %v2258_v42 = vpop.xlane.xlu1 %2257  ;;  %7645 = vpow2.f32 %v2358_v5  ;;  %v2424_v28 = vsel %vm1030_vm2, %v9300_v31, 0.0 }
 0x5a7   : > { %v9304_v1 = vpop.eup %7635  ;;  %v2366_v49 = vmul.f32 1.442695, %v2307_v55  ;;  %2413 = vadd.xlane.f32.xlu0 %v2412_v30  ;;  %v2304_v63 = vsub.f32 %v9149_v18, %v2258_v42 }
 0x5a8   : > { %v2261_v8 = vpop.xlane.xlu0 %2260  ;;  %v2427_v33 = vsel %vm1030_vm2, %v9304_v1, 0.0 }
 0x5a9   : > { %v9308_v22 = vpop.eup %7637  ;;  %7647 = vpow2.f32 %v2366_v49  ;;  %v2305_v58 = vsub.f32 %v9154_v20, %v2261_v8  ;;  %2428 = vadd.xlane.f32.xlu1 %v2427_v33  ;;  %v2360_v21 = vmul.f32 1.442695, %v2304_v63 }
 0x5aa   : > { %v9314_v0 = vpop.eup %7639  ;;  %7649 = vpow2.f32 %v2364_v9  ;;  %v2442_v41 = vsel %vm1030_vm2, %v9308_v22, 0.0 }
 0x5ab   : > { %v2362_v62 = vmul.f32 1.442695, %v2305_v58  ;;  %2425 = vadd.xlane.f32.xlu0 %v2424_v28  ;;  %v2433_v18 = vsel %vm1030_vm2, %v9314_v0, 0.0 }
 0x5ac   : > { %v2279_v63 = vpop.xlane.xlu0 %2278 }
 0x5ad   : > { %7651 = vpow2.f32 %v2362_v62  ;;  %2443 = vadd.xlane.f32.xlu1 %v2442_v41  ;;  %v9318_v51 = vpop.eup %7641  ;;  %v2276_v62 = vpop.xlane.xlu1 %2275 }
 0x5ae   : > { %7653 = vpow2.f32 %v2360_v21  ;;  %v2436_v7 = vsel %vm1030_vm2, %v9318_v51, 0.0  ;;  %v2310_v21 = vsub.f32 %v9161_v2, %v2276_v62 }
 0x5af   : > { %v9322_v20 = vpop.eup %7643  ;;  %2434 = vadd.xlane.f32.xlu0 %v2433_v18 }
 0x5b0   : > { %v2439_v35 = vsel %vm1030_vm2, %v9322_v20, 0.0  ;;  %v9326_v5 = vpop.eup %7645  ;;  %v2273_v58 = vpop.xlane.xlu0 %2272 }
 0x5b1   : > { %2440 = vadd.xlane.f32.xlu1 %v2439_v35  ;;  %v2445_v42 = vsel %vm1030_vm2, %v9326_v5, 0.0  ;;  %v2309_v28 = vsub.f32 %v9176_v40, %v2273_v58  ;;  %v2270_v18 = vpop.xlane.xlu1 %2269  ;;  %v2372_v35 = vmul.f32 1.442695, %v2310_v21 }
 0x5b3   : > { %v9330_v32 = vpop.eup %7647  ;;  %2437 = vadd.xlane.f32.xlu0 %v2436_v7  ;;  %v2370_v41 = vmul.f32 1.442695, %v2309_v28  ;;  %v2308_v7 = vsub.f32 %v9169_v17, %v2270_v18 }
 0x5b4   : > { %v2457_v53 = vsel %vm1030_vm2, %v9330_v32, 0.0  ;;  %v9334_v55 = vpop.eup %7649 }
 0x5b5   : > { %2458 = vadd.xlane.f32.xlu1 %v2457_v53  ;;  %v2454_v9 = vsel %vm1030_vm2, %v9334_v55, 0.0  ;;  %7655 = vpow2.f32 %v2370_v41  ;;  %v2311_v53 = vsub.f32 %v9166_v6, %v2279_v63 }
 0x5b6   : > { %7657 = vpow2.f32 %v2372_v35 }
 0x5b7   : > { %v9338_v30 = vpop.eup %7651  ;;  %2446 = vadd.xlane.f32.xlu0 %v2445_v42  ;;  %v2368_v42 = vmul.f32 1.442695, %v2308_v7 }
 0x5b8   : > { %v2451_v49 = vsel %vm1030_vm2, %v9338_v30, 0.0  ;;  %v9344_v8 = vpop.eup %7653 }
 0x5b9   : > { %2452 = vadd.xlane.f32.xlu1 %v2451_v49  ;;  %v2448_v33 = vsel %vm1030_vm2, %v9344_v8, 0.0  ;;  %7659 = vpow2.f32 %v2368_v42 }
 0x5bb   : > { %2455 = vadd.xlane.f32.xlu0 %v2454_v9  ;;  %v2374_v9 = vmul.f32 1.442695, %v2311_v53 }
 0x5bd   : > { %7661 = vpow2.f32 %v2374_v9 }
 0x5bf   : > { %2449 = vadd.xlane.f32.xlu0 %v2448_v33  ;;  %v9356_v49 = vpop.eup %7655 }
 0x5c0   : > { %v2463_v40 = vsel %vm1030_vm2, %v9356_v49, 0.0  ;;  %v9360_v33 = vpop.eup %7657 }
 0x5c1   : > { %v2466_v58 = vsel %vm1030_vm2, %v9360_v33, 0.0 }
 0x5c3   : > { %v9364_v17 = vpop.eup %7659 }
 0x5c4   : > { %v2460_v28 = vsel %vm1030_vm2, %v9364_v17, 0.0 }
 0x5c7   : > { %v9368_v62 = vpop.eup %7661 }
 0x5c8   : > { %v2469_v21 = vsel %vm1030_vm2, %v9368_v62, 0.0 }
 0x5ca   : > { %3036 = vrot.lane.b32.xlu1 %v8143_v57, %s7996_s9 }
 0x5d5   : > { %2919 = vrot.lane.b32.xlu0 %v8103_v27, %s7997_s10 }
 0x5ee   : > { %2464 = vadd.xlane.f32.xlu1 %v2463_v40 }
 0x5ef   : > { %v2384_v2 = vpop.xlane.xlu1 %2383 }
 0x5f3   : > { %v2378_v6 = vpop.xlane.xlu1 %2377 }
 0x5f4   : > { %2467 = vadd.xlane.f32.xlu0 %v2466_v58 }
 0x5f7   : > { %v2387_v63 = vpop.xlane.xlu0 %2386 }
 0x5f8   : > { %2461 = vadd.xlane.f32.xlu0 %v2460_v28  ;;  %7663 = vrcp.f32 %v2387_v63 }
 0x5f9   : > { %7665 = vrcp.f32 %v2378_v6 }
 0x5fa   : > { %7667 = vrcp.f32 %v2384_v2 }
 0x5fb   : > { %v2381_v41 = vpop.xlane.xlu0 %2380 }
 0x5fc   : > { %7669 = vrcp.f32 %v2381_v41  ;;  %2470 = vadd.xlane.f32.xlu0 %v2469_v21  ;;  %v11505_v41 = vld [vmem:[#allocation5_spill] sm:$0xff] }
 0x5ff   : > { %3022 = vrot.lane.b32.xlu1 %v8131_v48, %s7997_s10 }
 0x602   : > { %v7664_v18 = vpop.eup %7663 }
 0x603   : > { %3240 = vrot.lane.b32.xlu1 %v8181_v25, %s7996_s9  ;;  %v7666_v35 = vpop.eup %7665  ;;  %v2507_v42 = vmul.f32 %v7664_v18, %v9220_v44 }
 0x604   : > { %v7668_v7 = vpop.eup %7667  ;;  %v2504_v9 = vmul.f32 %v7666_v35, %v9216_v15 }
 0x605   : > { %v2506_v2 = vmul.f32 %v7668_v7, %v9212_v45 }
 0x606   : > { %v7670_v53 = vpop.eup %7669 }
 0x607   : > { %2921 = vrot.lane.b32.xlu1 %v8119_v38, %s7997_s10  ;;  %v2505_v40 = vmul.f32 %v7670_v53, %v9224_v23  ;;  %v2537_v6 = vpack.c.bf16 %v2507_v42, %v2506_v2 }
 0x609   : > { %v2536_v58 = vpack.c.bf16 %v2505_v40, %v2504_v9  ;;  %v11506_v40 = vld [vmem:[#allocation6_spill] sm:$0xff] }
 0x60b   : > { %6777 = vmatprep.mubr.msk.bf16.mxu1 %vm1030_vm2, %v2536_v58  ;;  %3141 = vrot.lane.b32.xlu1 %v8167_v13, %s7996_s9 }
 0x60c   : > { %6778 = vmatmul.mubr.msk.bf16.vlgmr.msra.gmra.mrb[40].mxu1 %vm1030_vm2, %v2537_v6 }
 0x60d   : > { %6802 = vmatpush3.bf16.msra.mxu1 %v8905_v61 }
 0x60e   : > { %6803 = vmatprep.subr.bf16.mxu1 %v8910_v43 }
 0x60f   : > { %3127 = vrot.lane.b32.xlu1 %v8157_v4, %s7997_s10 }
 0x611   : > { %6804 = vmatpush3.bf16.msra.mxu1 %v8910_v43 }
 0x612   : > { %6805 = vmatprep.subr.bf16.mxu1 %v8912_v26  ;;  %3137 = vrot.lane.b32.xlu0 %v8155_v3, %s7996_s9 }
 0x613   : > { %3244 = vrot.lane.b32.xlu1 %v8193_v39, %s7996_s9 }
 0x615   : > { %6806 = vmatpush3.bf16.msra.mxu1 %v8912_v26 }
 0x616   : > { %6807 = vmatprep.subr.bf16.mxu1 %v9173_v12  ;;  %3139 = vrot.lane.b32.xlu0 %v8169_v14, %s7996_s9 }
 0x617   : > { %3028 = vrot.lane.b32.xlu1 %v8143_v57, %s7997_s10 }
 0x618   : > { %v2396_v61 = vpop.xlane.xlu0 %2395 }
 0x619   : > { %6808 = vmatpush3.bf16.msra.mxu1 %v9173_v12 }
 0x61a   : > { %7157 = vmatprep.subr.msk.bf16.mxu1 %vm637_vm1, %v9186_v11  ;;  %3024 = vrot.lane.b32.xlu0 %v8129_v47, %s7997_s10 }
 0x61b   : > { %3232 = vrot.lane.b32.xlu1 %v8181_v25, %s7997_s10 }
 0x61c   : > { %v2399_v43 = vpop.xlane.xlu0 %2398  ;;  %v2390_v26 = vpop.xlane.xlu1 %2389 }
 0x61d   : > { %7671 = vrcp.f32 %v2399_v43 }
 0x61e   : > { %2923 = vrot.lane.b32.xlu0 %v8117_v37, %s7997_s10  ;;  %7673 = vrcp.f32 %v2390_v26 }
 0x61f   : > { %3131 = vrot.lane.b32.xlu1 %v8169_v14, %s7997_s10  ;;  %7675 = vrcp.f32 %v2396_v61 }
 0x620   : > { %v2393_v12 = vpop.xlane.xlu0 %2392  ;;  %v2408_v15 = vpop.xlane.xlu1 %2407 }
 0x621   : > { %7677 = vrcp.f32 %v2393_v12 }
 0x622   : > { %3242 = vrot.lane.b32.xlu0 %v8179_v24, %s7996_s9 }
 0x623   : > { %3236 = vrot.lane.b32.xlu1 %v8193_v39, %s7997_s10 }
 0x624   : > { %v2402_v45 = vpop.xlane.xlu0 %2401 }
 0x626   : > { %3129 = vrot.lane.b32.xlu0 %v8155_v3, %s7997_s10 }
 0x627   : > { %3707 = vrot.lane.b32.xlu1 %v8103_v27, %s7998_s29  ;;  %v7672_v23 = vpop.eup %7671 }
 0x628   : > { %v2411_v44 = vpop.xlane.xlu0 %2410  ;;  %v7674_v63 = vpop.eup %7673  ;;  %v2511_v7 = vmul.f32 %v7672_v23, %v9240_v56 }
 0x629   : > { %7679 = vrcp.f32 %v2411_v44  ;;  %v7676_v21 = vpop.eup %7675  ;;  %v2508_v53 = vmul.f32 %v7674_v63, %v9243_v50 }
 0x62a   : > { %v2423_v28 = vpop.xlane.xlu1 %2422  ;;  %3026 = vrot.lane.b32.xlu0 %v11505_v41, %s7997_s10  ;;  %7681 = vrcp.f32 %v2402_v45  ;;  %v2510_v2 = vmul.f32 %v7676_v21, %v9235_v34 }
 0x62b   : > { %3711 = vrot.lane.b32.xlu1 %v8117_v37, %s7998_s29  ;;  %v7678_v18 = vpop.eup %7677  ;;  %7683 = vrcp.f32 %v2408_v15 }
 0x62c   : > { %v2405_v35 = vpop.xlane.xlu0 %2404  ;;  %v2509_v42 = vmul.f32 %v7678_v18, %v9250_v29  ;;  %v2539_v61 = vpack.c.bf16 %v2511_v7, %v2510_v2 }
 0x62d   : > { %7685 = vrcp.f32 %v2405_v35 }
 0x62e   : > { %v2417_v9 = vpop.xlane.xlu1 %2416  ;;  %3246 = vrot.lane.b32.xlu0 %v11506_v40, %s7996_s9  ;;  %v2538_v58 = vpack.c.bf16 %v2509_v42, %v2508_v53  ;;  %v11508_v53 = vld [vmem:[#allocation3_spill] sm:$0xff]  ;;  %s11221_s9 = scalar_lea.vmem %s11328_s6, %s6040_s28 }
 0x62f   : > { %3883 = vrot.lane.b32.xlu1 %v8157_v4, %s7998_s29 }
 0x630   : > { %v2420_v6 = vpop.xlane.xlu0 %2419  ;;  %6781 = vmatprep.mubr.msk.bf16.mxu1 %vm1030_vm2, %v2538_v58 }
 0x631   : > { %7687 = vrcp.f32 %v2420_v6  ;;  %6782 = vmatmul.mubr.msk.bf16.gmra.mrb[44].mxu1 %vm1030_vm2, %v2539_v61 }
 0x632   : > { %v2432_v56 = vpop.xlane.xlu1 %2431  ;;  %3234 = vrot.lane.b32.xlu0 %v8179_v24, %s7997_s10  ;;  %7689 = vrcp.f32 %v2417_v9  ;;  %v11509_v9 = vld [vmem:[#allocation40_spill] sm:$0xff] }
 0x633   : > { %3885 = vrot.lane.b32.xlu1 %v8155_v3, %s7998_s29  ;;  %v7680_v34 = vpop.eup %7679  ;;  %7691 = vrcp.f32 %v2423_v28 }
 0x634   : > { %v2414_v50 = vpop.xlane.xlu0 %2413  ;;  %v7682_v29 = vpop.eup %7681  ;;  %v2515_v45 = vmul.f32 %v7680_v34, %v9265_v19 }
 0x635   : > { %7693 = vrcp.f32 %v2414_v50  ;;  %v7684_v43 = vpop.eup %7683  ;;  %v2512_v44 = vmul.f32 %v7682_v29, %v9261_v10 }
 0x636   : > { %v2429_v26 = vpop.xlane.xlu1 %2428  ;;  %3133 = vrot.lane.b32.xlu0 %v8167_v13, %s7997_s10  ;;  %v2514_v63 = vmul.f32 %v7684_v43, %v9252_v52 }
 0x637   : > { %v7686_v12 = vpop.eup %7685  ;;  %7695 = vrcp.f32 %v2429_v26  ;;  %3887 = vrot.lane.b32.xlu1 %v8169_v14, %s7998_s29  ;;  %v11510_v26 = vld [vmem:[#allocation41_spill] sm:$0xff] }
 0x638   : > { %v2426_v15 = vpop.xlane.xlu0 %2425  ;;  %v2513_v23 = vmul.f32 %v7686_v12, %v9270_v16  ;;  %v2541_v18 = vpack.c.bf16 %v2515_v45, %v2514_v63  ;;  %v11507_v16 = vld [vmem:[#allocation7_spill] sm:$0xff] }
 0x639   : > { %7697 = vrcp.f32 %v2426_v15 }
 0x63a   : > { %v2444_v28 = vpop.xlane.xlu1 %2443  ;;  %3238 = vrot.lane.b32.xlu0 %v11506_v40, %s7997_s10  ;;  %v2540_v21 = vpack.c.bf16 %v2513_v23, %v2512_v44  ;;  %7699 = vrcp.f32 %v2432_v56  ;;  %v11511_v44 = vld [vmem:[#allocation42_spill] sm:$0xff] }
 0x63b   : > { %3889 = vrot.lane.b32.xlu1 %v8167_v13, %s7998_s29  ;;  %v7688_v19 = vpop.eup %7687 }
 0x63c   : > { %6793 = vmatprep.mubr.msk.bf16.mxu0 %vm1030_vm2, %v2540_v21  ;;  %v2435_v35 = vpop.xlane.xlu0 %2434  ;;  %v7690_v10 = vpop.eup %7689  ;;  %v2518_v2 = vmul.f32 %v7688_v19, %v9279_v60  ;;  %v11512_v19 = vld [vmem:[#allocation46_spill] sm:$0xff] }
 0x63d   : > { %7701 = vrcp.f32 %v2435_v35  ;;  %6794 = vmatmul.mubr.msk.bf16.vlgmr.msra.gmra.mrb[88].mxu0 %vm1030_vm2, %v2541_v18  ;;  %v7692_v52 = vpop.eup %7691  ;;  %v2517_v61 = vmul.f32 %v7690_v10, %v9283_v54 }
 0x63e   : > { %6818 = vmatpush3.bf16.msra.mxu0 %v11507_v16  ;;  %v2441_v7 = vpop.xlane.xlu1 %2440  ;;  %3705 = vrot.lane.b32.xlu0 %v11508_v53, %s7998_s29  ;;  %v2519_v34 = vmul.f32 %v7692_v52, %v9274_v59  ;;  %v11513_v16 = vld [vmem:[#allocation44_spill] sm:$0xff] }
 0x63f   : > { %v7694_v42 = vpop.eup %7693  ;;  %7703 = vrcp.f32 %v2441_v7  ;;  %6819 = vmatprep.subr.bf16.mxu0 %v11509_v9  ;;  %3974 = vrot.lane.b32.xlu1 %v8179_v24, %s7998_s29 }
 0x640   : > { %v2438_v58 = vpop.xlane.xlu0 %2437  ;;  %v2516_v6 = vmul.f32 %v7694_v42, %v9294_v36  ;;  %v2543_v60 = vpack.c.bf16 %v2519_v34, %v2518_v2  ;;  %v2949_v2 = vsel %vm637_vm1, %v11513_v16, 0 }
 0x641   : > { %v7696_v56 = vpop.eup %7695  ;;  %7705 = vrcp.f32 %v2438_v58 }
 0x642   : > { %6820 = vmatpush3.bf16.msra.mxu0 %v11509_v9  ;;  %v2459_v50 = vpop.xlane.xlu1 %2458  ;;  %3709 = vrot.lane.b32.xlu0 %v8119_v38, %s7998_s29  ;;  %v2542_v29 = vpack.c.bf16 %v2517_v61, %v2516_v6  ;;  %7707 = vrcp.f32 %v2444_v28  ;;  %v2521_v36 = vmul.f32 %v7696_v56, %v9304_v1  ;;  %v11514_v6 = vld [vmem:[#allocation48_spill] sm:$0xff] }
 0x643   : > { %v7698_v43 = vpop.eup %7697  ;;  %6821 = vmatprep.subr.bf16.mxu0 %v11510_v26  ;;  %3978 = vrot.lane.b32.xlu1 %v11506_v40, %s7998_s29 }
 0x644   : > { %6797 = vmatprep.mubr.msk.bf16.mxu0 %vm1030_vm2, %v2542_v29  ;;  %v2447_v54 = vpop.xlane.xlu0 %2446  ;;  %v2520_v59 = vmul.f32 %v7698_v43, %v9300_v31  ;;  %v7700_v12 = vpop.eup %7699 }
 0x645   : > { %7709 = vrcp.f32 %v2447_v54  ;;  %6798 = vmatmul.mubr.msk.bf16.gmra.mrb[92].mxu0 %vm1030_vm2, %v2543_v60  ;;  %v2522_v31 = vmul.f32 %v7700_v12, %v9289_v46  ;;  %v2946_v46 = vsel %vm637_vm1, %v9186_v11, 0 }
 0x646   : > { %6822 = vmatpush3.bf16.msra.mxu0 %v11510_v26  ;;  %3794 = vrot.lane.b32.xlu0 %v8131_v48, %s7998_s29  ;;  %v2544_v45 = vpack.c.bf16 %v2521_v36, %v2520_v59  ;;  %v2453_v23 = vpop.xlane.xlu1 %2452  ;;  %v11518_v59 = vld [vmem:[#allocation50_spill] sm:$0xff]  ;;  %v11519_v36 = vld [vmem:[#allocation49_spill] sm:$0xff] }
 0x647   : > { %v7702_v15 = vpop.eup %7701  ;;  %6823 = vmatprep.subr.bf16.mxu0 %v11511_v44  ;;  %4183 = vrot.lane.b32.xlu1 %v8131_v48, %s7999_s30 }
 0x648   : > { %v2523_v1 = vmul.f32 %v7702_v15, %v9314_v0  ;;  %6809 = vmatprep.mubr.msk.bf16.mxu1 %vm1030_vm2, %v2544_v45  ;;  %v2456_v63 = vpop.xlane.xlu0 %2455  ;;  %v3156_v45 = vsel %vm637_vm1, %v11518_v59, 0  ;;  %v3057_v15 = vsel %vm637_vm1, %v11519_v36, 0 }
 0x649   : > { %v7704_v28 = vpop.eup %7703  ;;  %7711 = vrcp.f32 %v2456_v63 }
 0x64a   : > { %v2545_v21 = vpack.c.bf16 %v2523_v1, %v2522_v31  ;;  %6824 = vmatpush3.bf16.msra.mxu0 %v11511_v44  ;;  %3796 = vrot.lane.b32.xlu0 %v8129_v47, %s7998_s29  ;;  %7713 = vrcp.f32 %v2453_v23  ;;  %v2525_v10 = vmul.f32 %v7704_v28, %v9322_v20  ;;  %v3037_v44 = vpop.permute.xlu1 %3036 }
 0x64b   : > { %v7706_v18 = vpop.eup %7705  ;;  %7161 = vmatprep.subr.msk.bf16.mxu0 %vm637_vm1, %v11512_v19  ;;  %4084 = vrot.lane.b32.xlu1 %v8117_v37, %s7999_s30  ;;  %7715 = vrcp.f32 %v2459_v50  ;;  %v3060_v31 = vsel %vm637_vm1, %v3037_v44, 0 }
 0x64c   : > { %6810 = vmatmul.mubr.msk.bf16.vlgmr.msra.gmra.mrb[48].mxu1 %vm1030_vm2, %v2545_v21  ;;  %v2450_v0 = vpop.xlane.xlu0 %2449  ;;  %v2524_v35 = vmul.f32 %v7706_v18, %v9318_v51  ;;  %v7708_v52 = vpop.eup %7707 }
 0x64d   : > { %6834 = vmatpush3.bf16.xpose.msra.mxu1 %v2946_v46  ;;  %7717 = vrcp.f32 %v2450_v0  ;;  %v2526_v11 = vmul.f32 %v7708_v52, %v9308_v22 }
 0x64e   : > { %7158 = vmatprep.subr.msk.bf16.mxu1 %vm637_vm1, %v11513_v16  ;;  %3798 = vrot.lane.b32.xlu0 %v11505_v41, %s7998_s29  ;;  %v2546_v7 = vpack.c.bf16 %v2525_v10, %v2524_v35 }
 0x64f   : > { %v7710_v42 = vpop.eup %7709  ;;  %4070 = vrot.lane.b32.xlu1 %v11508_v53, %s8000_s7 }
 0x650   : > { %6813 = vmatprep.mubr.msk.bf16.mxu1 %vm1030_vm2, %v2546_v7  ;;  %v2527_v51 = vmul.f32 %v7710_v42, %v9326_v5  ;;  %v11515_v5 = vld [vmem:[#allocation43_spill] sm:$0xff]  ;;  %v2920_v12 = vpop.permute.xlu0 %2919 }
 0x651   : > { %v2952_v60 = vsel %vm637_vm1, %v11515_v5, 0 }
 0x652   : > { %3800 = vrot.lane.b32.xlu0 %v8143_v57, %s7998_s29  ;;  %v2547_v20 = vpack.c.bf16 %v2527_v51, %v2526_v11 }
 0x653   : > { %4187 = vrot.lane.b32.xlu1 %v11505_v41, %s7999_s30  ;;  %v7712_v9 = vpop.eup %7711 }
 0x654   : > { %6814 = vmatmul.mubr.msk.bf16.gmra.mrb[52].mxu1 %vm1030_vm2, %v2547_v20  ;;  %v7714_v58 = vpop.eup %7713  ;;  %v2530_v56 = vmul.f32 %v7712_v9, %v9334_v55  ;;  %v3051_v55 = vsel %vm637_vm1, %v11512_v19, 0 }
 0x655   : > { %6836 = vmatpush3.bf16.xpose.msra.mxu1 %v2949_v2  ;;  %6841 = vmatprep.mubr.msk.bf16.mxu1 %vm637_vm1, %v11514_v6  ;;  %v7716_v22 = vpop.eup %7715  ;;  %v2529_v50 = vmul.f32 %v7714_v58, %v9338_v30 }
 0x656   : > { %7159 = vmatprep.subr.msk.bf16.mxu1 %vm637_vm1, %v11515_v5  ;;  %3972 = vrot.lane.b32.xlu0 %v8181_v25, %s7998_s29  ;;  %v2531_v29 = vmul.f32 %v7716_v22, %v9330_v32  ;;  %v11517_v32 = vld [vmem:[#allocation47_spill] sm:$0xff] }
 0x657   : > { %v7718_v61 = vpop.eup %7717  ;;  %4074 = vrot.lane.b32.xlu1 %v8119_v38, %s8000_s7  ;;  %v3054_v54 = vsel %vm637_vm1, %v11517_v32, 0 }
 0x658   : > { %v2528_v34 = vmul.f32 %v7718_v61, %v9344_v8  ;;  %v2549_v26 = vpack.c.bf16 %v2531_v29, %v2530_v56  ;;  %v11516_v8 = vld [vmem:[#allocation45_spill] sm:$0xff] }
 0x659   : > { %v2955_v30 = vsel %vm637_vm1, %v11516_v8, 0 }
 0x65a   : > { %4078 = vrot.lane.b32.xlu0 %v11508_v53, %s7999_s30  ;;  %v2548_v43 = vpack.c.bf16 %v2529_v50, %v2528_v34 }
 0x65c   : > { %6825 = vmatprep.mubr.msk.bf16.mxu0 %vm1030_vm2, %v2548_v43 }
 0x65d   : > { %6838 = vmatpush3.bf16.xpose.msra.mxu1 %v2952_v60  ;;  %6826 = vmatmul.mubr.msk.bf16.vlgmr.msra.gmra.mrb[96].mxu0 %vm1030_vm2, %v2549_v26 }
 0x65e   : > { %7160 = vmatprep.subr.msk.bf16.mxu1 %vm637_vm1, %v11516_v8  ;;  %6850 = vmatpush3.bf16.xpose.msra.mxu0 %v3051_v55 }
 0x65f   : > { %3976 = vrot.lane.b32.xlu0 %v8193_v39, %s7998_s29  ;;  %7162 = vmatprep.subr.msk.bf16.mxu0 %vm637_vm1, %v11517_v32 }
 0x663   : > { %4080 = vrot.lane.b32.xlu0 %v8103_v27, %s7999_s30 }
 0x665   : > { %6840 = vmatpush3.bf16.xpose.msra.mxu1 %v2955_v30 }
 0x666   : > { %6852 = vmatpush3.bf16.xpose.msra.mxu0 %v3054_v54  ;;  %7165 = vmatprep.subr.msk.bf16.mxu1 %vm637_vm1, %v11518_v59 }
 0x667   : > { %4082 = vrot.lane.b32.xlu0 %v8119_v38, %s7999_s30  ;;  %7163 = vmatprep.subr.msk.bf16.mxu0 %vm637_vm1, %v11519_v36 }
 0x66b   : > { %4185 = vrot.lane.b32.xlu0 %v8129_v47, %s7999_s30 }
 0x66c   : > { %6842 = vmatmul.mubr.msk.bf16.vlgmr.msra.gmra.mrb[56].mxu1 %vm637_vm1, %v2920_v12 }
 0x66d   : > { %6866 = vmatpush3.bf16.xpose.msra.mxu1 %v3156_v45 }
 0x66e   : > { %6854 = vmatpush3.bf16.xpose.msra.mxu0 %v3057_v15 }
 0x66f   : > { %4072 = vrot.lane.b32.xlu0 %v8103_v27, %s8000_s7  ;;  %7164 = vmatprep.subr.msk.bf16.mxu0 %vm637_vm1, %v3037_v44 }
 0x673   : > { %4288 = vrot.lane.b32.xlu0 %v8157_v4, %s7999_s30 }
 0x676   : > { %6856 = vmatpush3.bf16.xpose.msra.mxu0 %v3060_v31 }
 0x67b   : > { %v2465_v1 = vpop.xlane.xlu1 %2464 }
 0x67c   : > { %7719 = vrcp.f32 %v2465_v1 }
 0x67f   : > { %v3023_v23 = vpop.permute.xlu1 %3022 }
 0x681   : > { %v2468_v63 = vpop.xlane.xlu0 %2467 }
 0x683   : > { %v3241_v28 = vpop.permute.xlu1 %3240 }
 0x684   : > { %7169 = vmatprep.subr.msk.bf16.mxu0 %vm637_vm1, %v3241_v28  ;;  %v3261_v34 = vsel %vm637_vm1, %v3241_v28, 0 }
 0x685   : > { %v2462_v21 = vpop.xlane.xlu0 %2461 }
 0x686   : > { %7721 = vrcp.f32 %v2462_v21  ;;  %v7720_v35 = vpop.eup %7719 }
 0x687   : > { %v2922_v18 = vpop.permute.xlu1 %2921  ;;  %7723 = vrcp.f32 %v2468_v63  ;;  %v2533_v11 = vmul.f32 %v7720_v35, %v9356_v49 }
 0x688   : > { %6845 = vmatprep.mubr.msk.bf16.mxu1 %vm637_vm1, %v2922_v18 }
 0x689   : > { %v2471_v19 = vpop.xlane.xlu0 %2470 }
 0x68a   : > { %7725 = vrcp.f32 %v2471_v19 }
 0x68b   : > { %v3142_v46 = vpop.permute.xlu1 %3141 }
 0x68d   : > { %v3138_v0 = vpop.permute.xlu0 %3137 }
 0x68e   : > { %7166 = vmatprep.subr.msk.bf16.mxu1 %vm637_vm1, %v3138_v0  ;;  %v3159_v10 = vsel %vm637_vm1, %v3138_v0, 0 }
 0x68f   : > { %v3128_v52 = vpop.permute.xlu1 %3127  ;;  %6868 = vmatpush3.bf16.xpose.msra.mxu1 %v3159_v10 }
 0x690   : > { %v7722_v16 = vpop.eup %7721 }
 0x691   : > { %v3140_v7 = vpop.permute.xlu0 %3139  ;;  %v2532_v42 = vmul.f32 %v7722_v16, %v9364_v17  ;;  %v7724_v51 = vpop.eup %7723 }
 0x692   : > { %7167 = vmatprep.subr.msk.bf16.mxu1 %vm637_vm1, %v3140_v7  ;;  %v2534_v6 = vmul.f32 %v7724_v51, %v9360_v33  ;;  %v3162_v5 = vsel %vm637_vm1, %v3140_v7, 0  ;;  %v3165_v33 = vsel %vm637_vm1, %v3142_v46, 0 }
 0x693   : > { %v2550_v20 = vpack.c.bf16 %v2533_v11, %v2532_v42  ;;  %v3245_v2 = vpop.permute.xlu1 %3244 }
 0x694   : > { %v7726_v9 = vpop.eup %7725  ;;  %v3267_v8 = vsel %vm637_vm1, %v3245_v2, 0 }
 0x695   : > { %6829 = vmatprep.mubr.msk.bf16.mxu0 %vm1030_vm2, %v2550_v20  ;;  %v3025_v58 = vpop.permute.xlu0 %3024  ;;  %v2535_v22 = vmul.f32 %v7726_v9, %v9368_v62 }
 0x697   : > { %6870 = vmatpush3.bf16.xpose.msra.mxu1 %v3162_v5  ;;  %v2551_v61 = vpack.c.bf16 %v2535_v22, %v2534_v6  ;;  %v3029_v17 = vpop.permute.xlu1 %3028 }
 0x698   : > { %7168 = vmatprep.subr.msk.bf16.mxu1 %vm637_vm1, %v3142_v46 }
 0x699   : > { %6830 = vmatmul.mubr.msk.bf16.gmra.mrb[100].mxu0 %vm1030_vm2, %v2551_v61  ;;  %v2924_v49 = vpop.permute.xlu0 %2923 }
 0x69a   : > { %6846 = vmatmul.mubr.msk.bf16.gmra.mrb[60].mxu1 %vm637_vm1, %v2924_v49  ;;  %6857 = vmatprep.mubr.msk.bf16.mxu0 %vm637_vm1, %v3023_v23 }
 0x69b   : > { %6873 = vmatprep.mubr.msk.bf16.mxu1 %vm637_vm1, %v3128_v52  ;;  %v3233_v62 = vpop.permute.xlu1 %3232 }
 0x69d   : > { %v3243_v56 = vpop.permute.xlu0 %3242 }
 0x69e   : > { %v3264_v26 = vsel %vm637_vm1, %v3243_v56, 0 }
 0x69f   : > { %6872 = vmatpush3.bf16.xpose.msra.mxu1 %v3165_v33  ;;  %v3132_v43 = vpop.permute.xlu1 %3131 }
 0x6a1   : > { %6858 = vmatmul.mubr.msk.bf16.vlgmr.msra.gmra.mrb[104].mxu0 %vm637_vm1, %v3025_v58  ;;  %v3130_v50 = vpop.permute.xlu0 %3129 }
 0x6a2   : > { %6882 = vmatpush3.bf16.xpose.msra.mxu0 %v3261_v34 }
 0x6a3   : > { %7170 = vmatprep.subr.msk.bf16.mxu0 %vm637_vm1, %v3243_v56  ;;  %v3237_v30 = vpop.permute.xlu1 %3236 }
 0x6a5   : > { %v3027_v29 = vpop.permute.xlu0 %3026 }
 0x6a6   : > { %6861 = vmatprep.mubr.msk.bf16.mxu0 %vm637_vm1, %v3027_v29  ;;  %6874 = vmatmul.mubr.msk.bf16.vlgmr.msra.gmra.mrb[64].mxu1 %vm637_vm1, %v3130_v50 }
 0x6a7   : > { %6877 = vmatprep.mubr.msk.bf16.mxu1 %vm637_vm1, %v3132_v43  ;;  %v3708_v12 = vpop.permute.xlu1 %3707 }
 0x6a9   : > { %6862 = vmatmul.mubr.msk.bf16.gmra.mrb[108].mxu0 %vm637_vm1, %v3029_v17  ;;  %v3247_v60 = vpop.permute.xlu0 %3246 }
 0x6aa   : > { %6884 = vmatpush3.bf16.xpose.msra.mxu0 %v3264_v26  ;;  %6889 = vmatprep.mubr.msk.bf16.mxu0 %vm637_vm1, %v3233_v62  ;;  %v3270_v59 = vsel %vm637_vm1, %v3247_v60, 0 }
 0x6ab   : > { %7171 = vmatprep.subr.msk.bf16.mxu0 %vm637_vm1, %v3245_v2  ;;  %v3712_v15 = vpop.permute.xlu1 %3711 }
 0x6ad   : > { %v3235_v55 = vpop.permute.xlu0 %3234 }
 0x6af   : > { %v9594_v1 = vpop.permute.xlu1 %3883 }
 0x6b1   : > { %v3134_v32 = vpop.permute.xlu0 %3133 }
 0x6b2   : > { %6886 = vmatpush3.bf16.xpose.msra.mxu0 %v3267_v8  ;;  %6878 = vmatmul.mubr.msk.bf16.gmra.mrb[68].mxu1 %vm637_vm1, %v3134_v32 }
 0x6b3   : > { %7172 = vmatprep.subr.msk.bf16.mxu0 %vm637_vm1, %v3247_v60 }
 0x6b5   : > { %v3239_v54 = vpop.permute.xlu0 %3238 }
 0x6b9   : > { %v3706_v36 = vpop.permute.xlu0 %3705 }
 0x6ba   : > { %6888 = vmatpush3.bf16.xpose.msra.mxu0 %v3270_v59  ;;  %6897 = vmatprep.subr.bf16.mxu1 %v3706_v36 }
 0x6bb   : > { %6898 = vmatpush3.bf16.msra.mxu1 %v3706_v36 }
 0x6bc   : > { %6899 = vmatprep.subr.bf16.mxu1 %v3708_v12 }
 0x6bd   : > { %v3710_v45 = vpop.permute.xlu0 %3709 }
 0x6bf   : > { %6900 = vmatpush3.bf16.msra.mxu1 %v3708_v12 }
 0x6c0   : > { %6901 = vmatprep.subr.bf16.mxu1 %v3710_v45 }
 0x6c1   : > { %6890 = vmatmul.mubr.msk.bf16.vlgmr.msra.gmra.mrb[112].mxu0 %vm637_vm1, %v3235_v55  ;;  %v3795_v44 = vpop.permute.xlu0 %3794 }
 0x6c2   : > { %6893 = vmatprep.mubr.msk.bf16.mxu0 %vm637_vm1, %v3237_v30  ;;  %6913 = vmatprep.subr.bf16.mxu0 %v3795_v44  ;;  %v9701_v30 = vld [vmem:[%s11325_s3 + $0x98] sm:$0xff] }
 0x6c3   : > { %6902 = vmatpush3.bf16.msra.mxu1 %v3710_v45  ;;  %6914 = vmatpush3.bf16.msra.mxu0 %v3795_v44  ;;  %v9688_v44 = vld [vmem:[%s11325_s3 + $0x90] sm:$0xff] }
 0x6c4   : > { %6903 = vmatprep.subr.bf16.mxu1 %v3712_v15 }
 0x6c5   : > { %v3797_v31 = vpop.permute.xlu0 %3796 }
 0x6c6   : > { %6915 = vmatprep.subr.bf16.mxu0 %v3797_v31 }
 0x6c7   : > { %6904 = vmatpush3.bf16.msra.mxu1 %v3712_v15  ;;  %6916 = vmatpush3.bf16.msra.mxu0 %v3797_v31  ;;  %v9693_v31 = vld [vmem:[%s11325_s3 + $0x80] sm:$0xff]  ;;  %v9706_v15 = vld [vmem:[%s11325_s3 + $0x88] sm:$0xff] }
 0x6c8   : > { %6929 = vmatprep.subr.bf16.mxu1 %v9594_v1 }
 0x6c9   : > { %6894 = vmatmul.mubr.msk.bf16.gmra.mrb[116].mxu0 %vm637_vm1, %v3239_v54  ;;  %v3799_v23 = vpop.permute.xlu0 %3798 }
 0x6ca   : > { %6917 = vmatprep.subr.bf16.mxu0 %v3799_v23 }
 0x6cb   : > { %6918 = vmatpush3.bf16.msra.mxu0 %v3799_v23 }
 0x6cd   : > { %v3801_v63 = vpop.permute.xlu0 %3800 }
 0x6ce   : > { %6919 = vmatprep.subr.bf16.mxu0 %v3801_v63 }
 0x6cf   : > { %6920 = vmatpush3.bf16.msra.mxu0 %v3801_v63 }
 0x6d1   : > { %v9598_v28 = vpop.permute.xlu0 %3972 }
 0x6d2   : > { %11520 = vst [vmem:[#allocation5_spill] sm:$0xff] %v9598_v28  ;;  %6945 = vmatprep.subr.bf16.mxu0 %v9598_v28 }
 0x6df   : > { %v9601_v21 = vpop.f32.mrb[40].mxu1 }
 0x6e0   : > { %11521 = vst [vmem:[#allocation6_spill] sm:$0xff] %v9601_v21  ;;  %v9603_v18 = vpop.f32.mrb[41].mxu1  ;;  %v9860_v21 = vpop.permute.xlu1 %3885 }
 0x6e1   : > { %11522 = vst [vmem:[#allocation7_spill] sm:$0xff] %v9603_v18  ;;  %v9605_v19 = vpop.f32.mrb[42].mxu1 }
 0x6e2   : > { %11523 = vst [vmem:[#allocation40_spill] sm:$0xff] %v9605_v19  ;;  %v9609_v0 = vpop.f32.mrb[43].mxu1 }
 0x6e3   : > { %11524 = vst [vmem:[#allocation41_spill] sm:$0xff] %v9609_v0 }
 0x704   : > { %v9613_v10 = vpop.f32.mrb[44].mxu1 }
 0x705   : > { %11525 = vst [vmem:[#allocation42_spill] sm:$0xff] %v9613_v10  ;;  %v9615_v52 = vpop.f32.mrb[45].mxu1 }
 0x706   : > { %11526 = vst [vmem:[#allocation46_spill] sm:$0xff] %v9615_v52  ;;  %v9617_v16 = vpop.f32.mrb[46].mxu1 }
 0x707   : > { %11527 = vst [vmem:[#allocation44_spill] sm:$0xff] %v9617_v16  ;;  %v9621_v42 = vpop.f32.mrb[47].mxu1 }
 0x708   : > { %11528 = vst [vmem:[#allocation48_spill] sm:$0xff] %v9621_v42 }
 0x710   : > { %v9625_v51 = vpop.f32.mrb[88].mxu0 }
 0x711   : > { %11529 = vst [vmem:[#allocation43_spill] sm:$0xff] %v9625_v51  ;;  %v9627_v20 = vpop.f32.mrb[89].mxu0 }
 0x712   : > { %11530 = vst [vmem:[#allocation45_spill] sm:$0xff] %v9627_v20  ;;  %v9629_v9 = vpop.f32.mrb[90].mxu0 }
 0x713   : > { %11531 = vst [vmem:[#allocation47_spill] sm:$0xff] %v9629_v9  ;;  %v9633_v58 = vpop.f32.mrb[91].mxu0 }
 0x714   : > { %11532 = vst [vmem:[#allocation50_spill] sm:$0xff] %v9633_v58 }
 0x718   : > { %v9637_v22 = vpop.f32.mrb[92].mxu0 }
 0x719   : > { %11533 = vst [vmem:[#allocation49_spill] sm:$0xff] %v9637_v22  ;;  %v9639_v5 = vpop.f32.mrb[93].mxu0 }
 0x71a   : > { %11534 = vst [vmem:[#allocation51_spill] sm:$0xff] %v9639_v5  ;;  %v9641_v61 = vpop.f32.mrb[94].mxu0 }
 0x71b   : > { %11535 = vst [vmem:[#allocation52_spill] sm:$0xff] %v9641_v61  ;;  %v9645_v17 = vpop.f32.mrb[95].mxu0 }
 0x71c   : > { %11536 = vst [vmem:[#allocation53_spill] sm:$0xff] %v9645_v17 }
 0x71f   : > { %v9649_v33 = vpop.f32.mrb[48].mxu1 }
 0x720   : > { %11537 = vst [vmem:[#allocation54_spill] sm:$0xff] %v9649_v33  ;;  %v9651_v62 = vpop.f32.mrb[49].mxu1 }
 0x721   : > { %11538 = vst [vmem:[#allocation55_spill] sm:$0xff] %v9651_v62  ;;  %v9653_v34 = vpop.f32.mrb[50].mxu1 }
 0x722   : > { %11539 = vst [vmem:[#allocation56_spill] sm:$0xff] %v9653_v34  ;;  %v9657_v29 = vpop.f32.mrb[51].mxu1 }
 0x723   : > { %11540 = vst [vmem:[#allocation57_spill] sm:$0xff] %v9657_v29 }
 0x727   : > { %v9661_v26 = vpop.f32.mrb[52].mxu1 }
 0x728   : > { %11541 = vst [vmem:[#allocation58_spill] sm:$0xff] %v9661_v26  ;;  %v9663_v60 = vpop.f32.mrb[53].mxu1 }
 0x729   : > { %11542 = vst [vmem:[#allocation59_spill] sm:$0xff] %v9663_v60  ;;  %v9665_v55 = vpop.f32.mrb[54].mxu1 }
 0x72a   : > { %11543 = vst [vmem:[#allocation60_spill] sm:$0xff] %v9665_v55  ;;  %v9669_v32 = vpop.f32.mrb[55].mxu1 }
 0x72b   : > { %11544 = vst [vmem:[#allocation61_spill] sm:$0xff] %v9669_v32 }
 0x730   : > { %v9673_v54 = vpop.f32.mrb[96].mxu0 }
 0x731   : > { %11545 = vst [vmem:[#allocation62_spill] sm:$0xff] %v9673_v54  ;;  %v9675_v59 = vpop.f32.mrb[97].mxu0  ;;  %v9756_v54 = vld [vmem:[%s11325_s3 + $0xa8] sm:$0xff] }
 0x732   : > { %11546 = vst [vmem:[#allocation63_spill] sm:$0xff] %v9675_v59  ;;  %v9677_v36 = vpop.f32.mrb[98].mxu0 }
 0x733   : > { %11547 = vst [vmem:[#allocation64_spill] sm:$0xff] %v9677_v36  ;;  %v9681_v45 = vpop.f32.mrb[99].mxu0 }
 0x734   : > { %11548 = vst [vmem:[#allocation65_spill] sm:$0xff] %v9681_v45 }
 0x73f   : > { %v6843_v23 = vpop.f32.mrb[56].mxu1 }
 0x740   : > { %v9696_v63 = vadd.f32 %v6843_v23, %v9688_v44  ;;  %v2991_v12 = vpop.f32.mrb[57].mxu1 }
 0x741   : > { %v9709_v8 = vadd.f32 %v9693_v31, %v2991_v12  ;;  %v6844_v50 = vpop.f32.mrb[58].mxu1 }
 0x742   : > { %v2994_v49 = vpop.f32.mrb[59].mxu1  ;;  %v3343_v23 = vsel %vm1030_vm2, %v9696_v63, -inf  ;;  %v9714_v43 = vadd.f32 %v6844_v50, %v9701_v30  ;;  %v9728_v50 = vld [vmem:[%s11325_s3 + $0xb0] sm:$0xff] }
 0x743   : > { %v9717_v2 = vadd.f32 %v9706_v15, %v2994_v49  ;;  %3344 = vmax.xlane.f32.xlu0 %v3343_v23  ;;  %v3337_v56 = vsel %vm1030_vm2, %v9709_v8, -inf }
 0x744   : > { %3338 = vmax.xlane.f32.xlu1 %v3337_v56  ;;  %v3346_v7 = vsel %vm1030_vm2, %v9714_v43, -inf  ;;  %v9737_v56 = vld [vmem:[%s11325_s3 + $0xa0] sm:$0xff] }
 0x745   : > { %v3340_v12 = vsel %vm1030_vm2, %v9717_v2, -inf }
 0x747   : > { %3341 = vmax.xlane.f32.xlu0 %v3340_v12  ;;  %v9742_v12 = vld [vmem:[%s11325_s3 + $0xb8] sm:$0xff] }
 0x748   : > { %3347 = vmax.xlane.f32.xlu1 %v3346_v7 }
 0x76c   : > { %v9730_v49 = vpop.f32.mrb[100].mxu0 }
 0x76d   : > { %11549 = vst [vmem:[#allocation66_spill] sm:$0xff] %v9730_v49  ;;  %v9732_v23 = vpop.f32.mrb[101].mxu0  ;;  %v6847_v6 = vpop.f32.mrb[60].mxu1 }
 0x76e   : > { %11550 = vst [vmem:[#allocation67_spill] sm:$0xff] %v9732_v23  ;;  %v9745_v7 = vadd.f32 %v6847_v6, %v9728_v50  ;;  %v9747_v46 = vpop.f32.mrb[102].mxu0  ;;  %v3007_v11 = vpop.f32.mrb[61].mxu1 }
 0x76f   : > { %11551 = vst [vmem:[#allocation68_spill] sm:$0xff] %v9747_v46  ;;  %v9751_v59 = vpop.f32.mrb[103].mxu0  ;;  %v6848_v45 = vpop.f32.mrb[62].mxu1  ;;  %v9759_v36 = vadd.f32 %v9737_v56, %v3007_v11 }
 0x770   : > { %11552 = vst [vmem:[#allocation69_spill] sm:$0xff] %v9751_v59  ;;  %v9764_v60 = vadd.f32 %v6848_v45, %v9742_v12  ;;  %v3010_v32 = vpop.f32.mrb[63].mxu1  ;;  %v3355_v35 = vsel %vm1030_vm2, %v9745_v7, -inf }
 0x771   : > { %3356 = vmax.xlane.f32.xlu0 %v3355_v35  ;;  %v9769_v49 = vadd.f32 %v9756_v54, %v3010_v32  ;;  %v3349_v26 = vsel %vm1030_vm2, %v9759_v36, -inf }
 0x772   : > { %v3358_v46 = vsel %vm1030_vm2, %v9764_v60, -inf }
 0x773   : > { %3359 = vmax.xlane.f32.xlu1 %v3358_v46  ;;  %v3352_v35 = vsel %vm1030_vm2, %v9769_v49, -inf }
 0x774   : > { %v6859_v11 = vpop.f32.mrb[104].mxu0 }
 0x775   : > { %v9776_v6 = vadd.f32 %v6859_v11, %v9688_v44  ;;  %v3096_v45 = vpop.f32.mrb[105].mxu0  ;;  %3350 = vmax.xlane.f32.xlu0 %v3349_v26 }
 0x776   : > { %v6860_v23 = vpop.f32.mrb[106].mxu0  ;;  %v9786_v55 = vadd.f32 %v9693_v31, %v3096_v45 }
 0x777   : > { %v9781_v32 = vadd.f32 %v6860_v23, %v9701_v30  ;;  %v3099_v59 = vpop.f32.mrb[107].mxu0  ;;  %3353 = vmax.xlane.f32.xlu1 %v3352_v35  ;;  %v3367_v46 = vsel %vm1030_vm2, %v9776_v6, -inf }
 0x778   : > { %v9791_v33 = vadd.f32 %v9706_v15, %v3099_v59  ;;  %v3361_v35 = vsel %vm1030_vm2, %v9786_v55, -inf }
 0x779   : > { %3368 = vmax.xlane.f32.xlu0 %v3367_v46  ;;  %v6875_v11 = vpop.f32.mrb[64].mxu1  ;;  %v3370_v26 = vsel %vm1030_vm2, %v9781_v32, -inf }
 0x77a   : > { %v3201_v34 = vpop.f32.mrb[65].mxu1  ;;  %v3364_v29 = vsel %vm1030_vm2, %v9791_v33, -inf  ;;  %v9814_v5 = vadd.f32 %v6875_v11, %v9688_v44 }
 0x77b   : > { %3371 = vmax.xlane.f32.xlu1 %v3370_v26  ;;  %v6876_v23 = vpop.f32.mrb[66].mxu1 }
 0x77c   : > { %v6863_v22 = vpop.f32.mrb[108].mxu0  ;;  %v3204_v61 = vpop.f32.mrb[67].mxu1  ;;  %v9819_v17 = vadd.f32 %v6876_v23, %v9701_v30  ;;  %v3391_v11 = vsel %vm1030_vm2, %v9814_v5, -inf }
 0x77d   : > { %v9796_v62 = vadd.f32 %v6863_v22, %v9728_v50  ;;  %3362 = vmax.xlane.f32.xlu0 %v3361_v35  ;;  %v3112_v45 = vpop.f32.mrb[109].mxu0 }
 0x77e   : > { %v6864_v46 = vpop.f32.mrb[110].mxu0  ;;  %v9806_v9 = vadd.f32 %v9737_v56, %v3112_v45  ;;  %v3394_v23 = vsel %vm1030_vm2, %v9819_v17, -inf }
 0x77f   : > { %v9801_v59 = vadd.f32 %v6864_v46, %v9742_v12  ;;  %3365 = vmax.xlane.f32.xlu1 %v3364_v29  ;;  %v3115_v26 = vpop.f32.mrb[111].mxu0  ;;  %v3379_v51 = vsel %vm1030_vm2, %v9796_v62, -inf }
 0x780   : > { %v9811_v35 = vadd.f32 %v9756_v54, %v3115_v26  ;;  %v3373_v29 = vsel %vm1030_vm2, %v9806_v9, -inf  ;;  %v9824_v26 = vadd.f32 %v9693_v31, %v3201_v34 }
 0x781   : > { %3380 = vmax.xlane.f32.xlu0 %v3379_v51  ;;  %v3382_v22 = vsel %vm1030_vm2, %v9801_v59, -inf }
 0x782   : > { %v3376_v51 = vsel %vm1030_vm2, %v9811_v35, -inf }
 0x783   : > { %3383 = vmax.xlane.f32.xlu1 %v3382_v22 }
 0x785   : > { %3374 = vmax.xlane.f32.xlu0 %v3373_v29  ;;  %v6879_v46 = vpop.f32.mrb[68].mxu1  ;;  %v9829_v29 = vadd.f32 %v9706_v15, %v3204_v61 }
 0x786   : > { %v3217_v45 = vpop.f32.mrb[69].mxu1  ;;  %v9834_v16 = vadd.f32 %v6879_v46, %v9728_v50 }
 0x787   : > { %3377 = vmax.xlane.f32.xlu1 %v3376_v51  ;;  %v6880_v10 = vpop.f32.mrb[70].mxu1  ;;  %v3385_v51 = vsel %vm1030_vm2, %v9824_v26, -inf  ;;  %v9844_v61 = vadd.f32 %v9737_v56, %v3217_v45 }
 0x788   : > { %v3220_v22 = vpop.f32.mrb[71].mxu1  ;;  %v9839_v34 = vadd.f32 %v6880_v10, %v9742_v12 }
 0x789   : > { %3392 = vmax.xlane.f32.xlu0 %v3391_v11  ;;  %v3388_v11 = vsel %vm1030_vm2, %v9829_v29, -inf  ;;  %v9849_v46 = vadd.f32 %v9756_v54, %v3220_v22  ;;  %v3397_v20 = vsel %vm1030_vm2, %v9844_v61, -inf }
 0x78b   : > { %3395 = vmax.xlane.f32.xlu1 %v3394_v23  ;;  %v3403_v23 = vsel %vm1030_vm2, %v9834_v16, -inf }
 0x78d   : > { %3386 = vmax.xlane.f32.xlu0 %v3385_v51  ;;  %v3406_v51 = vsel %vm1030_vm2, %v9839_v34, -inf }
 0x78f   : > { %3389 = vmax.xlane.f32.xlu1 %v3388_v11 }
 0x791   : > { %3404 = vmax.xlane.f32.xlu0 %v3403_v23  ;;  %v3400_v23 = vsel %vm1030_vm2, %v9849_v46, -inf }
 0x793   : > { %3407 = vmax.xlane.f32.xlu1 %v3406_v51 }
 0x794   : > { %v6891_v10 = vpop.f32.mrb[112].mxu0 }
 0x795   : > { %v9856_v11 = vadd.f32 %v6891_v10, %v9688_v44  ;;  %v3306_v45 = vpop.f32.mrb[113].mxu0  ;;  %3398 = vmax.xlane.f32.xlu0 %v3397_v20 }
 0x796   : > { %v6892_v58 = vpop.f32.mrb[114].mxu0  ;;  %v9866_v51 = vadd.f32 %v9693_v31, %v3306_v45 }
 0x797   : > { %v9863_v22 = vadd.f32 %v6892_v58, %v9701_v30  ;;  %v3309_v19 = vpop.f32.mrb[115].mxu0  ;;  %3401 = vmax.xlane.f32.xlu1 %v3400_v23  ;;  %v3415_v44 = vsel %vm1030_vm2, %v9856_v11, -inf  ;;  %v9877_v30 = vpop.permute.xlu1 %3887 }
 0x798   : > { %v9871_v20 = vadd.f32 %v9706_v15, %v3309_v19  ;;  %v3409_v58 = vsel %vm1030_vm2, %v9866_v51, -inf }
 0x799   : > { %3416 = vmax.xlane.f32.xlu0 %v3415_v44  ;;  %v3418_v10 = vsel %vm1030_vm2, %v9863_v22, -inf }
 0x79a   : > { %v3412_v19 = vsel %vm1030_vm2, %v9871_v20, -inf }
 0x79b   : > { %3419 = vmax.xlane.f32.xlu1 %v3418_v10 }
 0x79c   : > { %v6895_v52 = vpop.f32.mrb[116].mxu0 }
 0x79d   : > { %v9880_v31 = vadd.f32 %v6895_v52, %v9728_v50  ;;  %v3322_v45 = vpop.f32.mrb[117].mxu0  ;;  %3410 = vmax.xlane.f32.xlu0 %v3409_v58  ;;  %v9897_v58 = vpop.permute.xlu1 %3889 }
 0x79e   : > { %v6896_v23 = vpop.f32.mrb[118].mxu0  ;;  %v9888_v10 = vadd.f32 %v9737_v56, %v3322_v45  ;;  %v9903_v45 = vpop.permute.xlu0 %4078 }
 0x79f   : > { %v9885_v15 = vadd.f32 %v6896_v23, %v9742_v12  ;;  %v3325_v44 = vpop.f32.mrb[119].mxu0  ;;  %3413 = vmax.xlane.f32.xlu1 %v3412_v19  ;;  %v3427_v42 = vsel %vm1030_vm2, %v9880_v31, -inf }
 0x7a0   : > { %v9893_v52 = vadd.f32 %v9756_v54, %v3325_v44  ;;  %v3421_v12 = vsel %vm1030_vm2, %v9888_v10, -inf }
 0x7a1   : > { %3428 = vmax.xlane.f32.xlu0 %v3427_v42  ;;  %v3430_v50 = vsel %vm1030_vm2, %v9885_v15, -inf  ;;  %v9905_v42 = vpop.permute.xlu1 %3974 }
 0x7a2   : > { %v3424_v56 = vsel %vm1030_vm2, %v9893_v52, -inf  ;;  %11553 = vst [vmem:[#allocation70_spill] sm:$0xff] %v9905_v42  ;;  %v9907_v54 = vpop.permute.xlu0 %3976 }
 0x7a3   : > { %3431 = vmax.xlane.f32.xlu1 %v3430_v50  ;;  %11554 = vst [vmem:[#allocation71_spill] sm:$0xff] %v9907_v54 }
 0x7a5   : > { %3422 = vmax.xlane.f32.xlu0 %v3421_v12  ;;  %v9909_v23 = vpop.permute.xlu1 %3978 }
 0x7a6   : > { %11555 = vst [vmem:[#allocation72_spill] sm:$0xff] %v9909_v23  ;;  %v9911_v19 = vpop.permute.xlu0 %4080 }
 0x7a7   : > { %3425 = vmax.xlane.f32.xlu1 %v3424_v56  ;;  %11556 = vst [vmem:[#allocation73_spill] sm:$0xff] %v9911_v19 }
 0x7a9   : > { %v9913_v44 = vpop.permute.xlu1 %4183 }
 0x7aa   : > { %11557 = vst [vmem:[#allocation74_spill] sm:$0xff] %v9913_v44  ;;  %v9915_v50 = vpop.permute.xlu0 %4082 }
 0x7ab   : > { %11558 = vst [vmem:[#allocation75_spill] sm:$0xff] %v9915_v50 }
 0x7ad   : > { %v9917_v18 = vpop.permute.xlu1 %4084 }
 0x7ae   : > { %11559 = vst [vmem:[#allocation76_spill] sm:$0xff] %v9917_v18  ;;  %v9919_v12 = vpop.permute.xlu0 %4185 }
 0x7af   : > { %11560 = vst [vmem:[#allocation77_spill] sm:$0xff] %v9919_v12 }
 0x7b1   : > { %v9921_v0 = vpop.permute.xlu1 %4070 }
 0x7b2   : > { %11561 = vst [vmem:[#allocation78_spill] sm:$0xff] %v9921_v0  ;;  %v9923_v56 = vpop.permute.xlu0 %4072 }
 0x7b3   : > { %11562 = vst [vmem:[#allocation79_spill] sm:$0xff] %v9923_v56 }
 0x7b5   : > { %v9925_v28 = vpop.permute.xlu1 %4187 }
 0x7b6   : > { %11563 = vst [vmem:[#allocation80_spill] sm:$0xff] %v9925_v28  ;;  %v9927_v42 = vpop.permute.xlu0 %4288 }
 0x7b7   : > { %11564 = vst [vmem:[#allocation81_spill] sm:$0xff] %v9927_v42 }
 0x7b9   : > { %v9929_v54 = vpop.permute.xlu1 %4074 }
 0x7ba   : > { %11565 = vst [vmem:[#allocation82_spill] sm:$0xff] %v9929_v54 }
 0x7d0   : > { %v3345_v23 = vpop.xlane.xlu0 %3344 }
 0x7d1   : > { %v3435_v19 = vsub.f32 %v9696_v63, %v3345_v23  ;;  %v3339_v44 = vpop.xlane.xlu1 %3338 }
 0x7d2   : > { %v3433_v50 = vsub.f32 %v9709_v8, %v3339_v44 }
 0x7d3   : > { %v3469_v38 = vmul.f32 1.442695, %v3435_v19 }
 0x7d4   : > { %v3465_v18 = vmul.f32 1.442695, %v3433_v50  ;;  %v3342_v53 = vpop.xlane.xlu0 %3341 }
 0x7d5   : > { %7727 = vpow2.f32 %v3469_v38  ;;  %v3434_v12 = vsub.f32 %v9717_v2, %v3342_v53  ;;  %v3348_v0 = vpop.xlane.xlu1 %3347 }
 0x7d6   : > { %v3436_v56 = vsub.f32 %v9714_v43, %v3348_v0  ;;  %7729 = vpow2.f32 %v3465_v18 }
 0x7d7   : > { %v3467_v28 = vmul.f32 1.442695, %v3434_v12 }
 0x7d8   : > { %v3471_v42 = vmul.f32 1.442695, %v3436_v56 }
 0x7da   : > { %7731 = vpow2.f32 %v3471_v42 }
 0x7db   : > { %7733 = vpow2.f32 %v3467_v28 }
 0x7df   : > { %v9935_v54 = vpop.eup %7727 }
 0x7e0   : > { %v3535_v63 = vsel %vm1030_vm2, %v9935_v54, 0.0  ;;  %v9939_v8 = vpop.eup %7729 }
 0x7e1   : > { %3536 = vadd.xlane.f32.xlu0 %v3535_v63  ;;  %v3529_v38 = vsel %vm1030_vm2, %v9939_v8, 0.0 }
 0x7e4   : > { %v9941_v23 = vpop.eup %7731 }
 0x7e5   : > { %3530 = vadd.xlane.f32.xlu0 %v3529_v38  ;;  %v3538_v53 = vsel %vm1030_vm2, %v9941_v23, 0.0  ;;  %v9947_v18 = vpop.eup %7733 }
 0x7e6   : > { %3539 = vadd.xlane.f32.xlu1 %v3538_v53  ;;  %v3532_v28 = vsel %vm1030_vm2, %v9947_v18, 0.0 }
 0x7ea   : > { %3533 = vadd.xlane.f32.xlu1 %v3532_v28 }
 0x7fe   : > { %v3357_v0 = vpop.xlane.xlu0 %3356 }
 0x7ff   : > { %v3439_v2 = vsub.f32 %v9745_v7, %v3357_v0 }
 0x800   : > { %v3360_v43 = vpop.xlane.xlu1 %3359 }
 0x801   : > { %v3477_v42 = vmul.f32 1.442695, %v3439_v2  ;;  %v3440_v19 = vsub.f32 %v9764_v60, %v3360_v43 }
 0x802   : > { %v3351_v44 = vpop.xlane.xlu0 %3350 }
 0x803   : > { %7735 = vpow2.f32 %v3477_v42  ;;  %v3479_v50 = vmul.f32 1.442695, %v3440_v19  ;;  %v3437_v12 = vsub.f32 %v9759_v36, %v3351_v44 }
 0x804   : > { %v3354_v56 = vpop.xlane.xlu1 %3353 }
 0x805   : > { %7737 = vpow2.f32 %v3479_v50  ;;  %v3473_v63 = vmul.f32 1.442695, %v3437_v12  ;;  %v3438_v38 = vsub.f32 %v9769_v49, %v3354_v56 }
 0x806   : > { %v3369_v53 = vpop.xlane.xlu0 %3368 }
 0x807   : > { %7739 = vpow2.f32 %v3473_v63  ;;  %v3475_v28 = vmul.f32 1.442695, %v3438_v38  ;;  %v3443_v27 = vsub.f32 %v9776_v6, %v3369_v53 }
 0x808   : > { %v3372_v7 = vpop.xlane.xlu1 %3371 }
 0x809   : > { %7741 = vpow2.f32 %v3475_v28  ;;  %v3485_v0 = vmul.f32 1.442695, %v3443_v27  ;;  %v3444_v60 = vsub.f32 %v9781_v32, %v3372_v7 }
 0x80a   : > { %v3363_v2 = vpop.xlane.xlu0 %3362 }
 0x80b   : > { %v3487_v43 = vmul.f32 1.442695, %v3444_v60  ;;  %v3441_v42 = vsub.f32 %v9786_v55, %v3363_v2  ;;  %7743 = vpow2.f32 %v3485_v0 }
 0x80c   : > { %v3366_v36 = vpop.xlane.xlu1 %3365 }
 0x80d   : > { %v9958_v19 = vpop.eup %7735  ;;  %7745 = vpow2.f32 %v3487_v43  ;;  %v3481_v49 = vmul.f32 1.442695, %v3441_v42  ;;  %v3442_v44 = vsub.f32 %v9791_v33, %v3366_v36 }
 0x80e   : > { %v3381_v50 = vpop.xlane.xlu0 %3380  ;;  %v3547_v6 = vsel %vm1030_vm2, %v9958_v19, 0.0 }
 0x80f   : > { %v9963_v12 = vpop.eup %7737  ;;  %v3447_v27 = vsub.f32 %v9796_v62, %v3381_v50  ;;  %3548 = vadd.xlane.f32.xlu1 %v3547_v6  ;;  %7747 = vpow2.f32 %v3481_v49  ;;  %v3483_v55 = vmul.f32 1.442695, %v3442_v44 }
 0x810   : > { %v3384_v32 = vpop.xlane.xlu1 %3383  ;;  %v3550_v53 = vsel %vm1030_vm2, %v9963_v12, 0.0 }
 0x811   : > { %v9966_v56 = vpop.eup %7739  ;;  %v3493_v63 = vmul.f32 1.442695, %v3447_v27  ;;  %v3448_v62 = vsub.f32 %v9801_v59, %v3384_v32 }
 0x812   : > { %v3375_v38 = vpop.xlane.xlu0 %3374  ;;  %v3541_v33 = vsel %vm1030_vm2, %v9966_v56, 0.0 }
 0x813   : > { %v9972_v28 = vpop.eup %7741  ;;  %7749 = vpow2.f32 %v3493_v63  ;;  %v3445_v7 = vsub.f32 %v9806_v9, %v3375_v38  ;;  %3551 = vadd.xlane.f32.xlu1 %v3550_v53  ;;  %3542 = vadd.xlane.f32.xlu0 %v3541_v33  ;;  %v3495_v9 = vmul.f32 1.442695, %v3448_v62 }
 0x814   : > { %v3378_v0 = vpop.xlane.xlu1 %3377  ;;  %7751 = vpow2.f32 %v3483_v55  ;;  %v3544_v36 = vsel %vm1030_vm2, %v9972_v28, 0.0 }
 0x815   : > { %v3489_v60 = vmul.f32 1.442695, %v3445_v7  ;;  %v3446_v2 = vsub.f32 %v9811_v35, %v3378_v0  ;;  %v9977_v43 = vpop.eup %7743 }
 0x816   : > { %v3393_v42 = vpop.xlane.xlu0 %3392  ;;  %v3559_v32 = vsel %vm1030_vm2, %v9977_v43, 0.0 }
 0x817   : > { %v9981_v49 = vpop.eup %7745  ;;  %v3491_v44 = vmul.f32 1.442695, %v3446_v2  ;;  %3545 = vadd.xlane.f32.xlu1 %v3544_v36  ;;  %7753 = vpow2.f32 %v3489_v60  ;;  %v3451_v50 = vsub.f32 %v9814_v5, %v3393_v42 }
 0x818   : > { %v3396_v59 = vpop.xlane.xlu1 %3395  ;;  %v3562_v6 = vsel %vm1030_vm2, %v9981_v49, 0.0 }
 0x819   : > { %7755 = vpow2.f32 %v3491_v44  ;;  %v3452_v35 = vsub.f32 %v9819_v17, %v3396_v59  ;;  %3563 = vadd.xlane.f32.xlu0 %v3562_v6  ;;  %v9989_v55 = vpop.eup %7747  ;;  %v3501_v38 = vmul.f32 1.442695, %v3451_v50 }
 0x81a   : > { %v3387_v27 = vpop.xlane.xlu0 %3386  ;;  %7757 = vpow2.f32 %v3495_v9  ;;  %v3553_v62 = vsel %vm1030_vm2, %v9989_v55, 0.0 }
 0x81b   : > { %v3503_v63 = vmul.f32 1.442695, %v3452_v35  ;;  %3560 = vadd.xlane.f32.xlu1 %v3559_v32  ;;  %v3449_v33 = vsub.f32 %v9824_v26, %v3387_v27 }
 0x81c   : > { %v3390_v53 = vpop.xlane.xlu1 %3389 }
 0x81d   : > { %v9991_v5 = vpop.eup %7749  ;;  %7759 = vpow2.f32 %v3503_v63  ;;  %v3450_v7 = vsub.f32 %v9829_v29, %v3390_v53  ;;  %v3497_v44 = vmul.f32 1.442695, %v3449_v33 }
 0x81e   : > { %v3405_v17 = vpop.xlane.xlu0 %3404  ;;  %v3571_v0 = vsel %vm1030_vm2, %v9991_v5, 0.0  ;;  %v9999_v60 = vpop.eup %7751  ;;  %7761 = vpow2.f32 %v3501_v38 }
 0x81f   : > { %v3499_v2 = vmul.f32 1.442695, %v3450_v7  ;;  %v3455_v42 = vsub.f32 %v9834_v16, %v3405_v17  ;;  %3554 = vadd.xlane.f32.xlu1 %v3553_v62  ;;  %3572 = vadd.xlane.f32.xlu0 %v3571_v0  ;;  %v3556_v50 = vsel %vm1030_vm2, %v9999_v60, 0.0 }
 0x820   : > { %v3408_v36 = vpop.xlane.xlu1 %3407 }
 0x821   : > { %7763 = vpow2.f32 %v3499_v2  ;;  %v3509_v26 = vmul.f32 1.442695, %v3455_v42  ;;  %v10002_v29 = vpop.eup %7753  ;;  %v3456_v6 = vsub.f32 %v9839_v34, %v3408_v36 }
 0x822   : > { %v3399_v9 = vpop.xlane.xlu0 %3398  ;;  %v3565_v33 = vsel %vm1030_vm2, %v10002_v29, 0.0 }
 0x823   : > { %v10006_v59 = vpop.eup %7755  ;;  %7765 = vpow2.f32 %v3509_v26  ;;  %v3453_v16 = vsub.f32 %v9844_v61, %v3399_v9  ;;  %3557 = vadd.xlane.f32.xlu1 %v3556_v50  ;;  %v3511_v34 = vmul.f32 1.442695, %v3456_v6 }
 0x824   : > { %v3402_v35 = vpop.xlane.xlu1 %3401  ;;  %v3568_v27 = vsel %vm1030_vm2, %v10006_v59, 0.0  ;;  %7767 = vpow2.f32 %v3497_v44  ;;  %v10013_v38 = vpop.eup %7757 }
 0x825   : > { %v3505_v32 = vmul.f32 1.442695, %v3453_v16  ;;  %v3454_v63 = vsub.f32 %v9849_v46, %v3402_v35  ;;  %3569 = vadd.xlane.f32.xlu0 %v3568_v27  ;;  %v3574_v36 = vsel %vm1030_vm2, %v10013_v38, 0.0 }
 0x826   : > { %v3417_v53 = vpop.xlane.xlu0 %3416 }
 0x827   : > { %v10017_v7 = vpop.eup %7759  ;;  %7769 = vpow2.f32 %v3505_v32  ;;  %v3507_v61 = vmul.f32 1.442695, %v3454_v63  ;;  %v3459_v17 = vsub.f32 %v9856_v11, %v3417_v53  ;;  %3566 = vadd.xlane.f32.xlu1 %v3565_v33 }
 0x828   : > { %v3420_v62 = vpop.xlane.xlu1 %3419  ;;  %v3586_v0 = vsel %vm1030_vm2, %v10017_v7, 0.0  ;;  %v10023_v2 = vpop.eup %7761 }
 0x829   : > { %7771 = vpow2.f32 %v3507_v61  ;;  %v3460_v46 = vsub.f32 %v9863_v22, %v3420_v62  ;;  %3587 = vadd.xlane.f32.xlu0 %v3586_v0  ;;  %v3517_v26 = vmul.f32 1.442695, %v3459_v17  ;;  %v3583_v35 = vsel %vm1030_vm2, %v10023_v2, 0.0 }
 0x82a   : > { %v3411_v42 = vpop.xlane.xlu0 %3410  ;;  %7773 = vpow2.f32 %v3511_v34 }
 0x82b   : > { %v10027_v44 = vpop.eup %7763  ;;  %v3519_v11 = vmul.f32 1.442695, %v3460_v46  ;;  %v3457_v9 = vsub.f32 %v9866_v51, %v3411_v42  ;;  %3575 = vadd.xlane.f32.xlu1 %v3574_v36 }
 0x82c   : > { %v3414_v50 = vpop.xlane.xlu1 %3413  ;;  %v3580_v6 = vsel %vm1030_vm2, %v10027_v44, 0.0 }
 0x82d   : > { %v10032_v22 = vpop.eup %7765  ;;  %7775 = vpow2.f32 %v3519_v11  ;;  %v3458_v16 = vsub.f32 %v9871_v20, %v3414_v50  ;;  %3581 = vadd.xlane.f32.xlu0 %v3580_v6  ;;  %v3513_v32 = vmul.f32 1.442695, %v3457_v9 }
 0x82e   : > { %v10037_v27 = vpop.eup %7767  ;;  %7777 = vpow2.f32 %v3517_v26  ;;  %v3595_v51 = vsel %vm1030_vm2, %v10032_v22, 0.0  ;;  %v3429_v6 = vpop.xlane.xlu0 %3428 }
 0x82f   : > { %v3515_v63 = vmul.f32 1.442695, %v3458_v16  ;;  %3584 = vadd.xlane.f32.xlu1 %v3583_v35  ;;  %v3577_v20 = vsel %vm1030_vm2, %v10037_v27, 0.0 }
 0x830   : > { %v3432_v16 = vpop.xlane.xlu1 %3431 }
 0x831   : > { %v10041_v53 = vpop.eup %7769  ;;  %7779 = vpow2.f32 %v3515_v63  ;;  %3596 = vadd.xlane.f32.xlu0 %v3595_v51  ;;  %v3463_v63 = vsub.f32 %v9880_v31, %v3429_v6 }
 0x832   : > { %7781 = vpow2.f32 %v3513_v32  ;;  %v3589_v34 = vsel %vm1030_vm2, %v10041_v53, 0.0  ;;  %v3423_v35 = vpop.xlane.xlu0 %3422 }
 0x833   : > { %v10045_v33 = vpop.eup %7771  ;;  %3578 = vadd.xlane.f32.xlu1 %v3577_v20  ;;  %v3461_v32 = vsub.f32 %v9888_v10, %v3423_v35  ;;  %v3464_v20 = vsub.f32 %v9885_v15, %v3432_v16 }
 0x834   : > { %v10049_v61 = vpop.eup %7773  ;;  %v3592_v17 = vsel %vm1030_vm2, %v10045_v33, 0.0  ;;  %v3426_v51 = vpop.xlane.xlu1 %3425 }
 0x835   : > { %3590 = vadd.xlane.f32.xlu0 %v3589_v34  ;;  %v3598_v0 = vsel %vm1030_vm2, %v10049_v61, 0.0  ;;  %v3521_v34 = vmul.f32 1.442695, %v3461_v32 }
 0x837   : > { %v10053_v62 = vpop.eup %7775  ;;  %3593 = vadd.xlane.f32.xlu1 %v3592_v17  ;;  %v3525_v17 = vmul.f32 1.442695, %v3463_v63  ;;  %7783 = vpow2.f32 %v3521_v34 }
 0x838   : > { %11566 = vst [vmem:[#allocation83_spill] sm:$0xff] %v10053_v62  ;;  %v10057_v46 = vpop.eup %7777  ;;  %v3610_v42 = vsel %vm1030_vm2, %v10053_v62, 0.0 }
 0x839   : > { %3599 = vadd.xlane.f32.xlu0 %v3598_v0  ;;  %v3607_v26 = vsel %vm1030_vm2, %v10057_v46, 0.0  ;;  %v3462_v0 = vsub.f32 %v9893_v52, %v3426_v51  ;;  %7785 = vpow2.f32 %v3525_v17 }
 0x83b   : > { %v10061_v36 = vpop.eup %7779  ;;  %3611 = vadd.xlane.f32.xlu1 %v3610_v42  ;;  %v3527_v42 = vmul.f32 1.442695, %v3464_v20 }
 0x83c   : > { %v10065_v11 = vpop.eup %7781  ;;  %v3604_v9 = vsel %vm1030_vm2, %v10061_v36, 0.0 }
 0x83d   : > { %3608 = vadd.xlane.f32.xlu0 %v3607_v26  ;;  %v3601_v50 = vsel %vm1030_vm2, %v10065_v11, 0.0  ;;  %v3523_v26 = vmul.f32 1.442695, %v3462_v0  ;;  %7787 = vpow2.f32 %v3527_v42 }
 0x83f   : > { %3605 = vadd.xlane.f32.xlu1 %v3604_v9  ;;  %7789 = vpow2.f32 %v3523_v26 }
 0x841   : > { %3602 = vadd.xlane.f32.xlu0 %v3601_v50  ;;  %v10079_v50 = vpop.eup %7783 }
 0x842   : > { %v3613_v15 = vsel %vm1030_vm2, %v10079_v50, 0.0 }
 0x843   : > { %v10081_v62 = vpop.eup %7785 }
 0x844   : > { %v3619_v52 = vsel %vm1030_vm2, %v10081_v62, 0.0 }
 0x847   : > { %v10085_v6 = vpop.eup %7787 }
 0x848   : > { %v3622_v32 = vsel %vm1030_vm2, %v10085_v6, 0.0 }
 0x849   : > { %v10089_v16 = vpop.eup %7789 }
 0x84a   : > { %v3616_v63 = vsel %vm1030_vm2, %v10089_v16, 0.0 }
 0x850   : > { %4189 = vrot.lane.b32.xlu1 %v8143_v57, %s7999_s30 }
 0x857   : > { %4076 = vrot.lane.b32.xlu0 %v8117_v37, %s8000_s7 }
 0x86e   : > { %v3537_v9 = vpop.xlane.xlu0 %3536 }
 0x872   : > { %v3531_v10 = vpop.xlane.xlu0 %3530 }
 0x873   : > { %v3540_v31 = vpop.xlane.xlu1 %3539 }
 0x874   : > { %3614 = vadd.xlane.f32.xlu1 %v3613_v15  ;;  %7791 = vrcp.f32 %v3540_v31 }
 0x875   : > { %7793 = vrcp.f32 %v3531_v10 }
 0x876   : > { %3620 = vadd.xlane.f32.xlu0 %v3619_v52  ;;  %7795 = vrcp.f32 %v3537_v9  ;;  %v11567_v52 = vld [vmem:[#allocation2_spill] sm:$0xff] }
 0x877   : > { %v3534_v35 = vpop.xlane.xlu1 %3533 }
 0x878   : > { %7797 = vrcp.f32 %v3534_v35  ;;  %3623 = vadd.xlane.f32.xlu1 %v3622_v32 }
 0x87a   : > { %3617 = vadd.xlane.f32.xlu0 %v3616_v63 }
 0x87e   : > { %v7792_v51 = vpop.eup %7791 }
 0x87f   : > { %v7794_v20 = vpop.eup %7793  ;;  %v3660_v0 = vmul.f32 %v7792_v51, %v9941_v23 }
 0x880   : > { %v7796_v34 = vpop.eup %7795  ;;  %v3657_v42 = vmul.f32 %v7794_v20, %v9939_v8 }
 0x881   : > { %v3659_v9 = vmul.f32 %v7796_v34, %v9935_v54 }
 0x882   : > { %v7798_v17 = vpop.eup %7797 }
 0x883   : > { %v3658_v26 = vmul.f32 %v7798_v17, %v9947_v18  ;;  %v3690_v31 = vpack.c.bf16 %v3660_v0, %v3659_v9 }
 0x885   : > { %v3689_v10 = vpack.c.bf16 %v3658_v26, %v3657_v42 }
 0x887   : > { %6905 = vmatprep.mubr.msk.bf16.mxu1 %vm1030_vm2, %v3689_v10 }
 0x888   : > { %6906 = vmatmul.mubr.msk.bf16.vlgmr.msra.gmra.mrb[72].mxu1 %vm1030_vm2, %v3690_v31 }
 0x889   : > { %6930 = vmatpush3.bf16.msra.mxu1 %v9594_v1  ;;  %4175 = vrot.lane.b32.xlu1 %v8131_v48, %s8000_s7 }
 0x88a   : > { %6931 = vmatprep.subr.bf16.mxu1 %v9860_v21 }
 0x88d   : > { %6932 = vmatpush3.bf16.msra.mxu1 %v9860_v21  ;;  %4292 = vrot.lane.b32.xlu1 %v8169_v14, %s7999_s30 }
 0x88e   : > { %6933 = vmatprep.subr.bf16.mxu1 %v9877_v30 }
 0x890   : > { %4290 = vrot.lane.b32.xlu0 %v8155_v3, %s7999_s30 }
 0x891   : > { %6934 = vmatpush3.bf16.msra.mxu1 %v9877_v30  ;;  %4179 = vrot.lane.b32.xlu1 %v11505_v41, %s8000_s7 }
 0x892   : > { %6935 = vmatprep.subr.bf16.mxu1 %v9897_v58 }
 0x894   : > { %4177 = vrot.lane.b32.xlu0 %v8129_v47, %s8000_s7 }
 0x895   : > { %6936 = vmatpush3.bf16.msra.mxu1 %v9897_v58  ;;  %4294 = vrot.lane.b32.xlu1 %v8167_v13, %s7999_s30 }
 0x896   : > { %7173 = vmatprep.subr.msk.bf16.mxu1 %vm637_vm1, %v9903_v45 }
 0x898   : > { %4393 = vrot.lane.b32.xlu0 %v8181_v25, %s7999_s30 }
 0x899   : > { %4280 = vrot.lane.b32.xlu1 %v8157_v4, %s8000_s7 }
 0x89c   : > { %v3549_v1 = vpop.xlane.xlu1 %3548  ;;  %4181 = vrot.lane.b32.xlu0 %v8143_v57, %s8000_s7 }
 0x89d   : > { %4397 = vrot.lane.b32.xlu1 %v8193_v39, %s7999_s30 }
 0x8a0   : > { %v3552_v21 = vpop.xlane.xlu1 %3551  ;;  %4395 = vrot.lane.b32.xlu0 %v8179_v24, %s7999_s30  ;;  %v3543_v30 = vpop.xlane.xlu0 %3542 }
 0x8a1   : > { %4286 = vrot.lane.b32.xlu1 %v8167_v13, %s8000_s7  ;;  %7799 = vrcp.f32 %v3552_v21 }
 0x8a2   : > { %7801 = vrcp.f32 %v3543_v30 }
 0x8a3   : > { %7803 = vrcp.f32 %v3549_v1 }
 0x8a4   : > { %v3546_v58 = vpop.xlane.xlu1 %3545  ;;  %4282 = vrot.lane.b32.xlu0 %v8155_v3, %s8000_s7 }
 0x8a5   : > { %7805 = vrcp.f32 %v3546_v58  ;;  %4385 = vrot.lane.b32.xlu1 %v8181_v25, %s8000_s7  ;;  %v11569_v58 = vld [vmem:[#allocation4_spill] sm:$0xff] }
 0x8a6   : > { %v3564_v8 = vpop.xlane.xlu0 %3563 }
 0x8a8   : > { %v3561_v54 = vpop.xlane.xlu1 %3560  ;;  %4284 = vrot.lane.b32.xlu0 %v8169_v14, %s8000_s7 }
 0x8a9   : > { %4389 = vrot.lane.b32.xlu1 %v8193_v39, %s8000_s7  ;;  %7807 = vrcp.f32 %v3561_v54 }
 0x8ab   : > { %v7800_v23 = vpop.eup %7799 }
 0x8ac   : > { %v3555_v18 = vpop.xlane.xlu1 %3554  ;;  %4399 = vrot.lane.b32.xlu0 %v11506_v40, %s7999_s30  ;;  %v7802_v15 = vpop.eup %7801  ;;  %v3664_v51 = vmul.f32 %v7800_v23, %v9963_v12 }
 0x8ad   : > { %4860 = vrot.lane.b32.xlu1 %v11567_v52, %s8001_s26  ;;  %v7804_v35 = vpop.eup %7803  ;;  %v3573_v32 = vpop.xlane.xlu0 %3572  ;;  %7809 = vrcp.f32 %v3555_v18  ;;  %v3661_v34 = vmul.f32 %v7802_v15, %v9966_v56 }
 0x8ae   : > { %7811 = vrcp.f32 %v3564_v8  ;;  %v3663_v0 = vmul.f32 %v7804_v35, %v9958_v19 }
 0x8af   : > { %v7806_v63 = vpop.eup %7805 }
 0x8b0   : > { %v3558_v20 = vpop.xlane.xlu1 %3557  ;;  %4387 = vrot.lane.b32.xlu0 %v8179_v24, %s8000_s7  ;;  %v3662_v17 = vmul.f32 %v7806_v63, %v9972_v28  ;;  %v3692_v9 = vpack.c.bf16 %v3664_v51, %v3663_v0  ;;  %v11568_v28 = vld [vmem:[#allocation3_spill] sm:$0xff] }
 0x8b1   : > { %7813 = vrcp.f32 %v3558_v20  ;;  %4947 = vrot.lane.b32.xlu1 %v8131_v48, %s8001_s26  ;;  %v11571_v20 = vld [vmem:[#allocation70_spill] sm:$0xff] }
 0x8b2   : > { %v3570_v42 = vpop.xlane.xlu0 %3569  ;;  %v3691_v26 = vpack.c.bf16 %v3662_v17, %v3661_v34  ;;  %v11572_v17 = vld [vmem:[#allocation71_spill] sm:$0xff] }
 0x8b3   : > { %7815 = vrcp.f32 %v3570_v42  ;;  %v7808_v48 = vpop.eup %7807 }
 0x8b4   : > { %v3567_v12 = vpop.xlane.xlu1 %3566  ;;  %4391 = vrot.lane.b32.xlu0 %v11506_v40, %s8000_s7  ;;  %6909 = vmatprep.mubr.msk.bf16.mxu1 %vm1030_vm2, %v3691_v26  ;;  %v3667_v30 = vmul.f32 %v7808_v48, %v9977_v43 }
 0x8b5   : > { %7817 = vrcp.f32 %v3567_v12  ;;  %4949 = vrot.lane.b32.xlu1 %v8129_v47, %s8001_s26  ;;  %6910 = vmatmul.mubr.msk.bf16.gmra.mrb[76].mxu1 %vm1030_vm2, %v3692_v9  ;;  %v11573_v12 = vld [vmem:[#allocation72_spill] sm:$0xff] }
 0x8b6   : > { %v3588_v56 = vpop.xlane.xlu0 %3587  ;;  %7819 = vrcp.f32 %v3573_v32 }
 0x8b7   : > { %v7810_v10 = vpop.eup %7809 }
 0x8b8   : > { %v3576_v19 = vpop.xlane.xlu1 %3575  ;;  %4858 = vrot.lane.b32.xlu0 %v11568_v28, %s8001_s26  ;;  %v7812_v31 = vpop.eup %7811  ;;  %v3665_v54 = vmul.f32 %v7810_v10, %v9989_v55 }
 0x8b9   : > { %7821 = vrcp.f32 %v3576_v19  ;;  %4953 = vrot.lane.b32.xlu1 %v8143_v57, %s8001_s26  ;;  %v3668_v18 = vmul.f32 %v7812_v31, %v9981_v49 }
 0x8ba   : > { %v3582_v1 = vpop.xlane.xlu0 %3581 }
 0x8bb   : > { %v7814_v21 = vpop.eup %7813  ;;  %v3694_v35 = vpack.c.bf16 %v3668_v18, %v3667_v30 }
 0x8bc   : > { %v3585_v47 = vpop.xlane.xlu1 %3584  ;;  %4862 = vrot.lane.b32.xlu0 %v11569_v58, %s8001_s26  ;;  %v3666_v8 = vmul.f32 %v7814_v21, %v9999_v60  ;;  %v11574_v21 = vld [vmem:[#allocation74_spill] sm:$0xff]  ;;  %v11575_v58 = vld [vmem:[#allocation73_spill] sm:$0xff] }
 0x8bd   : > { %v7816_v23 = vpop.eup %7815  ;;  %5038 = vrot.lane.b32.xlu1 %v8155_v3, %s8001_s26  ;;  %7823 = vrcp.f32 %v3585_v47  ;;  %v11570_v3 = vld [vmem:[#allocation5_spill] sm:$0xff] }
 0x8be   : > { %v3597_v57 = vpop.xlane.xlu0 %3596  ;;  %v3693_v15 = vpack.c.bf16 %v3666_v8, %v3665_v54  ;;  %7825 = vrcp.f32 %v3582_v1  ;;  %v3670_v49 = vmul.f32 %v7816_v23, %v10006_v59 }
 0x8bf   : > { %v7818_v52 = vpop.eup %7817  ;;  %7827 = vrcp.f32 %v3588_v56 }
 0x8c0   : > { %6921 = vmatprep.mubr.msk.bf16.mxu0 %vm1030_vm2, %v3693_v15  ;;  %v3579_v43 = vpop.xlane.xlu1 %3578  ;;  %4864 = vrot.lane.b32.xlu0 %v8117_v37, %s8001_s26  ;;  %v3669_v55 = vmul.f32 %v7818_v52, %v10002_v29  ;;  %v7820_v60 = vpop.eup %7819  ;;  %v11576_v52 = vld [vmem:[#allocation78_spill] sm:$0xff] }
 0x8c1   : > { %7829 = vrcp.f32 %v3579_v43  ;;  %5042 = vrot.lane.b32.xlu1 %v8167_v13, %s8001_s26  ;;  %6922 = vmatmul.mubr.msk.bf16.vlgmr.msra.gmra.mrb[120].mxu0 %vm1030_vm2, %v3694_v35  ;;  %v3671_v29 = vmul.f32 %v7820_v60, %v9991_v5  ;;  %v11577_v35 = vld [vmem:[#allocation83_spill] sm:$0xff]  ;;  %v4204_v60 = vsel %vm637_vm1, %v11574_v21, 0 }
 0x8c2   : > { %6946 = vmatpush3.bf16.msra.mxu0 %v11570_v3  ;;  %v3591_v32 = vpop.xlane.xlu0 %3590  ;;  %v3695_v63 = vpack.c.bf16 %v3670_v49, %v3669_v55  ;;  %v11578_v55 = vld [vmem:[#allocation75_spill] sm:$0xff]  ;;  %v11579_v3 = vld [vmem:[#allocation77_spill] sm:$0xff] }
 0x8c3   : > { %v7822_v51 = vpop.eup %7821  ;;  %6947 = vmatprep.subr.bf16.mxu0 %v11571_v20  ;;  %7831 = vrcp.f32 %v3591_v32  ;;  %v4207_v32 = vsel %vm637_vm1, %v11579_v3, 0 }
 0x8c4   : > { %v3594_v37 = vpop.xlane.xlu1 %3593  ;;  %4951 = vrot.lane.b32.xlu0 %v11505_v41, %s8001_s26  ;;  %6925 = vmatprep.mubr.msk.bf16.mxu0 %vm1030_vm2, %v3695_v63  ;;  %v3672_v13 = vmul.f32 %v7822_v51, %v10013_v38  ;;  %v11581_v63 = vld [vmem:[#allocation80_spill] sm:$0xff] }
 0x8c5   : > { %7833 = vrcp.f32 %v3594_v37  ;;  %v4210_v37 = vsel %vm637_vm1, %v11581_v63, 0 }
 0x8c6   : > { %6948 = vmatpush3.bf16.msra.mxu0 %v11571_v20  ;;  %v3600_v59 = vpop.xlane.xlu0 %3599  ;;  %v3696_v34 = vpack.c.bf16 %v3672_v13, %v3671_v29  ;;  %v11582_v20 = vld [vmem:[#allocation81_spill] sm:$0xff]  ;;  %v11583_v13 = vld [vmem:[#allocation79_spill] sm:$0xff] }
 0x8c7   : > { %6949 = vmatprep.subr.bf16.mxu0 %v11572_v17  ;;  %7835 = vrcp.f32 %v3600_v59  ;;  %v7824_v0 = vpop.eup %7823  ;;  %v4309_v59 = vsel %vm637_vm1, %v11582_v20, 0 }
 0x8c8   : > { %7837 = vrcp.f32 %v3597_v57  ;;  %v3612_v42 = vpop.xlane.xlu1 %3611  ;;  %5036 = vrot.lane.b32.xlu0 %v8157_v4, %s8001_s26  ;;  %v7826_v41 = vpop.eup %7825  ;;  %v3675_v9 = vmul.f32 %v7824_v0, %v10023_v2 }
 0x8c9   : > { %6926 = vmatmul.mubr.msk.bf16.gmra.mrb[124].mxu0 %vm1030_vm2, %v3696_v34  ;;  %v7828_v5 = vpop.eup %7827  ;;  %v3674_v4 = vmul.f32 %v7826_v41, %v10027_v44  ;;  %v11584_v34 = vld [vmem:[#allocation82_spill] sm:$0xff] }
 0x8ca   : > { %6950 = vmatpush3.bf16.msra.mxu0 %v11572_v17  ;;  %v3609_v38 = vpop.xlane.xlu0 %3608  ;;  %v3676_v28 = vmul.f32 %v7828_v5, %v10017_v7  ;;  %v4099_v7 = vsel %vm637_vm1, %v9903_v45, 0  ;;  %v4102_v45 = vsel %vm637_vm1, %v11575_v58, 0 }
 0x8cb   : > { %v7830_v26 = vpop.eup %7829  ;;  %6951 = vmatprep.subr.bf16.mxu0 %v11573_v12  ;;  %7839 = vrcp.f32 %v3609_v38 }
 0x8cc   : > { %v3606_v56 = vpop.xlane.xlu1 %3605  ;;  %5040 = vrot.lane.b32.xlu0 %v8169_v14, %s8001_s26  ;;  %v3673_v48 = vmul.f32 %v7830_v26, %v10037_v27  ;;  %v3698_v1 = vpack.c.bf16 %v3676_v28, %v3675_v9 }
 0x8cd   : > { %v7832_v19 = vpop.eup %7831  ;;  %7841 = vrcp.f32 %v3606_v56 }
 0x8ce   : > { %7843 = vrcp.f32 %v3612_v42  ;;  %6952 = vmatpush3.bf16.msra.mxu0 %v11573_v12  ;;  %v3603_v10 = vpop.xlane.xlu0 %3602  ;;  %v3697_v2 = vpack.c.bf16 %v3674_v4, %v3673_v48  ;;  %v3677_v14 = vmul.f32 %v7832_v19, %v10041_v53 }
 0x8cf   : > { %v7834_v31 = vpop.eup %7833  ;;  %7177 = vmatprep.subr.msk.bf16.mxu0 %vm637_vm1, %v11574_v21  ;;  %7845 = vrcp.f32 %v3603_v10 }
 0x8d0   : > { %6937 = vmatprep.mubr.msk.bf16.mxu1 %vm1030_vm2, %v3697_v2  ;;  %v3678_v44 = vmul.f32 %v7834_v31, %v10045_v33  ;;  %v4190_v29 = vpop.permute.xlu1 %4189 }
 0x8d1   : > { %v7836_v27 = vpop.eup %7835  ;;  %6938 = vmatmul.mubr.msk.bf16.vlgmr.msra.gmra.mrb[80].mxu1 %vm1030_vm2, %v3698_v1  ;;  %v4213_v17 = vsel %vm637_vm1, %v4190_v29, 0 }
 0x8d2   : > { %v7838_v30 = vpop.eup %7837  ;;  %6962 = vmatpush3.bf16.xpose.msra.mxu1 %v4099_v7  ;;  %v3699_v47 = vpack.c.bf16 %v3678_v44, %v3677_v14  ;;  %v3680_v54 = vmul.f32 %v7836_v27, %v10049_v61  ;;  %v4077_v0 = vpop.permute.xlu0 %4076 }
 0x8d3   : > { %7174 = vmatprep.subr.msk.bf16.mxu1 %vm637_vm1, %v11575_v58  ;;  %v3679_v53 = vmul.f32 %v7838_v30, %v10032_v22 }
 0x8d4   : > { %6941 = vmatprep.mubr.msk.bf16.mxu1 %vm1030_vm2, %v3699_v47 }
 0x8d5   : > { %v7840_v8 = vpop.eup %7839  ;;  %v3700_v23 = vpack.c.bf16 %v3680_v54, %v3679_v53 }
 0x8d6   : > { %v3683_v15 = vmul.f32 %v7840_v8, %v10057_v46 }
 0x8d7   : > { %v7842_v33 = vpop.eup %7841 }
 0x8d8   : > { %v7844_v18 = vpop.eup %7843  ;;  %v3682_v22 = vmul.f32 %v7842_v33, %v10061_v36  ;;  %v4105_v36 = vsel %vm637_vm1, %v11578_v55, 0 }
 0x8d9   : > { %v7846_v57 = vpop.eup %7845  ;;  %6942 = vmatmul.mubr.msk.bf16.gmra.mrb[84].mxu1 %vm1030_vm2, %v3700_v23  ;;  %v3684_v43 = vmul.f32 %v7844_v18, %v11577_v35 }
 0x8da   : > { %6964 = vmatpush3.bf16.xpose.msra.mxu1 %v4102_v45  ;;  %6969 = vmatprep.mubr.msk.bf16.mxu1 %vm637_vm1, %v11576_v52  ;;  %v3681_v61 = vmul.f32 %v7846_v57, %v10065_v11  ;;  %v11580_v11 = vld [vmem:[#allocation76_spill] sm:$0xff] }
 0x8db   : > { %7175 = vmatprep.subr.msk.bf16.mxu1 %vm637_vm1, %v11578_v55  ;;  %v3702_v46 = vpack.c.bf16 %v3684_v43, %v3683_v15  ;;  %v4108_v51 = vsel %vm637_vm1, %v11580_v11, 0 }
 0x8dc   : > { %v3701_v49 = vpack.c.bf16 %v3682_v22, %v3681_v61 }
 0x8de   : > { %6953 = vmatprep.mubr.msk.bf16.mxu0 %vm1030_vm2, %v3701_v49 }
 0x8df   : > { %6954 = vmatmul.mubr.msk.bf16.vlgmr.msra.gmra.mrb[128].mxu0 %vm1030_vm2, %v3702_v46 }
 0x8e0   : > { %6978 = vmatpush3.bf16.xpose.msra.mxu0 %v4204_v60 }
 0x8e1   : > { %7178 = vmatprep.subr.msk.bf16.mxu0 %vm637_vm1, %v11579_v3 }
 0x8e2   : > { %6966 = vmatpush3.bf16.xpose.msra.mxu1 %v4105_v36 }
 0x8e3   : > { %7176 = vmatprep.subr.msk.bf16.mxu1 %vm637_vm1, %v11580_v11 }
 0x8e8   : > { %6980 = vmatpush3.bf16.xpose.msra.mxu0 %v4207_v32 }
 0x8e9   : > { %7179 = vmatprep.subr.msk.bf16.mxu0 %vm637_vm1, %v11581_v63 }
 0x8ea   : > { %6968 = vmatpush3.bf16.xpose.msra.mxu1 %v4108_v51 }
 0x8eb   : > { %7181 = vmatprep.subr.msk.bf16.mxu1 %vm637_vm1, %v11582_v20 }
 0x8f0   : > { %6982 = vmatpush3.bf16.xpose.msra.mxu0 %v4210_v37 }
 0x8f1   : > { %6970 = vmatmul.mubr.msk.bf16.vlgmr.msra.gmra.mrb[88].mxu1 %vm637_vm1, %v11583_v13  ;;  %7180 = vmatprep.subr.msk.bf16.mxu0 %vm637_vm1, %v4190_v29 }
 0x8f2   : > { %6973 = vmatprep.mubr.msk.bf16.mxu1 %vm637_vm1, %v11584_v34  ;;  %6994 = vmatpush3.bf16.xpose.msra.mxu1 %v4309_v59 }
 0x8f8   : > { %6984 = vmatpush3.bf16.xpose.msra.mxu0 %v4213_v17 }
 0x8f9   : > { %6974 = vmatmul.mubr.msk.bf16.gmra.mrb[92].mxu1 %vm637_vm1, %v4077_v0 }
 0x901   : > { %v3615_v42 = vpop.xlane.xlu1 %3614 }
 0x902   : > { %7847 = vrcp.f32 %v3615_v42 }
 0x903   : > { %v3621_v41 = vpop.xlane.xlu0 %3620 }
 0x905   : > { %v3624_v5 = vpop.xlane.xlu1 %3623 }
 0x906   : > { %7849 = vrcp.f32 %v3624_v5 }
 0x907   : > { %7851 = vrcp.f32 %v3621_v41  ;;  %v3618_v38 = vpop.xlane.xlu0 %3617 }
 0x908   : > { %7853 = vrcp.f32 %v3618_v38 }
 0x909   : > { %v4176_v26 = vpop.permute.xlu1 %4175 }
 0x90b   : > { %v4291_v9 = vpop.permute.xlu0 %4290 }
 0x90c   : > { %7182 = vmatprep.subr.msk.bf16.mxu1 %vm637_vm1, %v4291_v9  ;;  %v4312_v12 = vsel %vm637_vm1, %v4291_v9, 0  ;;  %v7848_v48 = vpop.eup %7847 }
 0x90d   : > { %v4293_v56 = vpop.permute.xlu1 %4292  ;;  %6996 = vmatpush3.bf16.xpose.msra.mxu1 %v4312_v12  ;;  %v3685_v21 = vmul.f32 %v7848_v48, %v10079_v50 }
 0x90e   : > { %7183 = vmatprep.subr.msk.bf16.mxu1 %vm637_vm1, %v4293_v56  ;;  %v4315_v44 = vsel %vm637_vm1, %v4293_v56, 0 }
 0x90f   : > { %v4178_v4 = vpop.permute.xlu0 %4177 }
 0x910   : > { %v7850_v19 = vpop.eup %7849 }
 0x911   : > { %v7852_v28 = vpop.eup %7851  ;;  %v4180_v10 = vpop.permute.xlu1 %4179  ;;  %v3688_v31 = vmul.f32 %v7850_v19, %v10085_v6 }
 0x912   : > { %v7854_v2 = vpop.eup %7853  ;;  %v3687_v27 = vmul.f32 %v7852_v28, %v10081_v62 }
 0x913   : > { %v4394_v1 = vpop.permute.xlu0 %4393  ;;  %v3686_v14 = vmul.f32 %v7854_v2, %v10089_v16 }
 0x914   : > { %7185 = vmatprep.subr.msk.bf16.mxu0 %vm637_vm1, %v4394_v1  ;;  %v3704_v47 = vpack.c.bf16 %v3688_v31, %v3687_v27  ;;  %v4414_v53 = vsel %vm637_vm1, %v4394_v1, 0 }
 0x915   : > { %v4295_v7 = vpop.permute.xlu1 %4294  ;;  %6998 = vmatpush3.bf16.xpose.msra.mxu1 %v4315_v44  ;;  %v3703_v30 = vpack.c.bf16 %v3686_v14, %v3685_v21 }
 0x916   : > { %7184 = vmatprep.subr.msk.bf16.mxu1 %vm637_vm1, %v4295_v7  ;;  %v4318_v58 = vsel %vm637_vm1, %v4295_v7, 0 }
 0x917   : > { %6957 = vmatprep.mubr.msk.bf16.mxu0 %vm1030_vm2, %v3703_v30  ;;  %v4182_v6 = vpop.permute.xlu0 %4181 }
 0x918   : > { %6958 = vmatmul.mubr.msk.bf16.gmra.mrb[132].mxu0 %vm1030_vm2, %v3704_v47 }
 0x919   : > { %v4281_v50 = vpop.permute.xlu1 %4280  ;;  %6985 = vmatprep.mubr.msk.bf16.mxu0 %vm637_vm1, %v4176_v26 }
 0x91a   : > { %7001 = vmatprep.mubr.msk.bf16.mxu1 %vm637_vm1, %v4281_v50 }
 0x91b   : > { %v4396_v16 = vpop.permute.xlu0 %4395 }
 0x91c   : > { %v4417_v57 = vsel %vm637_vm1, %v4396_v16, 0 }
 0x91d   : > { %v4398_v62 = vpop.permute.xlu1 %4397  ;;  %7000 = vmatpush3.bf16.xpose.msra.mxu1 %v4318_v58 }
 0x91e   : > { %v4420_v61 = vsel %vm637_vm1, %v4398_v62, 0 }
 0x91f   : > { %v4283_v54 = vpop.permute.xlu0 %4282 }
 0x920   : > { %6986 = vmatmul.mubr.msk.bf16.vlgmr.msra.gmra.mrb[136].mxu0 %vm637_vm1, %v4178_v4 }
 0x921   : > { %7010 = vmatpush3.bf16.xpose.msra.mxu0 %v4414_v53  ;;  %v4287_v8 = vpop.permute.xlu1 %4286  ;;  %6989 = vmatprep.mubr.msk.bf16.mxu0 %vm637_vm1, %v4180_v10 }
 0x922   : > { %7186 = vmatprep.subr.msk.bf16.mxu0 %vm637_vm1, %v4396_v16 }
 0x923   : > { %v4285_v33 = vpop.permute.xlu0 %4284 }
 0x924   : > { %7002 = vmatmul.mubr.msk.bf16.vlgmr.msra.gmra.mrb[96].mxu1 %vm637_vm1, %v4283_v54 }
 0x925   : > { %7005 = vmatprep.mubr.msk.bf16.mxu1 %vm637_vm1, %v4285_v33  ;;  %v4386_v23 = vpop.permute.xlu1 %4385  ;;  %v10376_v33 = vld [vmem:[%s11325_s3 + $0xd0] sm:$0xff] }
 0x927   : > { %v4400_v18 = vpop.permute.xlu0 %4399 }
 0x928   : > { %6990 = vmatmul.mubr.msk.bf16.gmra.mrb[140].mxu0 %vm637_vm1, %v4182_v6  ;;  %v4423_v55 = vsel %vm637_vm1, %v4400_v18, 0 }
 0x929   : > { %7012 = vmatpush3.bf16.xpose.msra.mxu0 %v4417_v57  ;;  %7017 = vmatprep.mubr.msk.bf16.mxu0 %vm637_vm1, %v4386_v23  ;;  %v4390_v45 = vpop.permute.xlu1 %4389  ;;  %v10381_v23 = vld [vmem:[%s11325_s3 + $0xc0] sm:$0xff] }
 0x92a   : > { %7187 = vmatprep.subr.msk.bf16.mxu0 %vm637_vm1, %v4398_v62 }
 0x92b   : > { %v4388_v15 = vpop.permute.xlu0 %4387 }
 0x92c   : > { %7006 = vmatmul.mubr.msk.bf16.gmra.mrb[100].mxu1 %vm637_vm1, %v4287_v8 }
 0x92d   : > { %v4861_v22 = vpop.permute.xlu1 %4860 }
 0x92f   : > { %v4392_v52 = vpop.permute.xlu0 %4391 }
 0x931   : > { %7014 = vmatpush3.bf16.xpose.msra.mxu0 %v4420_v61  ;;  %v4948_v49 = vpop.permute.xlu1 %4947 }
 0x932   : > { %7188 = vmatprep.subr.msk.bf16.mxu0 %vm637_vm1, %v4400_v18 }
 0x933   : > { %v4859_v35 = vpop.permute.xlu0 %4858 }
 0x934   : > { %7025 = vmatprep.subr.bf16.mxu1 %v4859_v35 }
 0x935   : > { %7026 = vmatpush3.bf16.msra.mxu1 %v4859_v35  ;;  %v4950_v3 = vpop.permute.xlu1 %4949 }
 0x936   : > { %7027 = vmatprep.subr.bf16.mxu1 %v4861_v22 }
 0x937   : > { %v4863_v43 = vpop.permute.xlu0 %4862 }
 0x939   : > { %7016 = vmatpush3.bf16.xpose.msra.mxu0 %v4423_v55  ;;  %7028 = vmatpush3.bf16.msra.mxu1 %v4861_v22  ;;  %v4954_v11 = vpop.permute.xlu1 %4953 }
 0x93a   : > { %7041 = vmatprep.subr.bf16.mxu0 %v4948_v49  ;;  %7029 = vmatprep.subr.bf16.mxu1 %v4863_v43 }
 0x93b   : > { %v4865_v46 = vpop.permute.xlu0 %4864 }
 0x93d   : > { %7030 = vmatpush3.bf16.msra.mxu1 %v4863_v43 }
 0x93e   : > { %7031 = vmatprep.subr.bf16.mxu1 %v4865_v46 }
 0x93f   : > { %v4952_v60 = vpop.permute.xlu0 %4951 }
 0x940   : > { %7018 = vmatmul.mubr.msk.bf16.vlgmr.msra.gmra.mrb[144].mxu0 %vm637_vm1, %v4388_v15 }
 0x941   : > { %7021 = vmatprep.mubr.msk.bf16.mxu0 %vm637_vm1, %v4390_v45  ;;  %7042 = vmatpush3.bf16.msra.mxu0 %v4948_v49  ;;  %v10389_v45 = vld [vmem:[%s11325_s3 + $0xd8] sm:$0xff] }
 0x942   : > { %7032 = vmatpush3.bf16.msra.mxu1 %v4865_v46  ;;  %7043 = vmatprep.subr.bf16.mxu0 %v4950_v3 }
 0x943   : > { %v10285_v36 = vpop.permute.xlu0 %5036 }
 0x944   : > { %11585 = vst [vmem:[#allocation2_spill] sm:$0xff] %v10285_v36  ;;  %7057 = vmatprep.subr.bf16.mxu1 %v10285_v36 }
 0x945   : > { %7044 = vmatpush3.bf16.msra.mxu0 %v4950_v3  ;;  %v10414_v3 = vld [vmem:[%s11325_s3 + $0xf0] sm:$0xff] }
 0x946   : > { %7045 = vmatprep.subr.bf16.mxu0 %v4952_v60 }
 0x948   : > { %7022 = vmatmul.mubr.msk.bf16.gmra.mrb[148].mxu0 %vm637_vm1, %v4392_v52  ;;  %v10394_v52 = vld [vmem:[%s11325_s3 + $0xc8] sm:$0xff] }
 0x949   : > { %7046 = vmatpush3.bf16.msra.mxu0 %v4952_v60 }
 0x94a   : > { %7047 = vmatprep.subr.bf16.mxu0 %v4954_v11 }
 0x94d   : > { %7048 = vmatpush3.bf16.msra.mxu0 %v4954_v11 }
 0x95b   : > { %v10289_v32 = vpop.f32.mrb[72].mxu1 }
 0x95c   : > { %v10291_v63 = vpop.f32.mrb[73].mxu1 }
 0x95d   : > { %v10293_v51 = vpop.f32.mrb[74].mxu1 }
 0x95e   : > { %v10297_v37 = vpop.f32.mrb[75].mxu1 }
 0x988   : > { %v10301_v13 = vpop.f32.mrb[76].mxu1 }
 0x989   : > { %v10303_v59 = vpop.f32.mrb[77].mxu1 }
 0x98a   : > { %v10305_v34 = vpop.f32.mrb[78].mxu1 }
 0x98b   : > { %v10309_v0 = vpop.f32.mrb[79].mxu1 }
 0x994   : > { %v10313_v41 = vpop.f32.mrb[120].mxu0 }
 0x995   : > { %v10315_v5 = vpop.f32.mrb[121].mxu0 }
 0x996   : > { %v10317_v38 = vpop.f32.mrb[122].mxu0 }
 0x997   : > { %v10321_v9 = vpop.f32.mrb[123].mxu0 }
 0x99c   : > { %v10325_v56 = vpop.f32.mrb[124].mxu0 }
 0x99d   : > { %v10327_v48 = vpop.f32.mrb[125].mxu0 }
 0x99e   : > { %v10329_v4 = vpop.f32.mrb[126].mxu0 }
 0x99f   : > { %v10333_v28 = vpop.f32.mrb[127].mxu0 }
 0x9a4   : > { %v10337_v2 = vpop.f32.mrb[80].mxu1 }
 0x9a5   : > { %11586 = vst [vmem:[#allocation3_spill] sm:$0xff] %v10337_v2  ;;  %v10339_v31 = vpop.f32.mrb[81].mxu1 }
 0x9a6   : > { %11587 = vst [vmem:[#allocation4_spill] sm:$0xff] %v10339_v31  ;;  %v10341_v1 = vpop.f32.mrb[82].mxu1 }
 0x9a7   : > { %11588 = vst [vmem:[#allocation5_spill] sm:$0xff] %v10341_v1  ;;  %v10345_v14 = vpop.f32.mrb[83].mxu1 }
 0x9a8   : > { %11589 = vst [vmem:[#allocation70_spill] sm:$0xff] %v10345_v14 }
 0x9ac   : > { %v10349_v27 = vpop.f32.mrb[84].mxu1 }
 0x9ad   : > { %11590 = vst [vmem:[#allocation71_spill] sm:$0xff] %v10349_v27  ;;  %v10351_v7 = vpop.f32.mrb[85].mxu1 }
 0x9ae   : > { %11591 = vst [vmem:[#allocation72_spill] sm:$0xff] %v10351_v7  ;;  %v10353_v30 = vpop.f32.mrb[86].mxu1 }
 0x9af   : > { %11592 = vst [vmem:[#allocation74_spill] sm:$0xff] %v10353_v30  ;;  %v10357_v6 = vpop.f32.mrb[87].mxu1 }
 0x9b0   : > { %11593 = vst [vmem:[#allocation73_spill] sm:$0xff] %v10357_v6 }
 0x9b2   : > { %v10361_v16 = vpop.f32.mrb[128].mxu0 }
 0x9b3   : > { %11594 = vst [vmem:[#allocation78_spill] sm:$0xff] %v10361_v16  ;;  %v10363_v58 = vpop.f32.mrb[129].mxu0 }
 0x9b4   : > { %11595 = vst [vmem:[#allocation83_spill] sm:$0xff] %v10363_v58  ;;  %v10365_v62 = vpop.f32.mrb[130].mxu0 }
 0x9b5   : > { %11596 = vst [vmem:[#allocation75_spill] sm:$0xff] %v10365_v62  ;;  %v10369_v53 = vpop.f32.mrb[131].mxu0 }
 0x9b6   : > { %11597 = vst [vmem:[#allocation77_spill] sm:$0xff] %v10369_v53 }
 0x9c4   : > { %v6971_v18 = vpop.f32.mrb[88].mxu1 }
 0x9c5   : > { %v10384_v57 = vadd.f32 %v6971_v18, %v10376_v33  ;;  %v4144_v15 = vpop.f32.mrb[89].mxu1 }
 0x9c6   : > { %v10397_v61 = vadd.f32 %v10381_v23, %v4144_v15  ;;  %v6972_v22 = vpop.f32.mrb[90].mxu1  ;;  %v10421_v15 = vld [vmem:[%s11325_s3 + $0xe0] sm:$0xff] }
 0x9c7   : > { %v4147_v35 = vpop.f32.mrb[91].mxu1  ;;  %v4496_v43 = vsel %vm1030_vm2, %v10384_v57, -inf  ;;  %v10402_v55 = vadd.f32 %v6972_v22, %v10389_v45  ;;  %v10426_v22 = vld [vmem:[%s11325_s3 + $0xf8] sm:$0xff] }
 0x9c8   : > { %v10405_v49 = vadd.f32 %v10394_v52, %v4147_v35  ;;  %4497 = vmax.xlane.f32.xlu0 %v4496_v43  ;;  %v4490_v46 = vsel %vm1030_vm2, %v10397_v61, -inf }
 0x9c9   : > { %4491 = vmax.xlane.f32.xlu1 %v4490_v46  ;;  %v4499_v18 = vsel %vm1030_vm2, %v10402_v55, -inf }
 0x9ca   : > { %v4493_v60 = vsel %vm1030_vm2, %v10405_v49, -inf }
 0x9cc   : > { %4494 = vmax.xlane.f32.xlu0 %v4493_v60  ;;  %v6975_v11 = vpop.f32.mrb[92].mxu1  ;;  %v10434_v60 = vld [vmem:[%s11325_s3 + $0xe8] sm:$0xff] }
 0x9cd   : > { %v10429_v35 = vadd.f32 %v6975_v11, %v10414_v3  ;;  %4500 = vmax.xlane.f32.xlu1 %v4499_v18  ;;  %v4160_v43 = vpop.f32.mrb[93].mxu1 }
 0x9ce   : > { %v6976_v46 = vpop.f32.mrb[94].mxu1  ;;  %v10437_v8 = vadd.f32 %v10421_v15, %v4160_v43 }
 0x9cf   : > { %v10440_v54 = vadd.f32 %v6976_v46, %v10426_v22  ;;  %v4163_v50 = vpop.f32.mrb[95].mxu1  ;;  %v4508_v47 = vsel %vm1030_vm2, %v10429_v35, -inf }
 0x9d0   : > { %4509 = vmax.xlane.f32.xlu0 %v4508_v47  ;;  %v10445_v11 = vadd.f32 %v10434_v60, %v4163_v50  ;;  %v4502_v44 = vsel %vm1030_vm2, %v10437_v8, -inf }
 0x9d1   : > { %v4511_v18 = vsel %vm1030_vm2, %v10440_v54, -inf }
 0x9d2   : > { %4512 = vmax.xlane.f32.xlu1 %v4511_v18  ;;  %v4505_v43 = vsel %vm1030_vm2, %v10445_v11, -inf }
 0x9d4   : > { %4503 = vmax.xlane.f32.xlu0 %v4502_v44 }
 0x9d6   : > { %4506 = vmax.xlane.f32.xlu1 %v4505_v43 }
 0x9eb   : > { %v10453_v46 = vpop.f32.mrb[132].mxu0 }
 0x9ec   : > { %11598 = vst [vmem:[#allocation76_spill] sm:$0xff] %v10453_v46  ;;  %v10455_v21 = vpop.f32.mrb[133].mxu0 }
 0x9ed   : > { %11599 = vst [vmem:[#allocation80_spill] sm:$0xff] %v10455_v21  ;;  %v10457_v47 = vpop.f32.mrb[134].mxu0 }
 0x9ee   : > { %11600 = vst [vmem:[#allocation81_spill] sm:$0xff] %v10457_v47  ;;  %v10461_v19 = vpop.f32.mrb[135].mxu0 }
 0x9ef   : > { %11601 = vst [vmem:[#allocation79_spill] sm:$0xff] %v10461_v19 }
 0x9f3   : > { %v6987_v26 = vpop.f32.mrb[136].mxu0 }
 0x9f4   : > { %v10466_v44 = vadd.f32 %v6987_v26, %v10376_v33  ;;  %v4249_v10 = vpop.f32.mrb[137].mxu0 }
 0x9f5   : > { %v6988_v43 = vpop.f32.mrb[138].mxu0  ;;  %v10469_v17 = vadd.f32 %v10381_v23, %v4249_v10 }
 0x9f6   : > { %v10472_v12 = vadd.f32 %v6988_v43, %v10389_v45  ;;  %v4252_v20 = vpop.f32.mrb[139].mxu0  ;;  %v4520_v50 = vsel %vm1030_vm2, %v10466_v44, -inf }
 0x9f7   : > { %4521 = vmax.xlane.f32.xlu0 %v4520_v50  ;;  %v7003_v42 = vpop.f32.mrb[96].mxu1  ;;  %v10477_v18 = vadd.f32 %v10394_v52, %v4252_v20  ;;  %v4514_v43 = vsel %vm1030_vm2, %v10469_v17, -inf }
 0x9f8   : > { %v4354_v29 = vpop.f32.mrb[97].mxu1  ;;  %v4523_v26 = vsel %vm1030_vm2, %v10472_v12, -inf }
 0x9f9   : > { %4524 = vmax.xlane.f32.xlu1 %v4523_v26  ;;  %v7004_v21 = vpop.f32.mrb[98].mxu1  ;;  %v4517_v20 = vsel %vm1030_vm2, %v10477_v18, -inf  ;;  %v10512_v27 = vadd.f32 %v10381_v23, %v4354_v29 }
 0x9fa   : > { %v4357_v10 = vpop.f32.mrb[99].mxu1 }
 0x9fb   : > { %4515 = vmax.xlane.f32.xlu0 %v4514_v43  ;;  %v6991_v19 = vpop.f32.mrb[140].mxu0 }
 0x9fc   : > { %v10484_v46 = vadd.f32 %v6991_v19, %v10414_v3  ;;  %v4265_v50 = vpop.f32.mrb[141].mxu0 }
 0x9fd   : > { %4518 = vmax.xlane.f32.xlu1 %v4517_v20  ;;  %v6992_v47 = vpop.f32.mrb[142].mxu0  ;;  %v10489_v58 = vadd.f32 %v10421_v15, %v4265_v50  ;;  %v10502_v50 = vadd.f32 %v7003_v42, %v10376_v33  ;;  %v10517_v42 = vadd.f32 %v10394_v52, %v4357_v10 }
 0x9fe   : > { %v10492_v26 = vadd.f32 %v6992_v47, %v10426_v22  ;;  %v4268_v53 = vpop.f32.mrb[143].mxu0  ;;  %v4532_v43 = vsel %vm1030_vm2, %v10484_v46, -inf }
 0x9ff   : > { %4533 = vmax.xlane.f32.xlu0 %v4532_v43  ;;  %v7007_v16 = vpop.f32.mrb[100].mxu1  ;;  %v10497_v19 = vadd.f32 %v10434_v60, %v4268_v53  ;;  %v4526_v6 = vsel %vm1030_vm2, %v10489_v58, -inf  ;;  %v10507_v43 = vadd.f32 %v7004_v21, %v10389_v45 }
 0xa00   : > { %v4370_v62 = vpop.f32.mrb[101].mxu1  ;;  %v4535_v20 = vsel %vm1030_vm2, %v10492_v26, -inf  ;;  %v10522_v21 = vadd.f32 %v7007_v16, %v10414_v3 }
 0xa01   : > { %4536 = vmax.xlane.f32.xlu1 %v4535_v20  ;;  %v7008_v7 = vpop.f32.mrb[102].mxu1  ;;  %v4529_v53 = vsel %vm1030_vm2, %v10497_v19, -inf  ;;  %v4544_v20 = vsel %vm1030_vm2, %v10502_v50, -inf  ;;  %v10532_v10 = vadd.f32 %v10421_v15, %v4370_v62 }
 0xa02   : > { %v4373_v47 = vpop.f32.mrb[103].mxu1  ;;  %v10527_v29 = vadd.f32 %v7008_v7, %v10426_v22 }
 0xa03   : > { %4527 = vmax.xlane.f32.xlu0 %v4526_v6  ;;  %v4547_v6 = vsel %vm1030_vm2, %v10507_v43, -inf  ;;  %v10537_v16 = vadd.f32 %v10434_v60, %v4373_v47  ;;  %v4550_v7 = vsel %vm1030_vm2, %v10532_v10, -inf }
 0xa05   : > { %4530 = vmax.xlane.f32.xlu1 %v4529_v53  ;;  %v4538_v53 = vsel %vm1030_vm2, %v10512_v27, -inf  ;;  %v4553_v31 = vsel %vm1030_vm2, %v10537_v16, -inf }
 0xa07   : > { %4545 = vmax.xlane.f32.xlu0 %v4544_v20  ;;  %v4541_v20 = vsel %vm1030_vm2, %v10517_v42, -inf }
 0xa09   : > { %4548 = vmax.xlane.f32.xlu1 %v4547_v6  ;;  %v4556_v6 = vsel %vm1030_vm2, %v10522_v21, -inf }
 0xa0b   : > { %4539 = vmax.xlane.f32.xlu0 %v4538_v53  ;;  %v4559_v53 = vsel %vm1030_vm2, %v10527_v29, -inf }
 0xa0d   : > { %4542 = vmax.xlane.f32.xlu1 %v4541_v20 }
 0xa0f   : > { %4557 = vmax.xlane.f32.xlu0 %v4556_v6 }
 0xa11   : > { %4560 = vmax.xlane.f32.xlu1 %v4559_v53 }
 0xa13   : > { %v7019_v30 = vpop.f32.mrb[144].mxu0  ;;  %4551 = vmax.xlane.f32.xlu0 %v4550_v7 }
 0xa14   : > { %v10544_v20 = vadd.f32 %v7019_v30, %v10376_v33  ;;  %v4459_v62 = vpop.f32.mrb[145].mxu0 }
 0xa15   : > { %v7020_v6 = vpop.f32.mrb[146].mxu0  ;;  %4554 = vmax.xlane.f32.xlu1 %v4553_v31  ;;  %v10549_v47 = vadd.f32 %v10381_v23, %v4459_v62 }
 0xa16   : > { %v10552_v14 = vadd.f32 %v7020_v6, %v10389_v45  ;;  %v4462_v53 = vpop.f32.mrb[147].mxu0  ;;  %v4568_v2 = vsel %vm1030_vm2, %v10544_v20, -inf }
 0xa17   : > { %4569 = vmax.xlane.f32.xlu0 %v4568_v2  ;;  %v10557_v30 = vadd.f32 %v10394_v52, %v4462_v53  ;;  %v4562_v31 = vsel %vm1030_vm2, %v10549_v47, -inf }
 0xa18   : > { %v4571_v33 = vsel %vm1030_vm2, %v10552_v14, -inf }
 0xa19   : > { %4572 = vmax.xlane.f32.xlu1 %v4571_v33  ;;  %v4565_v62 = vsel %vm1030_vm2, %v10557_v30, -inf }
 0xa1b   : > { %v7023_v23 = vpop.f32.mrb[148].mxu0  ;;  %4563 = vmax.xlane.f32.xlu0 %v4562_v31 }
 0xa1c   : > { %v10564_v45 = vadd.f32 %v7023_v23, %v10414_v3  ;;  %v4475_v7 = vpop.f32.mrb[149].mxu0 }
 0xa1d   : > { %v7024_v2 = vpop.f32.mrb[150].mxu0  ;;  %4566 = vmax.xlane.f32.xlu1 %v4565_v62  ;;  %v10569_v52 = vadd.f32 %v10421_v15, %v4475_v7 }
 0xa1e   : > { %v10572_v6 = vadd.f32 %v7024_v2, %v10426_v22  ;;  %v4478_v53 = vpop.f32.mrb[151].mxu0  ;;  %v4580_v33 = vsel %vm1030_vm2, %v10564_v45, -inf  ;;  %v10589_v22 = vpop.permute.xlu1 %5038 }
 0xa1f   : > { %4581 = vmax.xlane.f32.xlu0 %v4580_v33  ;;  %v10577_v3 = vadd.f32 %v10434_v60, %v4478_v53  ;;  %v4574_v23 = vsel %vm1030_vm2, %v10569_v52, -inf  ;;  %11602 = vst [vmem:[#allocation82_spill] sm:$0xff] %v10589_v22  ;;  %v10591_v60 = vpop.permute.xlu0 %5040 }
 0xa20   : > { %v4583_v31 = vsel %vm1030_vm2, %v10572_v6, -inf  ;;  %11603 = vst [vmem:[#allocation84_spill] sm:$0xff] %v10591_v60 }
 0xa21   : > { %4584 = vmax.xlane.f32.xlu1 %v4583_v31  ;;  %v4577_v15 = vsel %vm1030_vm2, %v10577_v3, -inf }
 0xa22   : > { %v10593_v7 = vpop.permute.xlu1 %5042 }
 0xa23   : > { %4575 = vmax.xlane.f32.xlu0 %v4574_v23  ;;  %11604 = vst [vmem:[#allocation85_spill] sm:$0xff] %v10593_v7 }
 0xa25   : > { %4578 = vmax.xlane.f32.xlu1 %v4577_v15 }
 0xa36   : > { %5127 = vrot.lane.b32.xlu1 %v8179_v24, %s8001_s26 }
 0xa39   : > { %5125 = vrot.lane.b32.xlu0 %v8181_v25, %s8001_s26 }
 0xa55   : > { %v4498_v62 = vpop.xlane.xlu0 %4497 }
 0xa56   : > { %v4588_v2 = vsub.f32 %v10384_v57, %v4498_v62  ;;  %v4492_v53 = vpop.xlane.xlu1 %4491 }
 0xa57   : > { %v4586_v33 = vsub.f32 %v10397_v61, %v4492_v53 }
 0xa58   : > { %v4622_v31 = vmul.f32 1.442695, %v4588_v2 }
 0xa59   : > { %v4618_v23 = vmul.f32 1.442695, %v4586_v33  ;;  %v4495_v15 = vpop.xlane.xlu0 %4494 }
 0xa5a   : > { %7855 = vpow2.f32 %v4622_v31  ;;  %v4587_v24 = vsub.f32 %v10405_v49, %v4495_v15  ;;  %v4501_v1 = vpop.xlane.xlu1 %4500 }
 0xa5b   : > { %v4589_v25 = vsub.f32 %v10402_v55, %v4501_v1  ;;  %7857 = vpow2.f32 %v4618_v23 }
 0xa5c   : > { %v4620_v22 = vmul.f32 1.442695, %v4587_v24 }
 0xa5d   : > { %v4624_v60 = vmul.f32 1.442695, %v4589_v25  ;;  %v4510_v36 = vpop.xlane.xlu0 %4509 }
 0xa5e   : > { %v4592_v7 = vsub.f32 %v10429_v35, %v4510_v36 }
 0xa5f   : > { %7859 = vpow2.f32 %v4624_v60  ;;  %v4513_v57 = vpop.xlane.xlu1 %4512 }
 0xa60   : > { %v4630_v62 = vmul.f32 1.442695, %v4592_v7  ;;  %v4593_v61 = vsub.f32 %v10440_v54, %v4513_v57  ;;  %7861 = vpow2.f32 %v4620_v22 }
 0xa61   : > { %v4504_v2 = vpop.xlane.xlu0 %4503 }
 0xa62   : > { %7863 = vpow2.f32 %v4630_v62  ;;  %v4632_v53 = vmul.f32 1.442695, %v4593_v61  ;;  %v4590_v49 = vsub.f32 %v10437_v8, %v4504_v2 }
 0xa63   : > { %v4507_v33 = vpop.xlane.xlu1 %4506 }
 0xa64   : > { %v10602_v31 = vpop.eup %7855  ;;  %v4626_v1 = vmul.f32 1.442695, %v4590_v49  ;;  %v4591_v55 = vsub.f32 %v10445_v11, %v4507_v33  ;;  %7865 = vpow2.f32 %v4632_v53 }
 0xa65   : > { %v4688_v36 = vsel %vm1030_vm2, %v10602_v31, 0.0  ;;  %v10607_v35 = vpop.eup %7857 }
 0xa66   : > { %7867 = vpow2.f32 %v4626_v1  ;;  %v4628_v54 = vmul.f32 1.442695, %v4591_v55  ;;  %4689 = vadd.xlane.f32.xlu0 %v4688_v36  ;;  %v4682_v8 = vsel %vm1030_vm2, %v10607_v35, 0.0 }
 0xa68   : > { %7869 = vpow2.f32 %v4628_v54 }
 0xa69   : > { %v10609_v22 = vpop.eup %7859 }
 0xa6a   : > { %4683 = vadd.xlane.f32.xlu0 %v4682_v8  ;;  %v4691_v60 = vsel %vm1030_vm2, %v10609_v22, 0.0  ;;  %v10615_v11 = vpop.eup %7861 }
 0xa6b   : > { %4692 = vadd.xlane.f32.xlu1 %v4691_v60  ;;  %v4685_v15 = vsel %vm1030_vm2, %v10615_v11, 0.0 }
 0xa6c   : > { %v10617_v7 = vpop.eup %7863 }
 0xa6d   : > { %v4700_v23 = vsel %vm1030_vm2, %v10617_v7, 0.0 }
 0xa6e   : > { %4701 = vadd.xlane.f32.xlu0 %v4700_v23  ;;  %v10623_v24 = vpop.eup %7865 }
 0xa6f   : > { %4686 = vadd.xlane.f32.xlu1 %v4685_v15  ;;  %v4703_v62 = vsel %vm1030_vm2, %v10623_v24, 0.0 }
 0xa70   : > { %v10625_v25 = vpop.eup %7867 }
 0xa71   : > { %v4694_v57 = vsel %vm1030_vm2, %v10625_v25, 0.0 }
 0xa72   : > { %4695 = vadd.xlane.f32.xlu0 %v4694_v57  ;;  %v10631_v61 = vpop.eup %7869 }
 0xa73   : > { %4704 = vadd.xlane.f32.xlu1 %v4703_v62  ;;  %v4697_v2 = vsel %vm1030_vm2, %v10631_v61, 0.0 }
 0xa77   : > { %4698 = vadd.xlane.f32.xlu1 %v4697_v2 }
 0xa84   : > { %v4522_v53 = vpop.xlane.xlu0 %4521 }
 0xa85   : > { %v4596_v49 = vsub.f32 %v10466_v44, %v4522_v53 }
 0xa86   : > { %v4525_v33 = vpop.xlane.xlu1 %4524 }
 0xa87   : > { %v4638_v1 = vmul.f32 1.442695, %v4596_v49  ;;  %v4597_v55 = vsub.f32 %v10472_v12, %v4525_v33 }
 0xa88   : > { %v4516_v36 = vpop.xlane.xlu0 %4515 }
 0xa89   : > { %7871 = vpow2.f32 %v4638_v1  ;;  %v4594_v54 = vsub.f32 %v10469_v17, %v4516_v36  ;;  %v4640_v60 = vmul.f32 1.442695, %v4597_v55 }
 0xa8a   : > { %v4519_v8 = vpop.xlane.xlu1 %4518 }
 0xa8b   : > { %v4634_v23 = vmul.f32 1.442695, %v4594_v54  ;;  %v4595_v15 = vsub.f32 %v10477_v18, %v4519_v8 }
 0xa8c   : > { %v4534_v57 = vpop.xlane.xlu0 %4533 }
 0xa8d   : > { %7873 = vpow2.f32 %v4634_v23  ;;  %v4600_v62 = vsub.f32 %v10484_v46, %v4534_v57  ;;  %v4636_v44 = vmul.f32 1.442695, %v4595_v15 }
 0xa8e   : > { %v4537_v2 = vpop.xlane.xlu1 %4536  ;;  %7875 = vpow2.f32 %v4640_v60 }
 0xa8f   : > { %v4646_v53 = vmul.f32 1.442695, %v4600_v62  ;;  %v4601_v49 = vsub.f32 %v10492_v26, %v4537_v2 }
 0xa90   : > { %v4528_v12 = vpop.xlane.xlu0 %4527 }
 0xa91   : > { %7877 = vpow2.f32 %v4646_v53  ;;  %v4598_v33 = vsub.f32 %v10489_v58, %v4528_v12  ;;  %v4648_v17 = vmul.f32 1.442695, %v4601_v49 }
 0xa92   : > { %v4531_v1 = vpop.xlane.xlu1 %4530  ;;  %7879 = vpow2.f32 %v4636_v44 }
 0xa93   : > { %v10642_v55 = vpop.eup %7871  ;;  %v4642_v18 = vmul.f32 1.442695, %v4598_v33  ;;  %v4599_v36 = vsub.f32 %v10497_v19, %v4531_v1 }
 0xa94   : > { %v4546_v54 = vpop.xlane.xlu0 %4545  ;;  %v4712_v46 = vsel %vm1030_vm2, %v10642_v55, 0.0 }
 0xa95   : > { %7881 = vpow2.f32 %v4642_v18  ;;  %v4644_v8 = vmul.f32 1.442695, %v4599_v36  ;;  %v4604_v26 = vsub.f32 %v10502_v50, %v4546_v54  ;;  %4713 = vadd.xlane.f32.xlu1 %v4712_v46 }
 0xa96   : > { %7883 = vpow2.f32 %v4648_v17  ;;  %v4549_v60 = vpop.xlane.xlu1 %4548 }
 0xa97   : > { %v10648_v58 = vpop.eup %7873  ;;  %7885 = vpow2.f32 %v4644_v8  ;;  %v4654_v23 = vmul.f32 1.442695, %v4604_v26  ;;  %v4605_v50 = vsub.f32 %v10507_v43, %v4549_v60 }
 0xa98   : > { %v4540_v15 = vpop.xlane.xlu0 %4539  ;;  %v4706_v57 = vsel %vm1030_vm2, %v10648_v58, 0.0  ;;  %v10652_v19 = vpop.eup %7875 }
 0xa99   : > { %v4602_v62 = vsub.f32 %v10512_v27, %v4540_v15  ;;  %4707 = vadd.xlane.f32.xlu1 %v4706_v57  ;;  %7887 = vpow2.f32 %v4654_v23  ;;  %v4715_v33 = vsel %vm1030_vm2, %v10652_v19, 0.0  ;;  %v4656_v54 = vmul.f32 1.442695, %v4605_v50 }
 0xa9a   : > { %v4543_v2 = vpop.xlane.xlu1 %4542 }
 0xa9b   : > { %v10655_v44 = vpop.eup %7877  ;;  %v4650_v53 = vmul.f32 1.442695, %v4602_v62  ;;  %v4603_v49 = vsub.f32 %v10517_v42, %v4543_v2 }
 0xa9c   : > { %v4558_v12 = vpop.xlane.xlu0 %4557  ;;  %v4724_v17 = vsel %vm1030_vm2, %v10655_v44, 0.0  ;;  %v10663_v1 = vpop.eup %7879 }
 0xa9d   : > { %v4652_v27 = vmul.f32 1.442695, %v4603_v49  ;;  %v4608_v18 = vsub.f32 %v10522_v21, %v4558_v12  ;;  %4716 = vadd.xlane.f32.xlu1 %v4715_v33  ;;  %4725 = vadd.xlane.f32.xlu0 %v4724_v17  ;;  %7889 = vpow2.f32 %v4650_v53  ;;  %v4709_v60 = vsel %vm1030_vm2, %v10663_v1, 0.0 }
 0xa9e   : > { %v4561_v36 = vpop.xlane.xlu1 %4560 }
 0xa9f   : > { %v10666_v43 = vpop.eup %7881  ;;  %7891 = vpow2.f32 %v4652_v27  ;;  %v4662_v42 = vmul.f32 1.442695, %v4608_v18  ;;  %v4609_v46 = vsub.f32 %v10527_v29, %v4561_v36 }
 0xaa0   : > { %v10669_v8 = vpop.eup %7883  ;;  %v4552_v26 = vpop.xlane.xlu0 %4551  ;;  %v4718_v21 = vsel %vm1030_vm2, %v10666_v43, 0.0 }
 0xaa1   : > { %v10675_v23 = vpop.eup %7885  ;;  %7893 = vpow2.f32 %v4662_v42  ;;  %v4606_v15 = vsub.f32 %v10532_v10, %v4552_v26  ;;  %4710 = vadd.xlane.f32.xlu1 %v4709_v60  ;;  %4719 = vadd.xlane.f32.xlu0 %v4718_v21  ;;  %v4664_v62 = vmul.f32 1.442695, %v4609_v46  ;;  %v4727_v49 = vsel %vm1030_vm2, %v10669_v8, 0.0 }
 0xaa2   : > { %v4555_v57 = vpop.xlane.xlu1 %4554  ;;  %7895 = vpow2.f32 %v4656_v54  ;;  %v4721_v53 = vsel %vm1030_vm2, %v10675_v23, 0.0 }
 0xaa3   : > { %v4658_v29 = vmul.f32 1.442695, %v4606_v15  ;;  %v4607_v2 = vsub.f32 %v10537_v16, %v4555_v57  ;;  %v10683_v12 = vpop.eup %7887 }
 0xaa4   : > { %v4570_v50 = vpop.xlane.xlu0 %4569  ;;  %v4736_v54 = vsel %vm1030_vm2, %v10683_v12, 0.0 }
 0xaa5   : > { %7897 = vpow2.f32 %v4658_v29  ;;  %v4612_v10 = vsub.f32 %v10544_v20, %v4570_v50  ;;  %4722 = vadd.xlane.f32.xlu1 %v4721_v53  ;;  %4728 = vadd.xlane.f32.xlu0 %v4727_v49  ;;  %v4660_v17 = vmul.f32 1.442695, %v4607_v2 }
 0xaa6   : > { %v4573_v33 = vpop.xlane.xlu1 %4572  ;;  %7899 = vpow2.f32 %v4664_v62 }
 0xaa7   : > { %v4670_v27 = vmul.f32 1.442695, %v4612_v10  ;;  %v4613_v16 = vsub.f32 %v10552_v14, %v4573_v33  ;;  %v10687_v18 = vpop.eup %7889 }
 0xaa8   : > { %v4564_v36 = vpop.xlane.xlu0 %4563  ;;  %v4730_v62 = vsel %vm1030_vm2, %v10687_v18, 0.0 }
 0xaa9   : > { %v10691_v42 = vpop.eup %7891  ;;  %7901 = vpow2.f32 %v4670_v27  ;;  %v4610_v46 = vsub.f32 %v10549_v47, %v4564_v36  ;;  %4737 = vadd.xlane.f32.xlu0 %v4736_v54  ;;  %v4672_v14 = vmul.f32 1.442695, %v4613_v16 }
 0xaaa   : > { %v4567_v20 = vpop.xlane.xlu1 %4566  ;;  %v4733_v26 = vsel %vm1030_vm2, %v10691_v42, 0.0  ;;  %7903 = vpow2.f32 %v4660_v17 }
 0xaab   : > { %v10696_v60 = vpop.eup %7893  ;;  %v4666_v21 = vmul.f32 1.442695, %v4610_v46  ;;  %v4611_v15 = vsub.f32 %v10557_v30, %v4567_v20  ;;  %4734 = vadd.xlane.f32.xlu1 %v4733_v26 }
 0xaac   : > { %v4582_v57 = vpop.xlane.xlu0 %4581  ;;  %v10701_v29 = vpop.eup %7895  ;;  %v4748_v50 = vsel %vm1030_vm2, %v10696_v60, 0.0 }
 0xaad   : > { %7905 = vpow2.f32 %v4666_v21  ;;  %v4616_v47 = vsub.f32 %v10564_v45, %v4582_v57  ;;  %4731 = vadd.xlane.f32.xlu0 %v4730_v62  ;;  %v4668_v49 = vmul.f32 1.442695, %v4611_v15  ;;  %v4739_v17 = vsel %vm1030_vm2, %v10701_v29, 0.0 }
 0xaae   : > { %v4585_v2 = vpop.xlane.xlu1 %4584  ;;  %7907 = vpow2.f32 %v4672_v14 }
 0xaaf   : > { %v10706_v53 = vpop.eup %7897  ;;  %v4678_v30 = vmul.f32 1.442695, %v4616_v47  ;;  %v4617_v10 = vsub.f32 %v10572_v6, %v4585_v2  ;;  %4749 = vadd.xlane.f32.xlu1 %v4748_v50 }
 0xab0   : > { %v4576_v33 = vpop.xlane.xlu0 %4575  ;;  %v10711_v27 = vpop.eup %7899  ;;  %v4742_v36 = vsel %vm1030_vm2, %v10706_v53, 0.0 }
 0xab1   : > { %7909 = vpow2.f32 %v4678_v30  ;;  %v4614_v45 = vsub.f32 %v10569_v52, %v4576_v33  ;;  %4740 = vadd.xlane.f32.xlu0 %v4739_v17  ;;  %v4680_v46 = vmul.f32 1.442695, %v4617_v10  ;;  %v4751_v14 = vsel %vm1030_vm2, %v10711_v27, 0.0 }
 0xab2   : > { %v4579_v16 = vpop.xlane.xlu1 %4578  ;;  %7911 = vpow2.f32 %v4668_v49 }
 0xab3   : > { %v10716_v54 = vpop.eup %7901  ;;  %v4674_v6 = vmul.f32 1.442695, %v4614_v45  ;;  %v4615_v20 = vsub.f32 %v10577_v3, %v4579_v16  ;;  %4743 = vadd.xlane.f32.xlu1 %v4742_v36 }
 0xab4   : > { %v10719_v26 = vpop.permute.xlu0 %5125  ;;  %v10723_v21 = vpop.eup %7903  ;;  %v4760_v52 = vsel %vm1030_vm2, %v10716_v54, 0.0 }
 0xab5   : > { %7913 = vpow2.f32 %v4674_v6  ;;  %4752 = vadd.xlane.f32.xlu0 %v4751_v14  ;;  %7073 = vmatprep.subr.bf16.mxu0 %v10719_v26  ;;  %v4676_v57 = vmul.f32 1.442695, %v4615_v20  ;;  %v4745_v3 = vsel %vm1030_vm2, %v10723_v21, 0.0  ;;  %v11605_v6 = vld [vmem:[#allocation41_spill] sm:$0xff]  ;;  %v11606_v20 = vld [vmem:[#allocation7_spill] sm:$0xff] }
 0xab6   : > { %7915 = vpow2.f32 %v4680_v46  ;;  %v11607_v14 = vpack.i.bf16 %v11605_v6, %v11606_v20 }
 0xab7   : > { %v10728_v15 = vpop.eup %7905  ;;  %4761 = vadd.xlane.f32.xlu1 %v4760_v52  ;;  %7917 = vpow2.f32 %v4676_v57  ;;  %v11608_v52 = vpack.i.bf16 %v10297_v37, %v10291_v63  ;;  %v11609_v57 = vld [vmem:[#allocation48_spill] sm:$0xff]  ;;  %v11616_v63 = vpack.i.bf16 %v10293_v51, %v10289_v32  ;;  %v11618_v37 = vld [vmem:[#allocation45_spill] sm:$0xff]  ;;  %v11624_v32 = vpack.i.bf16 %v10305_v34, %v10301_v13 }
 0xab8   : > { %v10732_v62 = vpop.eup %7907  ;;  %v4754_v47 = vsel %vm1030_vm2, %v10728_v15, 0.0  ;;  %v11625_v51 = vld [vmem:[#allocation53_spill] sm:$0xff]  ;;  %v11632_v34 = vpack.i.bf16 %v10317_v38, %v10313_v41  ;;  %v11639_v41 = vpack.i.bf16 %v10329_v4, %v10325_v56 }
 0xab9   : > { %4746 = vadd.xlane.f32.xlu0 %v4745_v3  ;;  %v4763_v50 = vsel %vm1030_vm2, %v10732_v62, 0.0  ;;  %v11610_v3 = vld [vmem:[#allocation46_spill] sm:$0xff] }
 0xabb   : > { %v10736_v2 = vpop.eup %7909  ;;  %4755 = vadd.xlane.f32.xlu1 %v4754_v47  ;;  %v11611_v47 = vpack.i.bf16 %v11609_v57, %v11610_v3  ;;  %v11629_v57 = vld [vmem:[#allocation43_spill] sm:$0xff] }
 0xabc   : > { %v10740_v49 = vpop.eup %7911  ;;  %v4772_v30 = vsel %vm1030_vm2, %v10736_v2, 0.0 }
 0xabd   : > { %4764 = vadd.xlane.f32.xlu0 %v4763_v50  ;;  %v4757_v33 = vsel %vm1030_vm2, %v10740_v49, 0.0  ;;  %v11613_v50 = vld [vmem:[#allocation6_spill] sm:$0xff] }
 0xabf   : > { %v10744_v10 = vpop.eup %7913  ;;  %4773 = vadd.xlane.f32.xlu1 %v4772_v30 }
 0xac0   : > { %v10748_v17 = vpop.eup %7915  ;;  %v4766_v45 = vsel %vm1030_vm2, %v10744_v10, 0.0 }
 0xac1   : > { %4758 = vadd.xlane.f32.xlu0 %v4757_v33  ;;  %v4775_v16 = vsel %vm1030_vm2, %v10748_v17, 0.0  ;;  %v10754_v36 = vpop.eup %7917  ;;  %v11615_v33 = vpack.i.bf16 %v10309_v0, %v10303_v59  ;;  %v11623_v59 = vpack.i.bf16 %v10321_v9, %v10315_v5  ;;  %v11626_v0 = vld [vmem:[#allocation51_spill] sm:$0xff]  ;;  %v11631_v5 = vpack.i.bf16 %v10333_v28, %v10327_v48 }
 0xac2   : > { %v4769_v46 = vsel %vm1030_vm2, %v10754_v36, 0.0  ;;  %v11627_v20 = vpack.i.bf16 %v11625_v51, %v11626_v0 }
 0xac3   : > { %4767 = vadd.xlane.f32.xlu1 %v4766_v45 }
 0xac5   : > { %4776 = vadd.xlane.f32.xlu0 %v4775_v16  ;;  %v11620_v16 = vld [vmem:[#allocation44_spill] sm:$0xff] }
 0xac9   : > { %4770 = vadd.xlane.f32.xlu0 %v4769_v46  ;;  %v11621_v46 = vld [vmem:[#allocation42_spill] sm:$0xff] }
 0xaca   : > { %v11622_v6 = vpack.i.bf16 %v11620_v16, %v11621_v46  ;;  %v11641_v16 = vld [vmem:[#allocation54_spill] sm:$0xff] }
 0xad4   : > { %5129 = vrot.lane.b32.xlu1 %v8193_v39, %s8001_s26  ;;  %v11612_v39 = vld [vmem:[#allocation40_spill] sm:$0xff] }
 0xad5   : > { %v11614_v30 = vpack.i.bf16 %v11612_v39, %v11613_v50  ;;  %v11633_v39 = vld [vmem:[#allocation57_spill] sm:$0xff]  ;;  %v11634_v50 = vld [vmem:[#allocation55_spill] sm:$0xff] }
 0xad8   : > { %7212 = vrot.lane.b32.xlu1 %v11607_v14, %s8002_s19 }
 0xadc   : > { %7222 = vrot.lane.b32.xlu1 %v11608_v52, %s8003_s20  ;;  %v11628_v52 = vld [vmem:[#allocation47_spill] sm:$0xff] }
 0xadd   : > { %v11630_v3 = vpack.i.bf16 %v11628_v52, %v11629_v57 }
 0xadf   : > { %5131 = vrot.lane.b32.xlu0 %v11506_v40, %s8001_s26  ;;  %v11617_v40 = vld [vmem:[#allocation50_spill] sm:$0xff] }
 0xae0   : > { %7232 = vrot.lane.b32.xlu1 %v11611_v47, %s8002_s19  ;;  %v11619_v45 = vpack.i.bf16 %v11617_v40, %v11618_v37  ;;  %v10810_v47 = vpop.permute.xlu1 %5127  ;;  %v11637_v40 = vld [vmem:[#allocation49_spill] sm:$0xff] }
 0xae3   : > { %7217 = vrot.lane.b32.xlu0 %v11614_v30, %s8002_s19  ;;  %v11635_v30 = vpack.i.bf16 %v11633_v39, %v11634_v50  ;;  %v11644_v39 = vld [vmem:[#allocation82_spill] sm:$0xff] }
 0xae4   : > { %7242 = vrot.lane.b32.xlu1 %v11615_v33, %s8003_s20 }
 0xae7   : > { %7227 = vrot.lane.b32.xlu0 %v11616_v63, %s8003_s20  ;;  %v11636_v63 = vld [vmem:[#allocation52_spill] sm:$0xff] }
 0xae8   : > { %7252 = vrot.lane.b32.xlu1 %v11619_v45, %s8002_s19  ;;  %v11638_v48 = vpack.i.bf16 %v11636_v63, %v11637_v40  ;;  %v11640_v45 = vld [vmem:[#allocation56_spill] sm:$0xff]  ;;  %v11646_v63 = vld [vmem:[#allocation85_spill] sm:$0xff] }
 0xae9   : > { %v11642_v46 = vpack.i.bf16 %v11640_v45, %v11641_v16 }
 0xaeb   : > { %7237 = vrot.lane.b32.xlu0 %v11622_v6, %s8002_s19 }
 0xaec   : > { %7262 = vrot.lane.b32.xlu1 %v11623_v59, %s8003_s20 }
 0xaef   : > { %7247 = vrot.lane.b32.xlu0 %v11624_v32, %s8003_s20 }
 0xaf0   : > { %7272 = vrot.lane.b32.xlu1 %v11627_v20, %s8002_s19 }
 0xaf3   : > { %v4690_v14 = vpop.xlane.xlu0 %4689  ;;  %7257 = vrot.lane.b32.xlu0 %v11630_v3, %s8002_s19 }
 0xaf4   : > { %7282 = vrot.lane.b32.xlu1 %v11631_v5, %s8003_s20 }
 0xaf7   : > { %v4684_v13 = vpop.xlane.xlu0 %4683  ;;  %7267 = vrot.lane.b32.xlu0 %v11632_v34, %s8003_s20  ;;  %v11643_v34 = vld [vmem:[#allocation2_spill] sm:$0xff] }
 0xaf8   : > { %v4693_v9 = vpop.xlane.xlu1 %4692  ;;  %7292 = vrot.lane.b32.xlu1 %v11635_v30, %s8002_s19  ;;  %v11645_v30 = vld [vmem:[#allocation84_spill] sm:$0xff] }
 0xaf9   : > { %7919 = vrcp.f32 %v4693_v9 }
 0xafa   : > { %7921 = vrcp.f32 %v4684_v13 }
 0xafb   : > { %v4702_v33 = vpop.xlane.xlu0 %4701  ;;  %7277 = vrot.lane.b32.xlu0 %v11638_v48, %s8002_s19  ;;  %7923 = vrcp.f32 %v4690_v14 }
 0xafc   : > { %v4687_v28 = vpop.xlane.xlu1 %4686 }
 0xafd   : > { %7925 = vrcp.f32 %v4687_v28 }
 0xaff   : > { %7287 = vrot.lane.b32.xlu0 %v11639_v41, %s8003_s20  ;;  %v4696_v38 = vpop.xlane.xlu0 %4695 }
 0xb00   : > { %v4705_v37 = vpop.xlane.xlu1 %4704 }
 0xb01   : > { %7927 = vrcp.f32 %v4705_v37 }
 0xb02   : > { %7929 = vrcp.f32 %v4696_v38 }
 0xb03   : > { %7297 = vrot.lane.b32.xlu0 %v11642_v46, %s8002_s19  ;;  %v7920_v6 = vpop.eup %7919  ;;  %7931 = vrcp.f32 %v4702_v33 }
 0xb04   : > { %v4699_v59 = vpop.xlane.xlu1 %4698  ;;  %v7922_v32 = vpop.eup %7921  ;;  %v4813_v20 = vmul.f32 %v7920_v6, %v10609_v22 }
 0xb05   : > { %7933 = vrcp.f32 %v4699_v59  ;;  %v7924_v51 = vpop.eup %7923  ;;  %v4810_v56 = vmul.f32 %v7922_v32, %v10607_v35 }
 0xb06   : > { %v4812_v14 = vmul.f32 %v7924_v51, %v10602_v31 }
 0xb07   : > { %v7926_v0 = vpop.eup %7925 }
 0xb08   : > { %v4811_v4 = vmul.f32 %v7926_v0, %v10615_v11  ;;  %v4843_v57 = vpack.c.bf16 %v4813_v20, %v4812_v14 }
 0xb0a   : > { %v4842_v52 = vpack.c.bf16 %v4811_v4, %v4810_v56 }
 0xb0b   : > { %v7928_v3 = vpop.eup %7927 }
 0xb0c   : > { %7033 = vmatprep.mubr.msk.bf16.mxu1 %vm1030_vm2, %v4842_v52  ;;  %v7930_v5 = vpop.eup %7929  ;;  %v4817_v35 = vmul.f32 %v7928_v3, %v10623_v24 }
 0xb0d   : > { %7034 = vmatmul.mubr.msk.bf16.vlgmr.msra.gmra.mrb[104].mxu1 %vm1030_vm2, %v4843_v57  ;;  %v7932_v13 = vpop.eup %7931  ;;  %v4814_v22 = vmul.f32 %v7930_v5, %v10625_v25 }
 0xb0e   : > { %7058 = vmatpush3.bf16.msra.mxu1 %v11643_v34  ;;  %v4816_v11 = vmul.f32 %v7932_v13, %v10617_v7 }
 0xb0f   : > { %v7934_v9 = vpop.eup %7933  ;;  %7059 = vmatprep.subr.bf16.mxu1 %v11644_v39 }
 0xb10   : > { %v4815_v31 = vmul.f32 %v7934_v9, %v10631_v61  ;;  %v4845_v33 = vpack.c.bf16 %v4817_v35, %v4816_v11 }
 0xb12   : > { %7060 = vmatpush3.bf16.msra.mxu1 %v11644_v39  ;;  %v4844_v50 = vpack.c.bf16 %v4815_v31, %v4814_v22 }
 0xb13   : > { %7061 = vmatprep.subr.bf16.mxu1 %v11645_v30 }
 0xb14   : > { %7037 = vmatprep.mubr.msk.bf16.mxu1 %vm1030_vm2, %v4844_v50 }
 0xb15   : > { %7038 = vmatmul.mubr.msk.bf16.gmra.mrb[108].mxu1 %vm1030_vm2, %v4845_v33 }
 0xb16   : > { %7062 = vmatpush3.bf16.msra.mxu1 %v11645_v30 }
 0xb17   : > { %7063 = vmatprep.subr.bf16.mxu1 %v11646_v63 }
 0xb1a   : > { %7064 = vmatpush3.bf16.msra.mxu1 %v11646_v63 }
 0xb22   : > { %v4714_v24 = vpop.xlane.xlu1 %4713 }
 0xb26   : > { %v4708_v25 = vpop.xlane.xlu1 %4707 }
 0xb2a   : > { %v4717_v61 = vpop.xlane.xlu1 %4716  ;;  %v4726_v7 = vpop.xlane.xlu0 %4725 }
 0xb2b   : > { %7935 = vrcp.f32 %v4717_v61 }
 0xb2c   : > { %7937 = vrcp.f32 %v4708_v25 }
 0xb2d   : > { %7939 = vrcp.f32 %v4714_v24 }
 0xb2e   : > { %v4711_v40 = vpop.xlane.xlu1 %4710  ;;  %v4720_v48 = vpop.xlane.xlu0 %4719 }
 0xb2f   : > { %7941 = vrcp.f32 %v4711_v40 }
 0xb30   : > { %7943 = vrcp.f32 %v4720_v48 }
 0xb32   : > { %v4723_v28 = vpop.xlane.xlu1 %4722  ;;  %v4729_v41 = vpop.xlane.xlu0 %4728 }
 0xb33   : > { %7945 = vrcp.f32 %v4723_v28 }
 0xb34   : > { %7947 = vrcp.f32 %v4729_v41 }
 0xb35   : > { %v7936_v38 = vpop.eup %7935  ;;  %7949 = vrcp.f32 %v4726_v7 }
 0xb36   : > { %v4738_v37 = vpop.xlane.xlu0 %4737  ;;  %v7938_v45 = vpop.eup %7937  ;;  %v4821_v59 = vmul.f32 %v7936_v38, %v10652_v19 }
 0xb37   : > { %v7940_v16 = vpop.eup %7939  ;;  %v4818_v51 = vmul.f32 %v7938_v45, %v10648_v58 }
 0xb38   : > { %v4735_v46 = vpop.xlane.xlu1 %4734  ;;  %v4820_v56 = vmul.f32 %v7940_v16, %v10642_v55 }
 0xb39   : > { %v7942_v6 = vpop.eup %7941  ;;  %7951 = vrcp.f32 %v4735_v46 }
 0xb3a   : > { %v4732_v32 = vpop.xlane.xlu0 %4731  ;;  %v4819_v0 = vmul.f32 %v7942_v6, %v10663_v1  ;;  %v7944_v20 = vpop.eup %7943  ;;  %v4847_v57 = vpack.c.bf16 %v4821_v59, %v4820_v56 }
 0xb3b   : > { %7953 = vrcp.f32 %v4732_v32  ;;  %v4822_v19 = vmul.f32 %v7944_v20, %v10666_v43 }
 0xb3c   : > { %v4750_v4 = vpop.xlane.xlu1 %4749  ;;  %v4846_v14 = vpack.c.bf16 %v4819_v0, %v4818_v51  ;;  %7955 = vrcp.f32 %v4738_v37 }
 0xb3d   : > { %v7946_v52 = vpop.eup %7945 }
 0xb3e   : > { %v7948_v3 = vpop.eup %7947  ;;  %7049 = vmatprep.mubr.msk.bf16.mxu0 %vm1030_vm2, %v4846_v14  ;;  %v4741_v5 = vpop.xlane.xlu0 %4740  ;;  %v4823_v13 = vmul.f32 %v7946_v52, %v10675_v23 }
 0xb3f   : > { %7957 = vrcp.f32 %v4741_v5  ;;  %7050 = vmatmul.mubr.msk.bf16.vlgmr.msra.gmra.mrb[152].mxu0 %vm1030_vm2, %v4847_v57  ;;  %v7950_v58 = vpop.eup %7949  ;;  %v4825_v34 = vmul.f32 %v7948_v3, %v10669_v8 }
 0xb40   : > { %7074 = vmatpush3.bf16.msra.mxu0 %v10719_v26  ;;  %v4744_v55 = vpop.xlane.xlu1 %4743  ;;  %v4848_v1 = vpack.c.bf16 %v4823_v13, %v4822_v19  ;;  %v4824_v43 = vmul.f32 %v7950_v58, %v10655_v44 }
 0xb41   : > { %7075 = vmatprep.subr.bf16.mxu0 %v10810_v47 }
 0xb42   : > { %7053 = vmatprep.mubr.msk.bf16.mxu0 %vm1030_vm2, %v4848_v1  ;;  %v4753_v9 = vpop.xlane.xlu0 %4752  ;;  %v4849_v22 = vpack.c.bf16 %v4825_v34, %v4824_v43 }
 0xb43   : > { %v7952_v39 = vpop.eup %7951  ;;  %7959 = vrcp.f32 %v4753_v9 }
 0xb44   : > { %7076 = vmatpush3.bf16.msra.mxu0 %v10810_v47  ;;  %v4762_v23 = vpop.xlane.xlu1 %4761  ;;  %7961 = vrcp.f32 %v4744_v55  ;;  %v4827_v11 = vmul.f32 %v7952_v39, %v10691_v42 }
 0xb45   : > { %v7954_v35 = vpop.eup %7953  ;;  %7963 = vrcp.f32 %v4750_v4 }
 0xb46   : > { %v4747_v26 = vpop.xlane.xlu0 %4746  ;;  %v4826_v31 = vmul.f32 %v7954_v35, %v10687_v18  ;;  %v7956_v8 = vpop.eup %7955  ;;  %v11648_v35 = vld [vmem:[#allocation14_spill] sm:$0xff] }
 0xb47   : > { %7965 = vrcp.f32 %v4747_v26  ;;  %7054 = vmatmul.mubr.msk.bf16.gmra.mrb[156].mxu0 %vm1030_vm2, %v4849_v22  ;;  %v4828_v33 = vmul.f32 %v7956_v8, %v10683_v12 }
 0xb48   : > { %v4756_v50 = vpop.xlane.xlu1 %4755  ;;  %v4850_v30 = vpack.c.bf16 %v4827_v11, %v4826_v31 }
 0xb49   : > { %v7958_v44 = vpop.eup %7957 }
 0xb4a   : > { %v4829_v47 = vmul.f32 %v7958_v44, %v10701_v29  ;;  %7065 = vmatprep.mubr.msk.bf16.mxu1 %vm1030_vm2, %v4850_v30  ;;  %v4765_v63 = vpop.xlane.xlu0 %4764 }
 0xb4b   : > { %7967 = vrcp.f32 %v4765_v63 }
 0xb4c   : > { %v4851_v24 = vpack.c.bf16 %v4829_v47, %v4828_v33  ;;  %v4774_v25 = vpop.xlane.xlu1 %4773  ;;  %7969 = vrcp.f32 %v4756_v50  ;;  %v11649_v47 = vld [vmem:[#allocation16_spill] sm:$0xff] }
 0xb4d   : > { %v7960_v18 = vpop.eup %7959  ;;  %7971 = vrcp.f32 %v4762_v23 }
 0xb4e   : > { %7066 = vmatmul.mubr.msk.bf16.vlgmr.msra.gmra.mrb[112].mxu1 %vm1030_vm2, %v4851_v24  ;;  %v4759_v42 = vpop.xlane.xlu0 %4758  ;;  %v7962_v61 = vpop.eup %7961  ;;  %v4833_v12 = vmul.f32 %v7960_v18, %v10711_v27  ;;  %v11650_v24 = vld [vmem:[#allocation19_spill] sm:$0xff] }
 0xb4f   : > { %7973 = vrcp.f32 %v4759_v42  ;;  %v7964_v7 = vpop.eup %7963  ;;  %v4830_v28 = vmul.f32 %v7962_v61, %v10706_v53 }
 0xb50   : > { %v4768_v40 = vpop.xlane.xlu1 %4767  ;;  %v4832_v38 = vmul.f32 %v7964_v7, %v10696_v60  ;;  %v11651_v7 = vld [vmem:[#allocation23_spill] sm:$0xff] }
 0xb51   : > { %v7966_v48 = vpop.eup %7965 }
 0xb52   : > { %v4777_v29 = vpop.xlane.xlu0 %4776  ;;  %v4831_v41 = vmul.f32 %v7966_v48, %v10723_v21  ;;  %v4853_v16 = vpack.c.bf16 %v4833_v12, %v4832_v38  ;;  %v11652_v48 = vld [vmem:[#allocation21_spill] sm:$0xff] }
 0xb53   : > { %7975 = vrcp.f32 %v4777_v29 }
 0xb54   : > { %v5130_v37 = vpop.permute.xlu1 %5129  ;;  %v4852_v45 = vpack.c.bf16 %v4831_v41, %v4830_v28  ;;  %7977 = vrcp.f32 %v4768_v40 }
 0xb55   : > { %7077 = vmatprep.subr.bf16.mxu0 %v5130_v37  ;;  %v7968_v46 = vpop.eup %7967  ;;  %7979 = vrcp.f32 %v4774_v25 }
 0xb56   : > { %7069 = vmatprep.mubr.msk.bf16.mxu1 %vm1030_vm2, %v4852_v45  ;;  %7078 = vmatpush3.bf16.msra.mxu0 %v5130_v37  ;;  %v4771_v6 = vpop.xlane.xlu0 %4770  ;;  %v7970_v27 = vpop.eup %7969  ;;  %v4837_v59 = vmul.f32 %v7968_v46, %v10732_v62 }
 0xb57   : > { %7981 = vrcp.f32 %v4771_v6  ;;  %7070 = vmatmul.mubr.msk.bf16.gmra.mrb[116].mxu1 %vm1030_vm2, %v4853_v16  ;;  %v7972_v53 = vpop.eup %7971  ;;  %v4834_v51 = vmul.f32 %v7970_v27, %v10728_v15 }
 0xb58   : > { %v10882_v21 = vpop.permute.xlu1 %7212  ;;  %v4836_v20 = vmul.f32 %v7972_v53, %v10716_v54 }
 0xb59   : > { %v7974_v60 = vpop.eup %7973 }
 0xb5a   : > { %v5132_v32 = vpop.permute.xlu0 %5131  ;;  %v4835_v0 = vmul.f32 %v7974_v60, %v10740_v49  ;;  %v4855_v14 = vpack.c.bf16 %v4837_v59, %v4836_v20  ;;  %v11653_v59 = vld [vmem:[#allocation22_spill] sm:$0xff] }
 0xb5b   : > { %7079 = vmatprep.subr.bf16.mxu0 %v5132_v32 }
 0xb5c   : > { %v10888_v56 = vpop.permute.xlu1 %7222  ;;  %7080 = vmatpush3.bf16.msra.mxu0 %v5132_v32  ;;  %v4854_v4 = vpack.c.bf16 %v4835_v0, %v4834_v51  ;;  %v11654_v51 = vld [vmem:[#allocation18_spill] sm:$0xff] }
 0xb5d   : > { %v7976_v52 = vpop.eup %7975 }
 0xb5e   : > { %7081 = vmatprep.mubr.msk.bf16.mxu0 %vm1030_vm2, %v4854_v4  ;;  %v10891_v57 = vpop.permute.xlu0 %7217  ;;  %v7978_v3 = vpop.eup %7977  ;;  %v4841_v54 = vmul.f32 %v7976_v52, %v10748_v17 }
 0xb5f   : > { %7082 = vmatmul.mubr.msk.bf16.vlgmr.msra.gmra.mrb[160].mxu0 %vm1030_vm2, %v4855_v14  ;;  %v7980_v62 = vpop.eup %7979  ;;  %v4838_v19 = vmul.f32 %v7978_v3, %v10744_v10  ;;  %v11647_v10 = vld [vmem:[#allocation15_spill] sm:$0xff] }
 0xb60   : > { %v10894_v15 = vpop.permute.xlu1 %7232  ;;  %v4840_v58 = vmul.f32 %v7980_v62, %v10736_v2  ;;  %v7469_v62 = vld [vmem:[%s11326_s4] sm:$0xff]  }
 0xb61   : > { %v7982_v49 = vpop.eup %7981  ;;  %7089 = vmatprep.subr.bf16.mxu1 %v7469_v62 }
 0xb62   : > { %v10897_v5 = vpop.permute.xlu0 %7227  ;;  %v4839_v13 = vmul.f32 %v7982_v49, %v10754_v36  ;;  %v4857_v34 = vpack.c.bf16 %v4841_v54, %v4840_v58  ;;  %7090 = vmatpush3.bf16.msra.mxu1 %v7469_v62  ;;  %v7470_v49 = vld [vmem:[%s11326_s4 + $0x8] sm:$0xff]  }
 0xb63   : > { %7091 = vmatprep.subr.bf16.mxu1 %v7470_v49 }
 0xb64   : > { %v10902_v55 = vpop.permute.xlu1 %7242  ;;  %v4856_v1 = vpack.c.bf16 %v4839_v13, %v4838_v19 }
 0xb66   : > { %7085 = vmatprep.mubr.msk.bf16.mxu0 %vm1030_vm2, %v4856_v1  ;;  %v10905_v9 = vpop.permute.xlu0 %7237  ;;  %7092 = vmatpush3.bf16.msra.mxu1 %v7470_v49 }
 0xb67   : > { %7086 = vmatmul.mubr.msk.bf16.gmra.mrb[164].mxu0 %vm1030_vm2, %v4857_v34 }
 0xb68   : > { %v7253_v39 = vpop.permute.xlu1 %7252 }
 0xb69   : > { %v7255_v17 = vunpack.i.h.bf16 %v7253_v39  ;;  %v7254_v43 = vunpack.i.l.bf16 %v7253_v39 }
 0xb6a   : > { %v10908_v23 = vpop.permute.xlu0 %7247 }
 0xb6b   : > { %v5607_v36 = vsel %vm637_vm1, %v11647_v10, %v7255_v17  ;;  %v5606_v2 = vsel %vm637_vm1, %v11648_v35, %v7254_v43  ;;  %v11655_v17 = vld [vmem:[#allocation5_spill] sm:$0xff]  ;;  %v11656_v43 = vld [vmem:[#allocation3_spill] sm:$0xff]  ;;  %v11658_v35 = vld [vmem:[#allocation70_spill] sm:$0xff] }
 0xb6c   : > { %v7263_v22 = vpop.permute.xlu1 %7262  ;;  %v11657_v10 = vpack.i.bf16 %v11655_v17, %v11656_v43  ;;  %v11679_v17 = vld [vmem:[#allocation75_spill] sm:$0xff]  ;;  %v11680_v43 = vld [vmem:[#allocation78_spill] sm:$0xff] }
 0xb6d   : > { %v7265_v26 = vunpack.i.h.bf16 %v7263_v22  ;;  %v7264_v31 = vunpack.i.l.bf16 %v7263_v22 }
 0xb6e   : > { %v7258_v11 = vpop.permute.xlu0 %7257 }
 0xb6f   : > { %v10915_v8 = vsel %vm5630_vm3, %v5606_v2, %v7264_v31  ;;  %v10918_v50 = vsel %vm5630_vm3, %v5607_v36, %v7265_v26  ;;  %v7260_v30 = vunpack.i.h.bf16 %v7258_v11  ;;  %v7259_v44 = vunpack.i.l.bf16 %v7258_v11  ;;  %v11659_v2 = vld [vmem:[#allocation4_spill] sm:$0xff] }
 0xb70   : > { %v7273_v33 = vpop.permute.xlu1 %7272  ;;  %v11660_v22 = vpack.i.bf16 %v11658_v35, %v11659_v2  ;;  %v11682_v35 = vld [vmem:[#allocation77_spill] sm:$0xff]  ;;  %v11683_v2 = vld [vmem:[#allocation83_spill] sm:$0xff] }
 0xb71   : > { %v5609_v63 = vsel %vm637_vm1, %v11649_v47, %v7260_v30  ;;  %v5608_v25 = vsel %vm637_vm1, %v11650_v24, %v7259_v44  ;;  %v7275_v18 = vunpack.i.h.bf16 %v7273_v33  ;;  %v7274_v42 = vunpack.i.l.bf16 %v7273_v33  ;;  %v11661_v44 = vld [vmem:[#allocation60_spill] sm:$0xff]  ;;  %v11662_v33 = vld [vmem:[#allocation58_spill] sm:$0xff]  ;;  %v11665_v24 = vld [vmem:[#allocation59_spill] sm:$0xff] }
 0xb72   : > { %v7268_v61 = vpop.permute.xlu0 %7267  ;;  %v11663_v47 = vpack.i.bf16 %v11661_v44, %v11662_v33  ;;  %v11685_v33 = vld [vmem:[#allocation68_spill] sm:$0xff] }
 0xb73   : > { %v5611_v40 = vsel %vm637_vm1, %v11651_v7, %v7275_v18  ;;  %v5610_v12 = vsel %vm637_vm1, %v11652_v48, %v7274_v42  ;;  %v7270_v29 = vunpack.i.h.bf16 %v7268_v61  ;;  %v7269_v28 = vunpack.i.l.bf16 %v7268_v61 }
 0xb74   : > { %v7283_v41 = vpop.permute.xlu1 %7282 }
 0xb75   : > { %v10929_v38 = vsel %vm5630_vm3, %v5608_v25, %v7269_v28  ;;  %v10932_v37 = vsel %vm5630_vm3, %v5609_v63, %v7270_v29  ;;  %v7285_v45 = vunpack.i.h.bf16 %v7283_v41  ;;  %v7284_v16 = vunpack.i.l.bf16 %v7283_v41  ;;  %v11664_v63 = vld [vmem:[#allocation61_spill] sm:$0xff]  ;;  %v11667_v29 = vld [vmem:[#allocation74_spill] sm:$0xff]  ;;  %v11668_v28 = vld [vmem:[#allocation71_spill] sm:$0xff] }
 0xb76   : > { %v7278_v46 = vpop.permute.xlu0 %7277  ;;  %v11666_v25 = vpack.i.bf16 %v11664_v63, %v11665_v24  ;;  %v11669_v41 = vpack.i.bf16 %v11667_v29, %v11668_v28  ;;  %v11691_v29 = vld [vmem:[#allocation81_spill] sm:$0xff]  ;;  %v11692_v28 = vld [vmem:[#allocation76_spill] sm:$0xff] }
 0xb77   : > { %v10935_v6 = vsel %vm5630_vm3, %v5610_v12, %v7284_v16  ;;  %v10938_v27 = vsel %vm5630_vm3, %v5611_v40, %v7285_v45  ;;  %v7280_v53 = vunpack.i.h.bf16 %v7278_v46  ;;  %v7279_v60 = vunpack.i.l.bf16 %v7278_v46  ;;  %v11670_v16 = vld [vmem:[#allocation73_spill] sm:$0xff]  ;;  %v11671_v46 = vld [vmem:[#allocation72_spill] sm:$0xff] }
 0xb79   : > { %v5613_v32 = vsel %vm637_vm1, %v11653_v59, %v7280_v53  ;;  %v5612_v0 = vsel %vm637_vm1, %v11654_v51, %v7279_v60  ;;  %v11672_v53 = vpack.i.bf16 %v11670_v16, %v11671_v46  ;;  %v11694_v16 = vld [vmem:[#allocation79_spill] sm:$0xff]  ;;  %v11695_v46 = vld [vmem:[#allocation80_spill] sm:$0xff] }
 0xb7a   : > { %v7288_v20 = vpop.permute.xlu0 %7287 }
 0xb7b   : > { %v7290_v4 = vunpack.i.h.bf16 %v7288_v20  ;;  %v7289_v14 = vunpack.i.l.bf16 %v7288_v20 }
 0xb7d   : > { %v10945_v52 = vsel %vm5630_vm3, %v5612_v0, %v7289_v14  ;;  %v10948_v3 = vsel %vm5630_vm3, %v5613_v32, %v7290_v4  ;;  %v11673_v4 = vld [vmem:[#allocation64_spill] sm:$0xff]  ;;  %v11674_v14 = vld [vmem:[#allocation62_spill] sm:$0xff] }
 0xb7e   : > { %v11675_v62 = vpack.i.bf16 %v11673_v4, %v11674_v14  ;;  %v7224_v4 = vunpack.i.l.bf16 %v10888_v56  ;;  %v11031_v14 = vpop.permute.xlu0 %7297 }
 0xbe0   : > { %v7035_v54 = vpop.f32.mrb[104].mxu1 }
 0xbe1   : > { %v4916_v19 = vpop.f32.mrb[105].mxu1 }
 0xbe2   : > { %v7036_v13 = vpop.f32.mrb[106].mxu1 }
 0xbe3   : > { %v7301_v58 = vpack.i.bf16 %v7036_v13, %v7035_v54  ;;  %v4919_v1 = vpop.f32.mrb[107].mxu1  ;;  %v11677_v13 = vld [vmem:[#allocation63_spill] sm:$0xff] }
 0xbe4   : > { %v7306_v34 = vpack.i.bf16 %v4919_v1, %v4916_v19  ;;  %v11676_v19 = vld [vmem:[#allocation65_spill] sm:$0xff] }
 0xbe5   : > { %7302 = vrot.lane.b32.xlu0 %v7301_v58, %s8004_s27  ;;  %v11678_v58 = vpack.i.bf16 %v11676_v19, %v11677_v13  ;;  %v7230_v19 = vunpack.i.h.bf16 %v10897_v5  ;;  %v7229_v13 = vunpack.i.l.bf16 %v10897_v5 }
 0xbe6   : > { %7307 = vrot.lane.b32.xlu1 %v7306_v34, %s8004_s27 }
 0xbe8   : > { %v7039_v39 = vpop.f32.mrb[108].mxu1 }
 0xbe9   : > { %7317 = vrot.lane.b32.xlu0 %v11657_v10, %s8003_s20  ;;  %v4932_v36 = vpop.f32.mrb[109].mxu1  ;;  %v11681_v10 = vpack.i.bf16 %v11679_v17, %v11680_v43 }
 0xbea   : > { %7312 = vrot.lane.b32.xlu1 %v11660_v22, %s8003_s20  ;;  %v7040_v26 = vpop.f32.mrb[110].mxu1  ;;  %v11684_v22 = vpack.i.bf16 %v11682_v35, %v11683_v2 }
 0xbeb   : > { %v7321_v31 = vpack.i.bf16 %v7040_v26, %v7039_v39  ;;  %v4935_v11 = vpop.f32.mrb[111].mxu1 }
 0xbec   : > { %v7326_v30 = vpack.i.bf16 %v4935_v11, %v4932_v36 }
 0xbed   : > { %7322 = vrot.lane.b32.xlu0 %v7321_v31, %s8004_s27 }
 0xbee   : > { %7327 = vrot.lane.b32.xlu1 %v7326_v30, %s8004_s27 }
 0xbf1   : > { %7337 = vrot.lane.b32.xlu0 %v11663_v47, %s8002_s19  ;;  %v11686_v47 = vld [vmem:[#allocation66_spill] sm:$0xff] }
 0xbf2   : > { %7332 = vrot.lane.b32.xlu1 %v11666_v25, %s8002_s19  ;;  %v11687_v63 = vpack.i.bf16 %v11685_v33, %v11686_v47  ;;  %v11688_v25 = vld [vmem:[#allocation69_spill] sm:$0xff] }
 0xc12   : > { %v7051_v18 = vpop.f32.mrb[152].mxu0 }
 0xc13   : > { %v5005_v42 = vpop.f32.mrb[153].mxu0 }
 0xc14   : > { %v7052_v61 = vpop.f32.mrb[154].mxu0 }
 0xc15   : > { %v7341_v7 = vpack.i.bf16 %v7052_v61, %v7051_v18  ;;  %v5008_v40 = vpop.f32.mrb[155].mxu0  ;;  %v11689_v18 = vld [vmem:[#allocation67_spill] sm:$0xff] }
 0xc16   : > { %v7346_v48 = vpack.i.bf16 %v5008_v40, %v5005_v42  ;;  %v11690_v42 = vpack.i.bf16 %v11688_v25, %v11689_v18 }
 0xc17   : > { %7342 = vrot.lane.b32.xlu0 %v7341_v7, %s8004_s27 }
 0xc18   : > { %7347 = vrot.lane.b32.xlu1 %v7346_v48, %s8004_s27 }
 0xc1a   : > { %v7055_v12 = vpop.f32.mrb[156].mxu0 }
 0xc1b   : > { %7357 = vrot.lane.b32.xlu0 %v11669_v41, %s8003_s20  ;;  %v5021_v45 = vpop.f32.mrb[157].mxu0  ;;  %v11693_v41 = vpack.i.bf16 %v11691_v29, %v11692_v28  ;;  %v7249_v29 = vunpack.i.l.bf16 %v10908_v23  ;;  %v7244_v28 = vunpack.i.l.bf16 %v10902_v55 }
 0xc1c   : > { %7352 = vrot.lane.b32.xlu1 %v11672_v53, %s8003_s20  ;;  %v7056_v60 = vpop.f32.mrb[158].mxu0  ;;  %v11696_v53 = vpack.i.bf16 %v11694_v16, %v11695_v46  ;;  %v11702_v16 = vld [vmem:[#allocation17_spill] sm:$0xff] }
 0xc1d   : > { %v7361_v59 = vpack.i.bf16 %v7056_v60, %v7055_v12  ;;  %v5024_v32 = vpop.f32.mrb[159].mxu0 }
 0xc1e   : > { %v7366_v51 = vpack.i.bf16 %v5024_v32, %v5021_v45 }
 0xc1f   : > { %7362 = vrot.lane.b32.xlu0 %v7361_v59, %s8004_s27 }
 0xc20   : > { %7367 = vrot.lane.b32.xlu1 %v7366_v51, %s8004_s27 }
 0xc21   : > { %v7067_v0 = vpop.f32.mrb[112].mxu1 }
 0xc22   : > { %v5094_v20 = vpop.f32.mrb[113].mxu1 }
 0xc23   : > { %7377 = vrot.lane.b32.xlu0 %v11675_v62, %s8002_s19  ;;  %v7068_v49 = vpop.f32.mrb[114].mxu1  ;;  %v7220_v62 = vunpack.i.h.bf16 %v10891_v57 }
 0xc24   : > { %v7381_v54 = vpack.i.bf16 %v7068_v49, %v7067_v0  ;;  %7372 = vrot.lane.b32.xlu1 %v11678_v58, %s8002_s19  ;;  %v5097_v1 = vpop.f32.mrb[115].mxu1  ;;  %v7214_v0 = vunpack.i.l.bf16 %v10882_v21  ;;  %v7219_v49 = vunpack.i.l.bf16 %v10891_v57  ;;  %v11697_v58 = vld [vmem:[#allocation9_spill] sm:$0xff] }
 0xc25   : > { %v7386_v34 = vpack.i.bf16 %v5097_v1, %v5094_v20  ;;  %v7215_v20 = vunpack.i.h.bf16 %v10882_v21  ;;  %v11698_v21 = vld [vmem:[#allocation20_spill] sm:$0xff] }
 0xc26   : > { %v5598_v1 = vsel %vm637_vm1, %v11697_v58, %v7214_v0 }
 0xc27   : > { %7382 = vrot.lane.b32.xlu0 %v7381_v54, %s8004_s27  ;;  %v11035_v54 = vpop.permute.xlu1 %7292  ;;  %v5631_v17 = vsel %vm5630_vm3, %v5598_v1, %v7224_v4 }
 0xc28   : > { %7387 = vrot.lane.b32.xlu1 %v7386_v34, %s8004_s27  ;;  %v7225_v34 = vunpack.i.h.bf16 %v10888_v56 }
 0xc2a   : > { %v7071_v39 = vpop.f32.mrb[116].mxu1 }
 0xc2b   : > { %7397 = vrot.lane.b32.xlu0 %v11681_v10, %s8003_s20  ;;  %v5110_v36 = vpop.f32.mrb[117].mxu1  ;;  %v11699_v10 = vld [vmem:[#allocation11_spill] sm:$0xff] }
 0xc2c   : > { %7392 = vrot.lane.b32.xlu1 %v11684_v22, %s8003_s20  ;;  %v7072_v26 = vpop.f32.mrb[118].mxu1  ;;  %v5601_v57 = vsel %vm637_vm1, %v11699_v10, %v7220_v62 }
 0xc2d   : > { %v7401_v31 = vpack.i.bf16 %v7072_v26, %v7071_v39  ;;  %v5113_v11 = vpop.f32.mrb[119].mxu1  ;;  %v5599_v39 = vsel %vm637_vm1, %v11698_v21, %v7215_v20  ;;  %v5634_v56 = vsel %vm5630_vm3, %v5601_v57, %v7230_v19 }
 0xc2e   : > { %v7406_v30 = vpack.i.bf16 %v5113_v11, %v5110_v36  ;;  %v11700_v36 = vld [vmem:[#allocation8_spill] sm:$0xff] }
 0xc2f   : > { %7402 = vrot.lane.b32.xlu0 %v7401_v31, %s8004_s27  ;;  %v5600_v35 = vsel %vm637_vm1, %v11700_v36, %v7219_v49 }
 0xc30   : > { %7407 = vrot.lane.b32.xlu1 %v7406_v30, %s8004_s27  ;;  %v5633_v26 = vsel %vm5630_vm3, %v5600_v35, %v7229_v13  ;;  %v5632_v30 = vsel %vm5630_vm3, %v5599_v39, %v7225_v34 }
 0xc32   : > { %v7083_v44 = vpop.f32.mrb[160].mxu0 }
 0xc33   : > { %7417 = vrot.lane.b32.xlu0 %v11687_v63, %s8002_s19  ;;  %v5183_v24 = vpop.f32.mrb[161].mxu0  ;;  %v7234_v63 = vunpack.i.l.bf16 %v10894_v15 }
 0xc34   : > { %7412 = vrot.lane.b32.xlu1 %v11690_v42, %s8002_s19  ;;  %v7084_v61 = vpop.f32.mrb[162].mxu0 }
 0xc35   : > { %v7421_v7 = vpack.i.bf16 %v7084_v61, %v7083_v44  ;;  %v5186_v40 = vpop.f32.mrb[163].mxu0  ;;  %v7235_v44 = vunpack.i.h.bf16 %v10894_v15  ;;  %v7240_v61 = vunpack.i.h.bf16 %v10905_v9  ;;  %v7245_v15 = vunpack.i.h.bf16 %v10902_v55 }
 0xc36   : > { %v7426_v48 = vpack.i.bf16 %v5186_v40, %v5183_v24  ;;  %v5602_v46 = vsel %vm637_vm1, %v11702_v16, %v7234_v63  ;;  %v11705_v16 = vld [vmem:[#allocation24_spill] sm:$0xff] }
 0xc37   : > { %7422 = vrot.lane.b32.xlu0 %v7421_v7, %s8004_s27  ;;  %v7239_v7 = vunpack.i.l.bf16 %v10905_v9  ;;  %v5635_v49 = vsel %vm5630_vm3, %v5602_v46, %v7244_v28 }
 0xc38   : > { %7427 = vrot.lane.b32.xlu1 %v7426_v48, %s8004_s27 }
 0xc3a   : > { %v7087_v12 = vpop.f32.mrb[164].mxu0 }
 0xc3b   : > { %7437 = vrot.lane.b32.xlu0 %v11693_v41, %s8003_s20  ;;  %v5199_v45 = vpop.f32.mrb[165].mxu0  ;;  %v11701_v41 = vld [vmem:[#allocation13_spill] sm:$0xff] }
 0xc3c   : > { %7432 = vrot.lane.b32.xlu1 %v11696_v53, %s8003_s20  ;;  %v7088_v60 = vpop.f32.mrb[166].mxu0  ;;  %v11703_v53 = vld [vmem:[#allocation10_spill] sm:$0xff] }
 0xc3d   : > { %v7446_v59 = vpack.i.bf16 %v7088_v60, %v7087_v12  ;;  %v5202_v32 = vpop.f32.mrb[167].mxu0  ;;  %v7250_v12 = vunpack.i.h.bf16 %v10908_v23  ;;  %v5605_v60 = vsel %vm637_vm1, %v11703_v53, %v7240_v61  ;;  %v7299_v61 = vunpack.i.l.bf16 %v11031_v14 }
 0xc3e   : > { %v7441_v51 = vpack.i.bf16 %v5202_v32, %v5199_v45  ;;  %v5603_v45 = vsel %vm637_vm1, %v11701_v41, %v7235_v44 }
 0xc3f   : > { %7447 = vrot.lane.b32.xlu0 %v7446_v59, %s8004_s27  ;;  %v11704_v59 = vld [vmem:[#allocation12_spill] sm:$0xff]  ;;  %v5638_v20 = vsel %vm5630_vm3, %v5605_v60, %v7250_v12  ;;  %v5636_v19 = vsel %vm5630_vm3, %v5603_v45, %v7245_v15  ;;  %v5616_v46 = vsel %vm637_vm1, %v11705_v16, %v7299_v61  ;;  %v11708_v60 = vld [vmem:[#allocation26_spill] sm:$0xff] }
 0xc40   : > { %7442 = vrot.lane.b32.xlu1 %v7441_v51, %s8004_s27  ;;  %v5604_v23 = vsel %vm637_vm1, %v11704_v59, %v7239_v7 }
 0xc41   : > { %v5637_v0 = vsel %vm5630_vm3, %v5604_v23, %v7249_v29 }
 0xc57   : > { %v7303_v43 = vpop.permute.xlu0 %7302 }
 0xc58   : > { %v7305_v2 = vunpack.i.h.bf16 %v7303_v43  ;;  %v7304_v5 = vunpack.i.l.bf16 %v7303_v43  ;;  %v7308_v22 = vpop.permute.xlu1 %7307 }
 0xc59   : > { %v7310_v31 = vunpack.i.h.bf16 %v7308_v22  ;;  %v7309_v11 = vunpack.i.l.bf16 %v7308_v22 }
 0xc5a   : > { %v5666_v33 = vsel %vm5663_vm4, %v5633_v26, %v7304_v5  ;;  %v5667_v47 = vsel %vm5663_vm4, %v5634_v56, %v7305_v2 }
 0xc5b   : > { %v5697_v24 = vpack.c.bf16 %v5667_v47, %v5666_v33  ;;  %v5665_v25 = vsel %vm5663_vm4, %v5632_v30, %v7310_v31  ;;  %v5664_v18 = vsel %vm5663_vm4, %v5631_v17, %v7309_v11  ;;  %v11058_v42 = vpop.permute.xlu0 %7317 }
 0xc5c   : > { %v5696_v40 = vpack.c.bf16 %v5665_v25, %v5664_v18  ;;  %v11062_v48 = vpop.permute.xlu1 %7312  ;;  %v7319_v12 = vunpack.i.l.bf16 %v11058_v42  ;;  %v7320_v41 = vunpack.i.h.bf16 %v11058_v42 }
 0xc5e   : > { %7093 = vmatprep.mubr.msk.bf16.mxu1 %vm391_vm0, %v5696_v40  ;;  %v5649_v59 = vsel %vm5630_vm3, %v5616_v46, %v7319_v12 }
 0xc5f   : > { %v7323_v9 = vpop.permute.xlu0 %7322  ;;  %7094 = vmatmul.mubr.msk.bf16.vlgmr.msra.gmra.mrb[120].mxu1 %vm391_vm0, %v5697_v24  ;;  %v7295_v24 = vunpack.i.h.bf16 %v11035_v54 }
 0xc60   : > { %v7325_v32 = vunpack.i.h.bf16 %v7323_v9  ;;  %v7324_v51 = vunpack.i.l.bf16 %v7323_v9  ;;  %v7328_v55 = vpop.permute.xlu1 %7327 }
 0xc61   : > { %v7330_v4 = vunpack.i.h.bf16 %v7328_v55  ;;  %v7329_v62 = vunpack.i.l.bf16 %v7328_v55 }
 0xc62   : > { %v5670_v13 = vsel %vm5663_vm4, %v5637_v0, %v7324_v51  ;;  %v5671_v58 = vsel %vm5663_vm4, %v5638_v20, %v7325_v32 }
 0xc63   : > { %v5699_v1 = vpack.c.bf16 %v5671_v58, %v5670_v13  ;;  %v5669_v34 = vsel %vm5663_vm4, %v5636_v19, %v7330_v4  ;;  %v5668_v21 = vsel %vm5663_vm4, %v5635_v49, %v7329_v62  ;;  %v11088_v17 = vpop.permute.xlu0 %7337 }
 0xc64   : > { %v5698_v39 = vpack.c.bf16 %v5669_v34, %v5668_v21  ;;  %v11090_v43 = vpop.permute.xlu1 %7332  ;;  %v7340_v4 = vunpack.i.h.bf16 %v11088_v17  ;;  %v7339_v19 = vunpack.i.l.bf16 %v11088_v17 }
 0xc65   : > { %v7335_v13 = vunpack.i.h.bf16 %v11090_v43  ;;  %v7334_v34 = vunpack.i.l.bf16 %v11090_v43 }
 0xc66   : > { %7097 = vmatprep.mubr.msk.bf16.mxu1 %vm391_vm0, %v5698_v39 }
 0xc67   : > { %7098 = vmatmul.mubr.msk.bf16.gmra.mrb[124].mxu1 %vm391_vm0, %v5699_v1 }
 0xc89   : > { %v7343_v10 = vpop.permute.xlu0 %7342 }
 0xc8a   : > { %v7345_v57 = vunpack.i.h.bf16 %v7343_v10  ;;  %v7344_v36 = vunpack.i.l.bf16 %v7343_v10  ;;  %v7348_v35 = vpop.permute.xlu1 %7347 }
 0xc8b   : > { %v7350_v2 = vunpack.i.h.bf16 %v7348_v35  ;;  %v7349_v5 = vunpack.i.l.bf16 %v7348_v35 }
 0xc8c   : > { %v5674_v22 = vsel %vm5663_vm4, %v10929_v38, %v7344_v36  ;;  %v5675_v26 = vsel %vm5663_vm4, %v10932_v37, %v7345_v57 }
 0xc8d   : > { %v5701_v56 = vpack.c.bf16 %v5675_v26, %v5674_v22  ;;  %v5673_v31 = vsel %vm5663_vm4, %v10918_v50, %v7350_v2  ;;  %v5672_v11 = vsel %vm5663_vm4, %v10915_v8, %v7349_v5  ;;  %v11100_v30 = vpop.permute.xlu0 %7357  ;;  %v7294_v50 = vunpack.i.l.bf16 %v11035_v54  ;;  %v11709_v26 = vld [vmem:[#allocation30_spill] sm:$0xff] }
 0xc8e   : > { %v5700_v44 = vpack.c.bf16 %v5673_v31, %v5672_v11  ;;  %v11102_v33 = vpop.permute.xlu1 %7352  ;;  %v7300_v8 = vunpack.i.h.bf16 %v11031_v14  ;;  %v7315_v14 = vunpack.i.h.bf16 %v11062_v48  ;;  %v7360_v36 = vunpack.i.h.bf16 %v11100_v30  ;;  %v11711_v11 = vld [vmem:[#allocation31_spill] sm:$0xff] }
 0xc8f   : > { %v7359_v35 = vunpack.i.l.bf16 %v11100_v30  ;;  %v7355_v5 = vunpack.i.h.bf16 %v11102_v33  ;;  %v7354_v22 = vunpack.i.l.bf16 %v11102_v33  ;;  %v5621_v43 = vsel %vm637_vm1, %v11709_v26, %v7340_v4 }
 0xc90   : > { %7101 = vmatprep.mubr.msk.bf16.mxu1 %vm391_vm0, %v5700_v44  ;;  %v5617_v42 = vsel %vm637_vm1, %v11708_v60, %v7300_v8  ;;  %v5619_v44 = vsel %vm637_vm1, %v11711_v11, %v7335_v13  ;;  %v5654_v33 = vsel %vm5630_vm3, %v5621_v43, %v7360_v36  ;;  %v11717_v11 = vld [vmem:[#allocation38_spill] sm:$0xff] }
 0xc91   : > { %v7363_v47 = vpop.permute.xlu0 %7362  ;;  %7102 = vmatmul.mubr.msk.bf16.gmra.mrb[128].mxu1 %vm391_vm0, %v5701_v56  ;;  %v11710_v56 = vld [vmem:[#allocation28_spill] sm:$0xff] }
 0xc92   : > { %v7365_v38 = vunpack.i.h.bf16 %v7363_v47  ;;  %v7364_v63 = vunpack.i.l.bf16 %v7363_v47  ;;  %v7368_v37 = vpop.permute.xlu1 %7367  ;;  %v5620_v31 = vsel %vm637_vm1, %v11710_v56, %v7339_v19  ;;  %v11712_v47 = vld [vmem:[#allocation29_spill] sm:$0xff] }
 0xc93   : > { %v7370_v25 = vunpack.i.h.bf16 %v7368_v37  ;;  %v7369_v18 = vunpack.i.l.bf16 %v7368_v37  ;;  %v5618_v30 = vsel %vm637_vm1, %v11712_v47, %v7334_v34  ;;  %v11718_v47 = vld [vmem:[#allocation36_spill] sm:$0xff] }
 0xc94   : > { %v5678_v7 = vsel %vm5663_vm4, %v10945_v52, %v7364_v63  ;;  %v5679_v40 = vsel %vm5663_vm4, %v10948_v3, %v7365_v38  ;;  %v7314_v3 = vunpack.i.l.bf16 %v11062_v48  ;;  %v5650_v48 = vsel %vm5630_vm3, %v5617_v42, %v7320_v41  ;;  %v11714_v42 = vld [vmem:[#allocation32_spill] sm:$0xff] }
 0xc95   : > { %v5703_v29 = vpack.c.bf16 %v5679_v40, %v5678_v7  ;;  %v5677_v15 = vsel %vm5663_vm4, %v10938_v27, %v7370_v25  ;;  %v5676_v54 = vsel %vm5663_vm4, %v10935_v6, %v7369_v18  ;;  %v11119_v28 = vpop.permute.xlu0 %7377  ;;  %v11706_v27 = vld [vmem:[#allocation27_spill] sm:$0xff]  ;;  %v11707_v6 = vld [vmem:[#allocation25_spill] sm:$0xff]  ;;  %v5653_v63 = vsel %vm5630_vm3, %v5620_v31, %v7359_v35 }
 0xc96   : > { %v5702_v45 = vpack.c.bf16 %v5677_v15, %v5676_v54  ;;  %v11123_v52 = vpop.permute.xlu1 %7372  ;;  %v5615_v9 = vsel %vm637_vm1, %v11706_v27, %v7295_v24  ;;  %v5614_v53 = vsel %vm637_vm1, %v11707_v6, %v7294_v50  ;;  %v5651_v25 = vsel %vm5630_vm3, %v5618_v30, %v7354_v22 }
 0xc97   : > { %v5648_v32 = vsel %vm5630_vm3, %v5615_v9, %v7315_v14  ;;  %v5647_v20 = vsel %vm5630_vm3, %v5614_v53, %v7314_v3  ;;  %v5652_v18 = vsel %vm5630_vm3, %v5619_v44, %v7355_v5  ;;  %v7380_v7 = vunpack.i.h.bf16 %v11119_v28  ;;  %v11713_v53 = vld [vmem:[#allocation34_spill] sm:$0xff] }
 0xc98   : > { %7105 = vmatprep.mubr.msk.bf16.mxu1 %vm391_vm0, %v5702_v45  ;;  %v7379_v40 = vunpack.i.l.bf16 %v11119_v28  ;;  %v7375_v15 = vunpack.i.h.bf16 %v11123_v52  ;;  %v7374_v3 = vunpack.i.l.bf16 %v11123_v52  ;;  %v11716_v52 = vld [vmem:[#allocation33_spill] sm:$0xff] }
 0xc99   : > { %v7383_v23 = vpop.permute.xlu0 %7382  ;;  %7106 = vmatmul.mubr.msk.bf16.gmra.mrb[132].mxu1 %vm391_vm0, %v5703_v29  ;;  %v5625_v60 = vsel %vm637_vm1, %v11713_v53, %v7380_v7 }
 0xc9a   : > { %v7385_v51 = vunpack.i.h.bf16 %v7383_v23  ;;  %v7384_v55 = vunpack.i.l.bf16 %v7383_v23  ;;  %v7388_v0 = vpop.permute.xlu1 %7387  ;;  %v11715_v23 = vld [vmem:[#allocation35_spill] sm:$0xff] }
 0xc9b   : > { %v7390_v62 = vunpack.i.h.bf16 %v7388_v0  ;;  %v7389_v49 = vunpack.i.l.bf16 %v7388_v0 }
 0xc9c   : > { %v5682_v58 = vsel %vm5663_vm4, %v5649_v59, %v7384_v55  ;;  %v5683_v1 = vsel %vm5663_vm4, %v5650_v48, %v7385_v51  ;;  %v5624_v59 = vsel %vm637_vm1, %v11714_v42, %v7379_v40  ;;  %v5623_v48 = vsel %vm637_vm1, %v11715_v23, %v7375_v15 }
 0xc9d   : > { %v5705_v21 = vpack.c.bf16 %v5683_v1, %v5682_v58  ;;  %v5681_v39 = vsel %vm5663_vm4, %v5648_v32, %v7390_v62  ;;  %v5680_v10 = vsel %vm5663_vm4, %v5647_v20, %v7389_v49  ;;  %v7398_v57 = vpop.permute.xlu0 %7397  ;;  %v5622_v51 = vsel %vm637_vm1, %v11716_v52, %v7374_v3 }
 0xc9e   : > { %v5704_v2 = vpack.c.bf16 %v5681_v39, %v5680_v10  ;;  %v7393_v17 = vpop.permute.xlu1 %7392  ;;  %v7399_v16 = vunpack.i.l.bf16 %v7398_v57  ;;  %v7400_v9 = vunpack.i.h.bf16 %v7398_v57 }
 0xc9f   : > { %v7395_v6 = vunpack.i.h.bf16 %v7393_v17  ;;  %v7394_v28 = vunpack.i.l.bf16 %v7393_v17 }
 0xca0   : > { %7109 = vmatprep.mubr.msk.bf16.mxu1 %vm391_vm0, %v5704_v2  ;;  %v5657_v55 = vsel %vm5630_vm3, %v5624_v59, %v7399_v16  ;;  %v5658_v62 = vsel %vm5630_vm3, %v5625_v60, %v7400_v9  ;;  %v11216_v16 = vld [vmem:[%s11327_s5] ss:$0 sm:$0xff] }
 0xca1   : > { %v7403_v38 = vpop.permute.xlu0 %7402  ;;  %7110 = vmatmul.mubr.msk.bf16.gmra.mrb[136].mxu1 %vm391_vm0, %v5705_v21  ;;  %v5656_v49 = vsel %vm5630_vm3, %v5623_v48, %v7395_v6  ;;  %v5655_v58 = vsel %vm5630_vm3, %v5622_v51, %v7394_v28 }
 0xca2   : > { %v7405_v37 = vunpack.i.h.bf16 %v7403_v38  ;;  %v7404_v24 = vunpack.i.l.bf16 %v7403_v38  ;;  %v7408_v50 = vpop.permute.xlu1 %7407 }
 0xca3   : > { %v7410_v8 = vunpack.i.h.bf16 %v7408_v50  ;;  %v7409_v61 = vunpack.i.l.bf16 %v7408_v50 }
 0xca4   : > { %v5686_v12 = vsel %vm5663_vm4, %v5653_v63, %v7404_v24  ;;  %v5687_v29 = vsel %vm5663_vm4, %v5654_v33, %v7405_v37  ;;  %v11719_v63 = vld [vmem:[#allocation39_spill] sm:$0xff]  ;;  %v11720_v37 = vld [vmem:[#allocation37_spill] sm:$0xff] }
 0xca5   : > { %v5707_v54 = vpack.c.bf16 %v5687_v29, %v5686_v12  ;;  %v5685_v41 = vsel %vm5663_vm4, %v5652_v18, %v7410_v8  ;;  %v5684_v14 = vsel %vm5663_vm4, %v5651_v25, %v7409_v61  ;;  %v7418_v45 = vpop.permute.xlu0 %7417 }
 0xca6   : > { %v5706_v46 = vpack.c.bf16 %v5685_v41, %v5684_v14  ;;  %v7413_v27 = vpop.permute.xlu1 %7412  ;;  %v7420_v1 = vunpack.i.h.bf16 %v7418_v45  ;;  %v7419_v39 = vunpack.i.l.bf16 %v7418_v45 }
 0xca7   : > { %v7415_v2 = vunpack.i.h.bf16 %v7413_v27  ;;  %v7414_v17 = vunpack.i.l.bf16 %v7413_v27 }
 0xca8   : > { %7113 = vmatprep.mubr.msk.bf16.mxu1 %vm391_vm0, %v5706_v46  ;;  %v5629_v44 = vsel %vm637_vm1, %v11717_v11, %v7420_v1  ;;  %v5628_v30 = vsel %vm637_vm1, %v11718_v47, %v7419_v39 }
 0xca9   : > { %v7423_v32 = vpop.permute.xlu0 %7422  ;;  %7114 = vmatmul.mubr.msk.bf16.gmra.mrb[140].mxu1 %vm391_vm0, %v5707_v54  ;;  %v5627_v33 = vsel %vm637_vm1, %v11719_v63, %v7415_v2  ;;  %v5626_v24 = vsel %vm637_vm1, %v11720_v37, %v7414_v17 }
 0xcaa   : > { %v7425_v0 = vunpack.i.h.bf16 %v7423_v32  ;;  %v7424_v20 = vunpack.i.l.bf16 %v7423_v32  ;;  %v7428_v4 = vpop.permute.xlu1 %7427 }
 0xcab   : > { %v7430_v19 = vunpack.i.h.bf16 %v7428_v4  ;;  %v7429_v13 = vunpack.i.l.bf16 %v7428_v4 }
 0xcac   : > { %v5690_v34 = vsel %vm5663_vm4, %v5657_v55, %v7424_v20  ;;  %v5691_v21 = vsel %vm5663_vm4, %v5658_v62, %v7425_v0 }
 0xcad   : > { %v5709_v10 = vpack.c.bf16 %v5691_v21, %v5690_v34  ;;  %v5689_v57 = vsel %vm5663_vm4, %v5656_v49, %v7430_v19  ;;  %v5688_v36 = vsel %vm5663_vm4, %v5655_v58, %v7429_v13  ;;  %v7438_v35 = vpop.permute.xlu0 %7437 }
 0xcae   : > { %v5708_v5 = vpack.c.bf16 %v5689_v57, %v5688_v36  ;;  %v7433_v22 = vpop.permute.xlu1 %7432  ;;  %v7440_v26 = vunpack.i.h.bf16 %v7438_v35  ;;  %v7439_v43 = vunpack.i.l.bf16 %v7438_v35 }
 0xcaf   : > { %v7435_v56 = vunpack.i.h.bf16 %v7433_v22  ;;  %v7434_v31 = vunpack.i.l.bf16 %v7433_v22 }
 0xcb0   : > { %7117 = vmatprep.mubr.msk.bf16.mxu1 %vm391_vm0, %v5708_v5  ;;  %v5661_v8 = vsel %vm5630_vm3, %v5628_v30, %v7439_v43  ;;  %v5662_v61 = vsel %vm5630_vm3, %v5629_v44, %v7440_v26 }
 0xcb1   : > { %v7448_v38 = vpop.permute.xlu0 %7447  ;;  %7118 = vmatmul.mubr.msk.bf16.gmra.mrb[144].mxu1 %vm391_vm0, %v5709_v10  ;;  %v5660_v12 = vsel %vm5630_vm3, %v5627_v33, %v7435_v56  ;;  %v5659_v29 = vsel %vm5630_vm3, %v5626_v24, %v7434_v31 }
 0xcb2   : > { %v7450_v50 = vunpack.i.h.bf16 %v7448_v38  ;;  %v7449_v25 = vunpack.i.l.bf16 %v7448_v38  ;;  %v7443_v18 = vpop.permute.xlu1 %7442 }
 0xcb3   : > { %v7445_v7 = vunpack.i.h.bf16 %v7443_v18  ;;  %v7444_v40 = vunpack.i.l.bf16 %v7443_v18 }
 0xcb4   : > { %v5694_v15 = vsel %vm5663_vm4, %v5661_v8, %v7449_v25  ;;  %v5695_v54 = vsel %vm5663_vm4, %v5662_v61, %v7450_v50 }
 0xcb5   : > { %v5711_v41 = vpack.c.bf16 %v5695_v54, %v5694_v15  ;;  %v5693_v14 = vsel %vm5663_vm4, %v5660_v12, %v7445_v7  ;;  %v5692_v45 = vsel %vm5663_vm4, %v5659_v29, %v7444_v40 }
 0xcb6   : > { %v5710_v3 = vpack.c.bf16 %v5693_v14, %v5692_v45 }
 0xcb8   : > { %7121 = vmatprep.mubr.msk.bf16.mxu1 %vm391_vm0, %v5710_v3 }
 0xcb9   : > { %7122 = vmatmul.mubr.msk.bf16.gmra.mrb[148].mxu1 %vm391_vm0, %v5711_v41 }
 0xd32   : > { %v7095_v46 = vpop.f32.mrb[120].mxu1 }
 0xd33   : > { %v5826_v27 = vadd.f32 %v7095_v46, %v11216_v16  ;;  %v5817_v9 = vpop.f32.mrb[121].mxu1 }
 0xd34   : > { %v5818_v6 = vadd.f32 %v11216_v16, %v5817_v9  ;;  %v7096_v28 = vpop.f32.mrb[122].mxu1 }
 0xd35   : > { %5946 = vst.msk [vmem:[%s11221_s9 + $0x10] sm:$0xff] %vm391_vm0, %v5826_v27  ;;  %v5829_v53 = vadd.f32 %v7096_v28, %v11216_v16  ;;  %v5820_v60 = vpop.f32.mrb[123].mxu1 }
 0xd36   : > { %5944 = vst.msk [vmem:[%s11221_s9] sm:$0xff] %vm391_vm0, %v5818_v6  ;;  %v5821_v42 = vadd.f32 %v11216_v16, %v5820_v60 }
 0xd37   : > { %5947 = vst.msk [vmem:[%s11221_s9 + $0x18] sm:$0xff] %vm391_vm0, %v5829_v53 }
 0xd38   : > { %5945 = vst.msk [vmem:[%s11221_s9 + $0x8] sm:$0xff] %vm391_vm0, %v5821_v42 }
 0xd3a   : > { %v7099_v59 = vpop.f32.mrb[124].mxu1 }
 0xd3b   : > { %v5842_v23 = vadd.f32 %v7099_v59, %v11216_v16  ;;  %v5833_v48 = vpop.f32.mrb[125].mxu1 }
 0xd3c   : > { %v5834_v32 = vadd.f32 %v11216_v16, %v5833_v48  ;;  %v7100_v52 = vpop.f32.mrb[126].mxu1 }
 0xd3d   : > { %5950 = vst.msk [vmem:[%s11221_s9 + $0x30] sm:$0xff] %vm391_vm0, %v5842_v23  ;;  %v5845_v51 = vadd.f32 %v7100_v52, %v11216_v16  ;;  %v5836_v55 = vpop.f32.mrb[127].mxu1 }
 0xd3e   : > { %5948 = vst.msk [vmem:[%s11221_s9 + $0x20] sm:$0xff] %vm391_vm0, %v5834_v32  ;;  %v5837_v0 = vadd.f32 %v11216_v16, %v5836_v55 }
 0xd3f   : > { %5951 = vst.msk [vmem:[%s11221_s9 + $0x38] sm:$0xff] %vm391_vm0, %v5845_v51 }
 0xd40   : > { %5949 = vst.msk [vmem:[%s11221_s9 + $0x28] sm:$0xff] %vm391_vm0, %v5837_v0 }
 0xd64   : > { %v7103_v20 = vpop.f32.mrb[128].mxu1 }
 0xd65   : > { %v5858_v4 = vadd.f32 %v7103_v20, %v11216_v16  ;;  %v5849_v62 = vpop.f32.mrb[129].mxu1 }
 0xd66   : > { %v5850_v49 = vadd.f32 %v11216_v16, %v5849_v62  ;;  %v7104_v19 = vpop.f32.mrb[130].mxu1 }
 0xd67   : > { %5954 = vst.msk [vmem:[%s11221_s9 + $0x50] sm:$0xff] %vm391_vm0, %v5858_v4  ;;  %v5861_v13 = vadd.f32 %v7104_v19, %v11216_v16  ;;  %v5852_v58 = vpop.f32.mrb[131].mxu1 }
 0xd68   : > { %5952 = vst.msk [vmem:[%s11221_s9 + $0x40] sm:$0xff] %vm391_vm0, %v5850_v49  ;;  %v5853_v1 = vadd.f32 %v11216_v16, %v5852_v58 }
 0xd69   : > { %5955 = vst.msk [vmem:[%s11221_s9 + $0x58] sm:$0xff] %vm391_vm0, %v5861_v13 }
 0xd6a   : > { %5953 = vst.msk [vmem:[%s11221_s9 + $0x48] sm:$0xff] %vm391_vm0, %v5853_v1 }
 0xd6c   : > { %v7107_v34 = vpop.f32.mrb[132].mxu1 }
 0xd6d   : > { %v5874_v21 = vadd.f32 %v7107_v34, %v11216_v16  ;;  %v5865_v39 = vpop.f32.mrb[133].mxu1 }
 0xd6e   : > { %v5866_v10 = vadd.f32 %v11216_v16, %v5865_v39  ;;  %v7108_v57 = vpop.f32.mrb[134].mxu1 }
 0xd6f   : > { %5958 = vst.msk [vmem:[%s11221_s9 + $0x70] sm:$0xff] %vm391_vm0, %v5874_v21  ;;  %v5877_v36 = vadd.f32 %v7108_v57, %v11216_v16  ;;  %v5868_v35 = vpop.f32.mrb[135].mxu1 }
 0xd70   : > { %5956 = vst.msk [vmem:[%s11221_s9 + $0x60] sm:$0xff] %vm391_vm0, %v5866_v10  ;;  %v5869_v2 = vadd.f32 %v11216_v16, %v5868_v35 }
 0xd71   : > { %5959 = vst.msk [vmem:[%s11221_s9 + $0x78] sm:$0xff] %vm391_vm0, %v5877_v36 }
 0xd72   : > { %5957 = vst.msk [vmem:[%s11221_s9 + $0x68] sm:$0xff] %vm391_vm0, %v5869_v2 }
 0xd74   : > { %v7111_v17 = vpop.f32.mrb[136].mxu1 }
 0xd75   : > { %v5890_v5 = vadd.f32 %v7111_v17, %v11216_v16  ;;  %v5881_v22 = vpop.f32.mrb[137].mxu1 }
 0xd76   : > { %v5882_v26 = vadd.f32 %v11216_v16, %v5881_v22  ;;  %v7112_v43 = vpop.f32.mrb[138].mxu1 }
 0xd77   : > { %5962 = vst.msk [vmem:[%s11221_s9 + $0x90] sm:$0xff] %vm391_vm0, %v5890_v5  ;;  %v5893_v56 = vadd.f32 %v7112_v43, %v11216_v16  ;;  %v5884_v31 = vpop.f32.mrb[139].mxu1 }
 0xd78   : > { %5960 = vst.msk [vmem:[%s11221_s9 + $0x80] sm:$0xff] %vm391_vm0, %v5882_v26  ;;  %v5885_v11 = vadd.f32 %v11216_v16, %v5884_v31 }
 0xd79   : > { %5963 = vst.msk [vmem:[%s11221_s9 + $0x98] sm:$0xff] %vm391_vm0, %v5893_v56 }
 0xd7a   : > { %5961 = vst.msk [vmem:[%s11221_s9 + $0x88] sm:$0xff] %vm391_vm0, %v5885_v11 }
 0xd7c   : > { %v7115_v44 = vpop.f32.mrb[140].mxu1 }
 0xd7d   : > { %v5906_v47 = vadd.f32 %v7115_v44, %v11216_v16  ;;  %v5897_v30 = vpop.f32.mrb[141].mxu1 }
 0xd7e   : > { %v5898_v38 = vadd.f32 %v11216_v16, %v5897_v30  ;;  %v7116_v63 = vpop.f32.mrb[142].mxu1 }
 0xd7f   : > { %5966 = vst.msk [vmem:[%s11221_s9 + $0xb0] sm:$0xff] %vm391_vm0, %v5906_v47  ;;  %v5909_v33 = vadd.f32 %v7116_v63, %v11216_v16  ;;  %v5900_v37 = vpop.f32.mrb[143].mxu1 }
 0xd80   : > { %5964 = vst.msk [vmem:[%s11221_s9 + $0xa0] sm:$0xff] %vm391_vm0, %v5898_v38  ;;  %v5901_v24 = vadd.f32 %v11216_v16, %v5900_v37 }
 0xd81   : > { %5967 = vst.msk [vmem:[%s11221_s9 + $0xb8] sm:$0xff] %vm391_vm0, %v5909_v33 }
 0xd82   : > { %5965 = vst.msk [vmem:[%s11221_s9 + $0xa8] sm:$0xff] %vm391_vm0, %v5901_v24 }
 0xd84   : > { %v7119_v50 = vpop.f32.mrb[144].mxu1 }
 0xd85   : > { %v5922_v25 = vadd.f32 %v7119_v50, %v11216_v16  ;;  %v5913_v18 = vpop.f32.mrb[145].mxu1 }
 0xd86   : > { %v5914_v8 = vadd.f32 %v11216_v16, %v5913_v18  ;;  %v7120_v61 = vpop.f32.mrb[146].mxu1 }
 0xd87   : > { %5970 = vst.msk [vmem:[%s11221_s9 + $0xd0] sm:$0xff] %vm391_vm0, %v5922_v25  ;;  %v5925_v7 = vadd.f32 %v7120_v61, %v11216_v16  ;;  %v5916_v40 = vpop.f32.mrb[147].mxu1 }
 0xd88   : > { %5968 = vst.msk [vmem:[%s11221_s9 + $0xc0] sm:$0xff] %vm391_vm0, %v5914_v8  ;;  %v5917_v12 = vadd.f32 %v11216_v16, %v5916_v40 }
 0xd89   : > { %5971 = vst.msk [vmem:[%s11221_s9 + $0xd8] sm:$0xff] %vm391_vm0, %v5925_v7 }
 0xd8a   : > { %5969 = vst.msk [vmem:[%s11221_s9 + $0xc8] sm:$0xff] %vm391_vm0, %v5917_v12 }
 0xd8c   : > { %v7123_v29 = vpop.f32.mrb[148].mxu1 }
 0xd8d   : > { %v5938_v15 = vadd.f32 %v7123_v29, %v11216_v16  ;;  %v5929_v54 = vpop.f32.mrb[149].mxu1 }
 0xd8e   : > { %v5930_v41 = vadd.f32 %v11216_v16, %v5929_v54  ;;  %v7124_v14 = vpop.f32.mrb[150].mxu1 }
 0xd8f   : > { %5974 = vst.msk [vmem:[%s11221_s9 + $0xf0] sm:$0xff] %vm391_vm0, %v5938_v15  ;;  %v5941_v45 = vadd.f32 %v7124_v14, %v11216_v16  ;;  %v5932_v3 = vpop.f32.mrb[151].mxu1 }
 0xd90   : > { %5972 = vst.msk [vmem:[%s11221_s9 + $0xe0] sm:$0xff] %vm391_vm0, %v5930_v41  ;;  %v5933_v46 = vadd.f32 %v11216_v16, %v5932_v3 }
 0xd91   : > { %5975 = vst.msk [vmem:[%s11221_s9 + $0xf8] sm:$0xff] %vm391_vm0, %v5941_v45 }
 0xd92   : > { %5973 = vst.msk [vmem:[%s11221_s9 + $0xe8] sm:$0xff] %vm391_vm0, %v5933_v46 }
 0xd93 PF: > { %s16_s21 = sadd.s32 1, %s7989_s21  }
 0xd94   : > { %p13_p4 = scmp.ge.s32.totalorder %s16_s21, 4  }
 0xd96   :  { %15 = sbr.rel (!%p13_p4) target bundleno = 1 (0x1), region = 77 }

</bundles_post_ra>
